<compile_context>
chip_gen: v7x
topology: tpu7x:2x2x1
jax: 0.10.0
libtpu: 0.0.40
codegen_flags: <defaults>
</compile_context>

<pallas_src>
import functools
import math

import jax
import jax.numpy as jnp
from jax.experimental import pallas as pl
from jax.experimental.pallas import tpu as pltpu

F32 = jnp.float32
BF16 = jnp.bfloat16
_LN_EPS = 1e-5
_SQRT_HALF = 0.7071067811865476


# ----------------------------- in-kernel helpers -----------------------------
def _gelu(x):  # exact (erf) GELU, matching torch.nn.GELU()
    return 0.5 * x * (1.0 + jax.lax.erf(x * _SQRT_HALF))


def _ln_rows(x, w, b):   # LayerNorm over the last (lane) axis; affine given as (1, C) rows
    mu = jnp.mean(x, axis=-1, keepdims=True)
    var = jnp.mean(jnp.square(x - mu), axis=-1, keepdims=True)
    return (x - mu) * jax.lax.rsqrt(var + _LN_EPS) * w + b


def _ln_cols(x, w, b):   # LayerNorm over the first (sublane) axis; affine given as (C, 1) cols
    mu = jnp.mean(x, axis=0, keepdims=True)
    var = jnp.mean(jnp.square(x - mu), axis=0, keepdims=True)
    return (x - mu) * jax.lax.rsqrt(var + _LN_EPS) * w + b


# bf16-input / f32-accumulate MXU matmuls (no materialized operand transposes).
def _mm(a, b):       # a @ b                (NN)
    return jnp.dot(a.astype(BF16), b.astype(BF16), preferred_element_type=F32)


def _mm_nt(a, b):    # a @ b.T  -- contract last dims     (NT)
    return jax.lax.dot_general(a.astype(BF16), b.astype(BF16),
                               (((1,), (1,)), ((), ())), preferred_element_type=F32)


def _mm_tn(a, b):    # a.T @ b  -- contract first dims    (TN)
    return jax.lax.dot_general(a.astype(BF16), b.astype(BF16),
                               (((0,), (0,)), ((), ())), preferred_element_type=F32)


# ----------------------------- BlockSpec helpers -----------------------------
def _rep_spec(shape):          # whole array, same block every grid step -> resident in VMEM
    n = len(shape)
    return pl.BlockSpec(tuple(shape), lambda b, _n=n: (0,) * _n)


def _batched_spec(shape):      # one batch element per grid step
    n = len(shape)
    return pl.BlockSpec((1,) + tuple(shape), lambda b, _n=n: (b,) + (0,) * _n)


# ----------------------------- fused Block kernel -----------------------------
def _block_kernel(x_ref, parts_ref, *refs, scale):
    (e_nqw, e_nqb, e_nkw, e_nkb, e_nvw, e_nvb,
     e_wq, e_bq, e_wk, e_bk, e_wv, e_bv, e_wp, e_bp,
     d_nqw, d_nqb, d_nkw, d_nkb, d_nvw, d_nvb,
     d_wq, d_bq, d_wk, d_bk, d_wv, d_bv, d_wp, d_bp,
     ef_nw, ef_nb, ef_w1, ef_b1, ef_w2, ef_b2,
     f1_nw, f1_nb, f1_w1, f1_b1, f1_w2, f1_b2,
     g_w1, g_b1, g_w2, g_b2,
     r_nw, r_nb, r_w1, r_b1, r_w2, r_b2, r_w3, r_b3) = refs[:52]
    feats_ref, a0_ref, a1_ref = refs[52:]

    x_cp = x_ref[0]            # (C, P)  native 'b c p' layout
    parts = parts_ref[0]       # (N, C)

    # ---- shared LayerNorm statistics of x over channels (enc nk/nv and dec nq reuse them) ----
    mu = jnp.mean(x_cp, axis=0, keepdims=True)
    var = jnp.mean(jnp.square(x_cp - mu), axis=0, keepdims=True)
    xn_cp = (x_cp - mu) * jax.lax.rsqrt(var + _LN_EPS)                         # (C, P)

    # ---- enc_attn shared K / V (identical for both enc-attention calls; computed once) ----
    k_enc = _mm_tn(xn_cp * e_nkw[...] + e_nkb[...], e_wk[...]) + e_bk[...]     # (P, C)
    v_enc = _mm_tn(xn_cp * e_nvw[...] + e_nvb[...], e_wv[...]) + e_bv[...]     # (P, C)

    def enc_attention(q_in):
        """AnyAttention(q=q_in, k=v=x).  Returns (max_k relu(qk)*scale : (1,N), out : (N,C))."""
        qn = _ln_rows(q_in, e_nqw[...], e_nqb[...])
        q_proj = _mm(qn, e_wq[...]) + e_bq[...]                                # (N, C)
        s = jnp.maximum(_mm_nt(k_enc, q_proj), 0.0) * scale                    # (K=P, Q=N)
        m = jnp.max(s, axis=0, keepdims=True)                                  # (1, N) lane-dense
        e = jnp.exp(s - m)
        p = e * pl.reciprocal(jnp.sum(e, axis=0, keepdims=True), approx=True)
        out = _mm_tn(p, v_enc)                                                 # (N, C) = softmax @ V
        return m, _mm(out, e_wp[...]) + e_bp[...]

    def group_compact(t):      # SimpleReasoning: sigmoid gate from per-part channel max
        m = jnp.max(t, axis=-1, keepdims=True)                                 # (N, 1)
        # tiny (N x Hg) gate -- stays f32; matmul cost is negligible at this width
        h = _gelu(jnp.dot(g_w1[...], m, preferred_element_type=F32) + g_b1[...])
        s = jax.nn.sigmoid(jnp.dot(g_w2[...], h, preferred_element_type=F32) + g_b2[...])
        return s * t + t

    def enc_ffn(t):            # Mlp(dim, hidden=dim)
        y = _ln_rows(t, ef_nw[...], ef_nb[...])
        h = _gelu(_mm(y, ef_w1[...]) + ef_b1[...])
        return _mm(h, ef_w2[...]) + ef_b2[...]

    # -------------------- parts branch --------------------
    m0, a_out = enc_attention(parts)
    parts1 = parts + a_out
    parts2 = group_compact(parts1)
    parts_out = parts2 + enc_ffn(parts2) + parts1
    parts_d = parts + parts_out

    m1, a_out = enc_attention(parts_d)
    parts1_d = parts_d + a_out
    parts_comp = group_compact(parts1_d)
    parts_in = parts_comp + enc_ffn(parts_comp) + parts1_d

    a0_ref[0] = m0
    a1_ref[0] = m1

    # -------------------- decoder attention (q = x, k = v = parts_in) --------------------
    q_dec = _mm_tn(xn_cp * d_nqw[...] + d_nqb[...], d_wq[...]) + d_bq[...]     # (P, C)
    k_dec = _mm(_ln_rows(parts_in, d_nkw[...], d_nkb[...]), d_wk[...]) + d_bk[...]   # (N, C)
    v_dec = _mm(_ln_rows(parts_in, d_nvw[...], d_nvb[...]), d_wv[...]) + d_bv[...]   # (N, C)

    s = jnp.maximum(_mm_nt(k_dec, q_dec), 0.0) * scale                         # (K=N, Q=P)
    sm = jnp.max(s, axis=0, keepdims=True)                                     # (1, P)
    e = jnp.exp(s - sm)
    pm = e * pl.reciprocal(jnp.sum(e, axis=0, keepdims=True), approx=True)     # (N, P)
    av_cp = _mm_tn(v_dec, pm)                                                  # (C, P) = (softmax@V)^T
    feats = x_cp + _mm_tn(d_wp[...], av_cp) + d_bp[...]                        # residual, channel-major

    # -------------------- Tokenmix (reason): LN over channels, MLP over patch axis --------------------
    y = _ln_cols(feats, r_nw[...], r_nb[...])                                  # (C, P)
    g = _gelu(_mm(y, r_w1[...]) + r_b1[...])                                   # (C, TH)
    g = _gelu(_mm(g, r_w2[...]) + r_b2[...])                                   # (C, TH)
    feats = feats + (_mm(g, r_w3[...]) + r_b3[...])                            # (C, P)

    # -------------------- ffn1 (Mlp dim -> ffn_exp*dim -> dim), channel-major --------------------
    y = _ln_cols(feats, f1_nw[...], f1_nb[...])
    h = _gelu(_mm_tn(f1_w1[...], y) + f1_b1[...])                              # (H, P)
    feats_ref[0] = feats + _mm_tn(f1_w2[...], h) + f1_b2[...]                  # (C, P) native 'b c p'


# ----------------------------- parameters -----------------------------
def init_params(key, dim, seq, num_parts, num_g, ffn_exp, tm_hidden):
    it = iter(jax.random.split(key, 64))

    def w_mat(in_d, out_d, dtype=BF16):      # math layout (in, out); bf16 for the MXU
        return (jax.random.normal(next(it), (in_d, out_d), F32) / math.sqrt(in_d)).astype(dtype)

    def b_row(d):
        return 0.01 * jax.random.normal(next(it), (1, d), F32)

    def b_col(d):
        return 0.01 * jax.random.normal(next(it), (d, 1), F32)

    def ln_row(d):   # affine for (rows, d) tiles
        return (1.0 + 0.01 * jax.random.normal(next(it), (1, d), F32),
                0.01 * jax.random.normal(next(it), (1, d), F32))

    def ln_col(d):   # affine for (d, cols) channel-major tiles
        return (1.0 + 0.01 * jax.random.normal(next(it), (d, 1), F32),
                0.01 * jax.random.normal(next(it), (d, 1), F32))

    def enc_attn_params():
        nqw, nqb = ln_row(dim)          # q = parts          (N, C) rows
        nkw, nkb = ln_col(dim)          # k = v = x          (C, P) channel-major
        nvw, nvb = ln_col(dim)
        return {"nqw": nqw, "nqb": nqb, "nkw": nkw, "nkb": nkb, "nvw": nvw, "nvb": nvb,
                "wq": w_mat(dim, dim), "bq": b_row(dim),
                "wk": w_mat(dim, dim), "bk": b_row(dim),
                "wv": w_mat(dim, dim), "bv": b_row(dim),
                "wp": w_mat(dim, dim), "bp": b_row(dim)}

    def dec_attn_params():
        nqw, nqb = ln_col(dim)          # q = x              (C, P) channel-major
        nkw, nkb = ln_row(dim)          # k = v = parts_in   (N, C) rows
        nvw, nvb = ln_row(dim)
        return {"nqw": nqw, "nqb": nqb, "nkw": nkw, "nkb": nkb, "nvw": nvw, "nvb": nvb,
                "wq": w_mat(dim, dim), "bq": b_row(dim),
                "wk": w_mat(dim, dim), "bk": b_row(dim),
                "wv": w_mat(dim, dim), "bv": b_row(dim),
                "wp": w_mat(dim, dim), "bp": b_col(dim)}    # output kept channel-major

    h_g = num_parts // num_g
    hidden1 = dim * ffn_exp

    enc_ffn = {}
    enc_ffn["nw"], enc_ffn["nb"] = ln_row(dim)
    enc_ffn.update(w1=w_mat(dim, dim), b1=b_row(dim), w2=w_mat(dim, dim), b2=b_row(dim))

    ffn1 = {}
    ffn1["nw"], ffn1["nb"] = ln_col(dim)
    ffn1.update(w1=w_mat(dim, hidden1), b1=b_col(hidden1),
                w2=w_mat(hidden1, dim), b2=b_col(dim))

    group = {"w1": jax.random.normal(next(it), (h_g, num_parts), F32) / math.sqrt(num_parts),
             "b1": b_col(h_g),
             "w2": jax.random.normal(next(it), (num_parts, h_g), F32) / math.sqrt(h_g),
             "b2": b_col(num_parts)}

    # Tokenmix in the reference hard-codes Linear(196,512)/(512,512)/(512,196); here the
    # token axis (=seq) and hidden width are parameterised so the same semantics run at
    # small test shapes.
    reason = {}
    reason["nw"], reason["nb"] = ln_col(dim)
    reason.update(w1=w_mat(seq, tm_hidden), b1=b_row(tm_hidden),
                  w2=w_mat(tm_hidden, tm_hidden), b2=b_row(tm_hidden),
                  w3=w_mat(tm_hidden, seq), b3=b_row(seq))

    return {"enc_attn": enc_attn_params(), "dec_attn": dec_attn_params(),
            "enc_ffn": enc_ffn, "ffn1": ffn1, "group_compact": group, "reason": reason}


def _flatten_params(p):
    e, d = p["enc_attn"], p["dec_attn"]
    ef, f1 = p["enc_ffn"], p["ffn1"]
    g, r = p["group_compact"], p["reason"]
    return [
        e["nqw"], e["nqb"], e["nkw"], e["nkb"], e["nvw"], e["nvb"],
        e["wq"], e["bq"], e["wk"], e["bk"], e["wv"], e["bv"], e["wp"], e["bp"],
        d["nqw"], d["nqb"], d["nkw"], d["nkb"], d["nvw"], d["nvb"],
        d["wq"], d["bq"], d["wk"], d["bk"], d["wv"], d["bv"], d["wp"], d["bp"],
        ef["nw"], ef["nb"], ef["w1"], ef["b1"], ef["w2"], ef["b2"],
        f1["nw"], f1["nb"], f1["w1"], f1["b1"], f1["w2"], f1["b2"],
        g["w1"], g["b1"], g["w2"], g["b2"],
        r["nw"], r["nb"], r["w1"], r["b1"], r["w2"], r["b2"], r["w3"], r["b3"],
    ]


# ----------------------------- Block.forward -----------------------------
def block_forward(x, parts, params):
    """x: (B, C, P) ('b c p'), parts: (B, N, C).  Returns (feats (B,C,P), attn_0 (B,N), attn_1 (B,N))."""
    B, C, P = x.shape
    N = parts.shape[1]
    weights = _flatten_params(params)
    kernel = functools.partial(_block_kernel, scale=float(C) ** -0.5)
    feats, a0, a1 = pl.pallas_call(
        kernel,
        grid=(B,),
        in_specs=[_batched_spec((C, P)), _batched_spec((N, C))]
                 + [_rep_spec(w.shape) for w in weights],
        out_specs=(_batched_spec((C, P)), _batched_spec((1, N)), _batched_spec((1, N))),
        out_shape=(jax.ShapeDtypeStruct((B, C, P), F32),
                   jax.ShapeDtypeStruct((B, 1, N), F32),
                   jax.ShapeDtypeStruct((B, 1, N), F32)),
        compiler_params=pltpu.CompilerParams(
            dimension_semantics=("parallel",)),   # batch steps are independent (v7x: 2 TCs)
    )(x, parts, *weights)
    return feats, a0[:, 0, :], a1[:, 0, :]


if __name__ == "__main__":
    B, dim, seq, num_parts, num_g, ffn_exp = 2, 32, 16, 12, 6, 4
    tm_hidden = 64   # Tokenmix hidden width (512 at production scale)

    key = jax.random.PRNGKey(0)
    kx, kp, kw = jax.random.split(key, 3)
    x = jax.random.normal(kx, (B, dim, seq), F32)                   # 'b c p'
    parts = jax.random.normal(kp, (B, num_parts, dim), F32)         # 'b q c'
    params = init_params(kw, dim, seq, num_parts, num_g, ffn_exp, tm_hidden)

    feats, attn_0, attn_1 = jax.jit(block_forward)(x, parts, params)
    jax.block_until_ready((feats, attn_0, attn_1))

    assert feats.shape == (B, dim, seq)
    assert attn_0.shape == (B, num_parts)
    assert attn_1.shape == (B, num_parts)
    assert bool(jnp.all(jnp.isfinite(feats)))
    assert bool(jnp.all(jnp.isfinite(attn_0))) and bool(jnp.all(jnp.isfinite(attn_1)))
    print("KERNEL_OK")
</pallas_src>

<mosaic_0001>
module attributes {stable_mosaic.version = 11 : i64} {
  func.func @_block_kernel(%arg0: i32, %arg1: memref<1x32x16xf32, #tpu.memory_space<vmem>>, %arg2: memref<1x12x32xf32, #tpu.memory_space<vmem>>, %arg3: memref<1x32xf32, #tpu.memory_space<vmem>>, %arg4: memref<1x32xf32, #tpu.memory_space<vmem>>, %arg5: memref<32x1xf32, #tpu.memory_space<vmem>>, %arg6: memref<32x1xf32, #tpu.memory_space<vmem>>, %arg7: memref<32x1xf32, #tpu.memory_space<vmem>>, %arg8: memref<32x1xf32, #tpu.memory_space<vmem>>, %arg9: memref<32x32xbf16, #tpu.memory_space<vmem>>, %arg10: memref<1x32xf32, #tpu.memory_space<vmem>>, %arg11: memref<32x32xbf16, #tpu.memory_space<vmem>>, %arg12: memref<1x32xf32, #tpu.memory_space<vmem>>, %arg13: memref<32x32xbf16, #tpu.memory_space<vmem>>, %arg14: memref<1x32xf32, #tpu.memory_space<vmem>>, %arg15: memref<32x32xbf16, #tpu.memory_space<vmem>>, %arg16: memref<1x32xf32, #tpu.memory_space<vmem>>, %arg17: memref<32x1xf32, #tpu.memory_space<vmem>>, %arg18: memref<32x1xf32, #tpu.memory_space<vmem>>, %arg19: memref<1x32xf32, #tpu.memory_space<vmem>>, %arg20: memref<1x32xf32, #tpu.memory_space<vmem>>, %arg21: memref<1x32xf32, #tpu.memory_space<vmem>>, %arg22: memref<1x32xf32, #tpu.memory_space<vmem>>, %arg23: memref<32x32xbf16, #tpu.memory_space<vmem>>, %arg24: memref<1x32xf32, #tpu.memory_space<vmem>>, %arg25: memref<32x32xbf16, #tpu.memory_space<vmem>>, %arg26: memref<1x32xf32, #tpu.memory_space<vmem>>, %arg27: memref<32x32xbf16, #tpu.memory_space<vmem>>, %arg28: memref<1x32xf32, #tpu.memory_space<vmem>>, %arg29: memref<32x32xbf16, #tpu.memory_space<vmem>>, %arg30: memref<32x1xf32, #tpu.memory_space<vmem>>, %arg31: memref<1x32xf32, #tpu.memory_space<vmem>>, %arg32: memref<1x32xf32, #tpu.memory_space<vmem>>, %arg33: memref<32x32xbf16, #tpu.memory_space<vmem>>, %arg34: memref<1x32xf32, #tpu.memory_space<vmem>>, %arg35: memref<32x32xbf16, #tpu.memory_space<vmem>>, %arg36: memref<1x32xf32, #tpu.memory_space<vmem>>, %arg37: memref<32x1xf32, #tpu.memory_space<vmem>>, %arg38: memref<32x1xf32, #tpu.memory_space<vmem>>, %arg39: memref<32x128xbf16, #tpu.memory_space<vmem>>, %arg40: memref<128x1xf32, #tpu.memory_space<vmem>>, %arg41: memref<128x32xbf16, #tpu.memory_space<vmem>>, %arg42: memref<32x1xf32, #tpu.memory_space<vmem>>, %arg43: memref<2x12xf32, #tpu.memory_space<vmem>>, %arg44: memref<2x1xf32, #tpu.memory_space<vmem>>, %arg45: memref<12x2xf32, #tpu.memory_space<vmem>>, %arg46: memref<12x1xf32, #tpu.memory_space<vmem>>, %arg47: memref<32x1xf32, #tpu.memory_space<vmem>>, %arg48: memref<32x1xf32, #tpu.memory_space<vmem>>, %arg49: memref<16x64xbf16, #tpu.memory_space<vmem>>, %arg50: memref<1x64xf32, #tpu.memory_space<vmem>>, %arg51: memref<64x64xbf16, #tpu.memory_space<vmem>>, %arg52: memref<1x64xf32, #tpu.memory_space<vmem>>, %arg53: memref<64x16xbf16, #tpu.memory_space<vmem>>, %arg54: memref<1x16xf32, #tpu.memory_space<vmem>>, %arg55: memref<1x32x16xf32, #tpu.memory_space<vmem>>, %arg56: memref<1x1x12xf32, #tpu.memory_space<vmem>>, %arg57: memref<1x1x12xf32, #tpu.memory_space<vmem>>) attributes {dimension_semantics = [#tpu.dimension_semantics<parallel>], iteration_bounds = array<i64: 2>, scalar_prefetch = 0 : i64, scratch_operands = 0 : i64, tpu.core_type = #tpu.core_type<tc>, window_params = [{transform_indices = @transform_0, window_bounds = array<i64: 1, 32, 16>}, {transform_indices = @transform_1, window_bounds = array<i64: 1, 12, 32>}, {pipeline_mode = #tpu.pipeline_mode<synchronous>, transform_indices = @transform_2, window_bounds = array<i64: 1, 32>}, {pipeline_mode = #tpu.pipeline_mode<synchronous>, transform_indices = @transform_3, window_bounds = array<i64: 1, 32>}, {pipeline_mode = #tpu.pipeline_mode<synchronous>, transform_indices = @transform_4, window_bounds = array<i64: 32, 1>}, {pipeline_mode = #tpu.pipeline_mode<synchronous>, transform_indices = @transform_5, window_bounds = array<i64: 32, 1>}, {pipeline_mode = #tpu.pipeline_mode<synchronous>, transform_indices = @transform_6, window_bounds = array<i64: 32, 1>}, {pipeline_mode = #tpu.pipeline_mode<synchronous>, transform_indices = @transform_7, window_bounds = array<i64: 32, 1>}, {pipeline_mode = #tpu.pipeline_mode<synchronous>, transform_indices = @transform_8, window_bounds = array<i64: 32, 32>}, {pipeline_mode = #tpu.pipeline_mode<synchronous>, transform_indices = @transform_9, window_bounds = array<i64: 1, 32>}, {pipeline_mode = #tpu.pipeline_mode<synchronous>, transform_indices = @transform_10, window_bounds = array<i64: 32, 32>}, {pipeline_mode = #tpu.pipeline_mode<synchronous>, transform_indices = @transform_11, window_bounds = array<i64: 1, 32>}, {pipeline_mode = #tpu.pipeline_mode<synchronous>, transform_indices = @transform_12, window_bounds = array<i64: 32, 32>}, {pipeline_mode = #tpu.pipeline_mode<synchronous>, transform_indices = @transform_13, window_bounds = array<i64: 1, 32>}, {pipeline_mode = #tpu.pipeline_mode<synchronous>, transform_indices = @transform_14, window_bounds = array<i64: 32, 32>}, {pipeline_mode = #tpu.pipeline_mode<synchronous>, transform_indices = @transform_15, window_bounds = array<i64: 1, 32>}, {pipeline_mode = #tpu.pipeline_mode<synchronous>, transform_indices = @transform_16, window_bounds = array<i64: 32, 1>}, {pipeline_mode = #tpu.pipeline_mode<synchronous>, transform_indices = @transform_17, window_bounds = array<i64: 32, 1>}, {pipeline_mode = #tpu.pipeline_mode<synchronous>, transform_indices = @transform_18, window_bounds = array<i64: 1, 32>}, {pipeline_mode = #tpu.pipeline_mode<synchronous>, transform_indices = @transform_19, window_bounds = array<i64: 1, 32>}, {pipeline_mode = #tpu.pipeline_mode<synchronous>, transform_indices = @transform_20, window_bounds = array<i64: 1, 32>}, {pipeline_mode = #tpu.pipeline_mode<synchronous>, transform_indices = @transform_21, window_bounds = array<i64: 1, 32>}, {pipeline_mode = #tpu.pipeline_mode<synchronous>, transform_indices = @transform_22, window_bounds = array<i64: 32, 32>}, {pipeline_mode = #tpu.pipeline_mode<synchronous>, transform_indices = @transform_23, window_bounds = array<i64: 1, 32>}, {pipeline_mode = #tpu.pipeline_mode<synchronous>, transform_indices = @transform_24, window_bounds = array<i64: 32, 32>}, {pipeline_mode = #tpu.pipeline_mode<synchronous>, transform_indices = @transform_25, window_bounds = array<i64: 1, 32>}, {pipeline_mode = #tpu.pipeline_mode<synchronous>, transform_indices = @transform_26, window_bounds = array<i64: 32, 32>}, {pipeline_mode = #tpu.pipeline_mode<synchronous>, transform_indices = @transform_27, window_bounds = array<i64: 1, 32>}, {pipeline_mode = #tpu.pipeline_mode<synchronous>, transform_indices = @transform_28, window_bounds = array<i64: 32, 32>}, {pipeline_mode = #tpu.pipeline_mode<synchronous>, transform_indices = @transform_29, window_bounds = array<i64: 32, 1>}, {pipeline_mode = #tpu.pipeline_mode<synchronous>, transform_indices = @transform_30, window_bounds = array<i64: 1, 32>}, {pipeline_mode = #tpu.pipeline_mode<synchronous>, transform_indices = @transform_31, window_bounds = array<i64: 1, 32>}, {pipeline_mode = #tpu.pipeline_mode<synchronous>, transform_indices = @transform_32, window_bounds = array<i64: 32, 32>}, {pipeline_mode = #tpu.pipeline_mode<synchronous>, transform_indices = @transform_33, window_bounds = array<i64: 1, 32>}, {pipeline_mode = #tpu.pipeline_mode<synchronous>, transform_indices = @transform_34, window_bounds = array<i64: 32, 32>}, {pipeline_mode = #tpu.pipeline_mode<synchronous>, transform_indices = @transform_35, window_bounds = array<i64: 1, 32>}, {pipeline_mode = #tpu.pipeline_mode<synchronous>, transform_indices = @transform_36, window_bounds = array<i64: 32, 1>}, {pipeline_mode = #tpu.pipeline_mode<synchronous>, transform_indices = @transform_37, window_bounds = array<i64: 32, 1>}, {pipeline_mode = #tpu.pipeline_mode<synchronous>, transform_indices = @transform_38, window_bounds = array<i64: 32, 128>}, {pipeline_mode = #tpu.pipeline_mode<synchronous>, transform_indices = @transform_39, window_bounds = array<i64: 128, 1>}, {pipeline_mode = #tpu.pipeline_mode<synchronous>, transform_indices = @transform_40, window_bounds = array<i64: 128, 32>}, {pipeline_mode = #tpu.pipeline_mode<synchronous>, transform_indices = @transform_41, window_bounds = array<i64: 32, 1>}, {pipeline_mode = #tpu.pipeline_mode<synchronous>, transform_indices = @transform_42, window_bounds = array<i64: 2, 12>}, {pipeline_mode = #tpu.pipeline_mode<synchronous>, transform_indices = @transform_43, window_bounds = array<i64: 2, 1>}, {pipeline_mode = #tpu.pipeline_mode<synchronous>, transform_indices = @transform_44, window_bounds = array<i64: 12, 2>}, {pipeline_mode = #tpu.pipeline_mode<synchronous>, transform_indices = @transform_45, window_bounds = array<i64: 12, 1>}, {pipeline_mode = #tpu.pipeline_mode<synchronous>, transform_indices = @transform_46, window_bounds = array<i64: 32, 1>}, {pipeline_mode = #tpu.pipeline_mode<synchronous>, transform_indices = @transform_47, window_bounds = array<i64: 32, 1>}, {pipeline_mode = #tpu.pipeline_mode<synchronous>, transform_indices = @transform_48, window_bounds = array<i64: 16, 64>}, {pipeline_mode = #tpu.pipeline_mode<synchronous>, transform_indices = @transform_49, window_bounds = array<i64: 1, 64>}, {pipeline_mode = #tpu.pipeline_mode<synchronous>, transform_indices = @transform_50, window_bounds = array<i64: 64, 64>}, {pipeline_mode = #tpu.pipeline_mode<synchronous>, transform_indices = @transform_51, window_bounds = array<i64: 1, 64>}, {pipeline_mode = #tpu.pipeline_mode<synchronous>, transform_indices = @transform_52, window_bounds = array<i64: 64, 16>}, {pipeline_mode = #tpu.pipeline_mode<synchronous>, transform_indices = @transform_53, window_bounds = array<i64: 1, 16>}, {transform_indices = @transform_54, window_bounds = array<i64: 1, 32, 16>}, {transform_indices = @transform_55, window_bounds = array<i64: 1, 1, 12>}, {transform_indices = @transform_56, window_bounds = array<i64: 1, 1, 12>}]} {
    %c0 = arith.constant 0 : index
    %c0_0 = arith.constant 0 : index
    %c0_1 = arith.constant 0 : index
    %0 = vector.load %arg1[%c0, %c0_0, %c0_1] : memref<1x32x16xf32, #tpu.memory_space<vmem>>, vector<1x32x16xf32>
    %1 = vector.shape_cast %0 : vector<1x32x16xf32> to vector<32x16xf32>
    %c0_2 = arith.constant 0 : index
    %c0_3 = arith.constant 0 : index
    %c0_4 = arith.constant 0 : index
    %2 = vector.load %arg2[%c0_2, %c0_3, %c0_4] : memref<1x12x32xf32, #tpu.memory_space<vmem>>, vector<1x12x32xf32>
    %3 = vector.shape_cast %2 : vector<1x12x32xf32> to vector<12x32xf32>
    %cst = arith.constant dense<0.000000e+00> : vector<16xf32>
    %4 = vector.multi_reduction <add>, %1, %cst [0] : vector<32x16xf32> to vector<16xf32>
    %5 = vector.shape_cast %4 : vector<16xf32> to vector<1x16xf32>
    %cst_5 = arith.constant 3.200000e+01 : f32
    %6 = vector.broadcast %cst_5 : f32 to vector<1x16xf32>
    %7 = arith.divf %5, %6 : vector<1x16xf32>
    %8 = vector.broadcast %7 : vector<1x16xf32> to vector<32x16xf32>
    %9 = arith.subf %1, %8 : vector<32x16xf32>
    %10 = arith.mulf %9, %9 : vector<32x16xf32>
    %cst_6 = arith.constant dense<0.000000e+00> : vector<16xf32>
    %11 = vector.multi_reduction <add>, %10, %cst_6 [0] : vector<32x16xf32> to vector<16xf32>
    %12 = vector.shape_cast %11 : vector<16xf32> to vector<1x16xf32>
    %cst_7 = arith.constant 3.200000e+01 : f32
    %13 = vector.broadcast %cst_7 : f32 to vector<1x16xf32>
    %14 = arith.divf %12, %13 : vector<1x16xf32>
    %15 = vector.broadcast %7 : vector<1x16xf32> to vector<32x16xf32>
    %16 = arith.subf %1, %15 : vector<32x16xf32>
    %cst_8 = arith.constant 9.99999974E-6 : f32
    %17 = vector.broadcast %cst_8 : f32 to vector<1x16xf32>
    %18 = arith.addf %14, %17 : vector<1x16xf32>
    %19 = math.rsqrt %18 : vector<1x16xf32>
    %20 = vector.broadcast %19 : vector<1x16xf32> to vector<32x16xf32>
    %21 = arith.mulf %16, %20 : vector<32x16xf32>
    %c0_9 = arith.constant 0 : index
    %c0_10 = arith.constant 0 : index
    %22 = vector.load %arg5[%c0_9, %c0_10] : memref<32x1xf32, #tpu.memory_space<vmem>>, vector<32x1xf32>
    %23 = vector.broadcast %22 : vector<32x1xf32> to vector<32x16xf32>
    %24 = arith.mulf %21, %23 : vector<32x16xf32>
    %c0_11 = arith.constant 0 : index
    %c0_12 = arith.constant 0 : index
    %25 = vector.load %arg6[%c0_11, %c0_12] : memref<32x1xf32, #tpu.memory_space<vmem>>, vector<32x1xf32>
    %26 = vector.broadcast %25 : vector<32x1xf32> to vector<32x16xf32>
    %27 = arith.addf %24, %26 : vector<32x16xf32>
    %c0_13 = arith.constant 0 : index
    %c0_14 = arith.constant 0 : index
    %28 = vector.load %arg11[%c0_13, %c0_14] : memref<32x32xbf16, #tpu.memory_space<vmem>>, vector<32x32xbf16>
    %29 = arith.truncf %27 : vector<32x16xf32> to vector<32x16xbf16>
    %cst_15 = arith.constant dense<0.000000e+00> : vector<16x32xf32>
    %30 = tpu.matmul %29, %28, %cst_15 {dimension_numbers = #tpu.dot_dimension_numbers<[0], [0], [1], [1], [0, 1, 1, 1], [], []>} : vector<32x16xbf16>, vector<32x32xbf16>, vector<16x32xf32> -> vector<16x32xf32>
    %c0_16 = arith.constant 0 : index
    %c0_17 = arith.constant 0 : index
    %31 = vector.load %arg12[%c0_16, %c0_17] : memref<1x32xf32, #tpu.memory_space<vmem>>, vector<1x32xf32>
    %32 = vector.broadcast %31 : vector<1x32xf32> to vector<16x32xf32>
    %33 = arith.addf %30, %32 : vector<16x32xf32>
    %c0_18 = arith.constant 0 : index
    %c0_19 = arith.constant 0 : index
    %34 = vector.load %arg7[%c0_18, %c0_19] : memref<32x1xf32, #tpu.memory_space<vmem>>, vector<32x1xf32>
    %35 = vector.broadcast %34 : vector<32x1xf32> to vector<32x16xf32>
    %36 = arith.mulf %21, %35 : vector<32x16xf32>
    %c0_20 = arith.constant 0 : index
    %c0_21 = arith.constant 0 : index
    %37 = vector.load %arg8[%c0_20, %c0_21] : memref<32x1xf32, #tpu.memory_space<vmem>>, vector<32x1xf32>
    %38 = vector.broadcast %37 : vector<32x1xf32> to vector<32x16xf32>
    %39 = arith.addf %36, %38 : vector<32x16xf32>
    %c0_22 = arith.constant 0 : index
    %c0_23 = arith.constant 0 : index
    %40 = vector.load %arg13[%c0_22, %c0_23] : memref<32x32xbf16, #tpu.memory_space<vmem>>, vector<32x32xbf16>
    %41 = arith.truncf %39 : vector<32x16xf32> to vector<32x16xbf16>
    %cst_24 = arith.constant dense<0.000000e+00> : vector<16x32xf32>
    %42 = tpu.matmul %41, %40, %cst_24 {dimension_numbers = #tpu.dot_dimension_numbers<[0], [0], [1], [1], [0, 1, 1, 1], [], []>} : vector<32x16xbf16>, vector<32x32xbf16>, vector<16x32xf32> -> vector<16x32xf32>
    %c0_25 = arith.constant 0 : index
    %c0_26 = arith.constant 0 : index
    %43 = vector.load %arg14[%c0_25, %c0_26] : memref<1x32xf32, #tpu.memory_space<vmem>>, vector<1x32xf32>
    %44 = vector.broadcast %43 : vector<1x32xf32> to vector<16x32xf32>
    %45 = arith.addf %42, %44 : vector<16x32xf32>
    %c0_27 = arith.constant 0 : index
    %c0_28 = arith.constant 0 : index
    %46 = vector.load %arg3[%c0_27, %c0_28] : memref<1x32xf32, #tpu.memory_space<vmem>>, vector<1x32xf32>
    %c0_29 = arith.constant 0 : index
    %c0_30 = arith.constant 0 : index
    %47 = vector.load %arg4[%c0_29, %c0_30] : memref<1x32xf32, #tpu.memory_space<vmem>>, vector<1x32xf32>
    %cst_31 = arith.constant dense<0.000000e+00> : vector<12xf32>
    %48 = vector.multi_reduction <add>, %3, %cst_31 [1] : vector<12x32xf32> to vector<12xf32>
    %49 = vector.shape_cast %48 : vector<12xf32> to vector<12x1xf32>
    %cst_32 = arith.constant 3.200000e+01 : f32
    %50 = vector.broadcast %cst_32 : f32 to vector<12x1xf32>
    %51 = arith.divf %49, %50 : vector<12x1xf32>
    %52 = vector.broadcast %51 : vector<12x1xf32> to vector<12x32xf32>
    %53 = arith.subf %3, %52 : vector<12x32xf32>
    %54 = arith.mulf %53, %53 : vector<12x32xf32>
    %cst_33 = arith.constant dense<0.000000e+00> : vector<12xf32>
    %55 = vector.multi_reduction <add>, %54, %cst_33 [1] : vector<12x32xf32> to vector<12xf32>
    %56 = vector.shape_cast %55 : vector<12xf32> to vector<12x1xf32>
    %cst_34 = arith.constant 3.200000e+01 : f32
    %57 = vector.broadcast %cst_34 : f32 to vector<12x1xf32>
    %58 = arith.divf %56, %57 : vector<12x1xf32>
    %59 = vector.broadcast %51 : vector<12x1xf32> to vector<12x32xf32>
    %60 = arith.subf %3, %59 : vector<12x32xf32>
    %cst_35 = arith.constant 9.99999974E-6 : f32
    %61 = vector.broadcast %cst_35 : f32 to vector<12x1xf32>
    %62 = arith.addf %58, %61 : vector<12x1xf32>
    %63 = math.rsqrt %62 : vector<12x1xf32>
    %64 = vector.broadcast %63 : vector<12x1xf32> to vector<12x32xf32>
    %65 = arith.mulf %60, %64 : vector<12x32xf32>
    %66 = vector.broadcast %46 : vector<1x32xf32> to vector<12x32xf32>
    %67 = arith.mulf %65, %66 : vector<12x32xf32>
    %68 = vector.broadcast %47 : vector<1x32xf32> to vector<12x32xf32>
    %69 = arith.addf %67, %68 : vector<12x32xf32>
    %c0_36 = arith.constant 0 : index
    %c0_37 = arith.constant 0 : index
    %70 = vector.load %arg9[%c0_36, %c0_37] : memref<32x32xbf16, #tpu.memory_space<vmem>>, vector<32x32xbf16>
    %71 = arith.truncf %69 : vector<12x32xf32> to vector<12x32xbf16>
    %cst_38 = arith.constant dense<0.000000e+00> : vector<12x32xf32>
    %72 = tpu.matmul %71, %70, %cst_38 {dimension_numbers = #tpu.dot_dimension_numbers<[1], [0], [0], [1], [0, 0, 1, 1], [], []>} : vector<12x32xbf16>, vector<32x32xbf16>, vector<12x32xf32> -> vector<12x32xf32>
    %c0_39 = arith.constant 0 : index
    %c0_40 = arith.constant 0 : index
    %73 = vector.load %arg10[%c0_39, %c0_40] : memref<1x32xf32, #tpu.memory_space<vmem>>, vector<1x32xf32>
    %74 = vector.broadcast %73 : vector<1x32xf32> to vector<12x32xf32>
    %75 = arith.addf %72, %74 : vector<12x32xf32>
    %76 = arith.truncf %33 : vector<16x32xf32> to vector<16x32xbf16>
    %77 = arith.truncf %75 : vector<12x32xf32> to vector<12x32xbf16>
    %cst_41 = arith.constant dense<0.000000e+00> : vector<16x12xf32>
    %78 = tpu.matmul %76, %77, %cst_41 {dimension_numbers = #tpu.dot_dimension_numbers<[1], [1], [0], [0], [0, 0, 1, 0], [], []>} : vector<16x32xbf16>, vector<12x32xbf16>, vector<16x12xf32> -> vector<16x12xf32>
    %cst_42 = arith.constant 0.000000e+00 : f32
    %79 = vector.broadcast %cst_42 : f32 to vector<16x12xf32>
    %80 = arith.maximumf %78, %79 : vector<16x12xf32>
    %cst_43 = arith.constant 0.176776692 : f32
    %81 = vector.broadcast %cst_43 : f32 to vector<16x12xf32>
    %82 = arith.mulf %80, %81 : vector<16x12xf32>
    %cst_44 = arith.constant dense<0xFF800000> : vector<12xf32>
    %83 = vector.multi_reduction <maximumf>, %82, %cst_44 [0] : vector<16x12xf32> to vector<12xf32>
    %84 = vector.shape_cast %83 : vector<12xf32> to vector<1x12xf32>
    %85 = vector.broadcast %84 : vector<1x12xf32> to vector<16x12xf32>
    %86 = arith.subf %82, %85 : vector<16x12xf32>
    %87 = math.exp %86 : vector<16x12xf32>
    %cst_45 = arith.constant dense<0.000000e+00> : vector<12xf32>
    %88 = vector.multi_reduction <add>, %87, %cst_45 [0] : vector<16x12xf32> to vector<12xf32>
    %89 = vector.shape_cast %88 : vector<12xf32> to vector<1x12xf32>
    %90 = tpu.reciprocal %89 {approx = true} : vector<1x12xf32> -> vector<1x12xf32>
    %91 = vector.broadcast %90 : vector<1x12xf32> to vector<16x12xf32>
    %92 = arith.mulf %87, %91 : vector<16x12xf32>
    %93 = arith.truncf %92 : vector<16x12xf32> to vector<16x12xbf16>
    %94 = arith.truncf %45 : vector<16x32xf32> to vector<16x32xbf16>
    %cst_46 = arith.constant dense<0.000000e+00> : vector<12x32xf32>
    %95 = tpu.matmul %93, %94, %cst_46 {dimension_numbers = #tpu.dot_dimension_numbers<[0], [0], [1], [1], [0, 1, 1, 1], [], []>} : vector<16x12xbf16>, vector<16x32xbf16>, vector<12x32xf32> -> vector<12x32xf32>
    %c0_47 = arith.constant 0 : index
    %c0_48 = arith.constant 0 : index
    %96 = vector.load %arg15[%c0_47, %c0_48] : memref<32x32xbf16, #tpu.memory_space<vmem>>, vector<32x32xbf16>
    %97 = arith.truncf %95 : vector<12x32xf32> to vector<12x32xbf16>
    %cst_49 = arith.constant dense<0.000000e+00> : vector<12x32xf32>
    %98 = tpu.matmul %97, %96, %cst_49 {dimension_numbers = #tpu.dot_dimension_numbers<[1], [0], [0], [1], [0, 0, 1, 1], [], []>} : vector<12x32xbf16>, vector<32x32xbf16>, vector<12x32xf32> -> vector<12x32xf32>
    %c0_50 = arith.constant 0 : index
    %c0_51 = arith.constant 0 : index
    %99 = vector.load %arg16[%c0_50, %c0_51] : memref<1x32xf32, #tpu.memory_space<vmem>>, vector<1x32xf32>
    %100 = vector.broadcast %99 : vector<1x32xf32> to vector<12x32xf32>
    %101 = arith.addf %98, %100 : vector<12x32xf32>
    %102 = arith.addf %3, %101 : vector<12x32xf32>
    %cst_52 = arith.constant dense<0xFF800000> : vector<12xf32>
    %103 = vector.multi_reduction <maximumf>, %102, %cst_52 [1] : vector<12x32xf32> to vector<12xf32>
    %104 = vector.shape_cast %103 : vector<12xf32> to vector<12x1xf32>
    %c0_53 = arith.constant 0 : index
    %c0_54 = arith.constant 0 : index
    %105 = vector.load %arg43[%c0_53, %c0_54] : memref<2x12xf32, #tpu.memory_space<vmem>>, vector<2x12xf32>
    %cst_55 = arith.constant dense<0.000000e+00> : vector<2x1xf32>
    %106 = tpu.matmul %105, %104, %cst_55 {dimension_numbers = #tpu.dot_dimension_numbers<[1], [0], [0], [1], [0, 0, 1, 1], [], []>} : vector<2x12xf32>, vector<12x1xf32>, vector<2x1xf32> -> vector<2x1xf32>
    %c0_56 = arith.constant 0 : index
    %c0_57 = arith.constant 0 : index
    %107 = vector.load %arg44[%c0_56, %c0_57] : memref<2x1xf32, #tpu.memory_space<vmem>>, vector<2x1xf32>
    %108 = arith.addf %106, %107 : vector<2x1xf32>
    %cst_58 = arith.constant 5.000000e-01 : f32
    %109 = vector.broadcast %cst_58 : f32 to vector<2x1xf32>
    %110 = arith.mulf %109, %108 : vector<2x1xf32>
    %cst_59 = arith.constant 0.707106769 : f32
    %111 = vector.broadcast %cst_59 : f32 to vector<2x1xf32>
    %112 = arith.mulf %108, %111 : vector<2x1xf32>
    %113 = math.erf %112 : vector<2x1xf32>
    %cst_60 = arith.constant 1.000000e+00 : f32
    %114 = vector.broadcast %cst_60 : f32 to vector<2x1xf32>
    %115 = arith.addf %114, %113 : vector<2x1xf32>
    %116 = arith.mulf %110, %115 : vector<2x1xf32>
    %c0_61 = arith.constant 0 : index
    %c0_62 = arith.constant 0 : index
    %117 = vector.load %arg45[%c0_61, %c0_62] : memref<12x2xf32, #tpu.memory_space<vmem>>, vector<12x2xf32>
    %cst_63 = arith.constant dense<0.000000e+00> : vector<12x1xf32>
    %118 = tpu.matmul %117, %116, %cst_63 {dimension_numbers = #tpu.dot_dimension_numbers<[1], [0], [0], [1], [0, 0, 1, 1], [], []>} : vector<12x2xf32>, vector<2x1xf32>, vector<12x1xf32> -> vector<12x1xf32>
    %c0_64 = arith.constant 0 : index
    %c0_65 = arith.constant 0 : index
    %119 = vector.load %arg46[%c0_64, %c0_65] : memref<12x1xf32, #tpu.memory_space<vmem>>, vector<12x1xf32>
    %120 = arith.addf %118, %119 : vector<12x1xf32>
    %121 = arith.negf %120 : vector<12x1xf32>
    %122 = math.exp %121 : vector<12x1xf32>
    %cst_66 = arith.constant 1.000000e+00 : f32
    %123 = vector.broadcast %cst_66 : f32 to vector<12x1xf32>
    %124 = arith.addf %123, %122 : vector<12x1xf32>
    %125 = arith.divf %123, %124 : vector<12x1xf32>
    %126 = vector.broadcast %125 : vector<12x1xf32> to vector<12x32xf32>
    %127 = arith.mulf %126, %102 : vector<12x32xf32>
    %128 = arith.addf %127, %102 : vector<12x32xf32>
    %c0_67 = arith.constant 0 : index
    %c0_68 = arith.constant 0 : index
    %129 = vector.load %arg31[%c0_67, %c0_68] : memref<1x32xf32, #tpu.memory_space<vmem>>, vector<1x32xf32>
    %c0_69 = arith.constant 0 : index
    %c0_70 = arith.constant 0 : index
    %130 = vector.load %arg32[%c0_69, %c0_70] : memref<1x32xf32, #tpu.memory_space<vmem>>, vector<1x32xf32>
    %cst_71 = arith.constant dense<0.000000e+00> : vector<12xf32>
    %131 = vector.multi_reduction <add>, %128, %cst_71 [1] : vector<12x32xf32> to vector<12xf32>
    %132 = vector.shape_cast %131 : vector<12xf32> to vector<12x1xf32>
    %cst_72 = arith.constant 3.200000e+01 : f32
    %133 = vector.broadcast %cst_72 : f32 to vector<12x1xf32>
    %134 = arith.divf %132, %133 : vector<12x1xf32>
    %135 = vector.broadcast %134 : vector<12x1xf32> to vector<12x32xf32>
    %136 = arith.subf %128, %135 : vector<12x32xf32>
    %137 = arith.mulf %136, %136 : vector<12x32xf32>
    %cst_73 = arith.constant dense<0.000000e+00> : vector<12xf32>
    %138 = vector.multi_reduction <add>, %137, %cst_73 [1] : vector<12x32xf32> to vector<12xf32>
    %139 = vector.shape_cast %138 : vector<12xf32> to vector<12x1xf32>
    %cst_74 = arith.constant 3.200000e+01 : f32
    %140 = vector.broadcast %cst_74 : f32 to vector<12x1xf32>
    %141 = arith.divf %139, %140 : vector<12x1xf32>
    %142 = vector.broadcast %134 : vector<12x1xf32> to vector<12x32xf32>
    %143 = arith.subf %128, %142 : vector<12x32xf32>
    %cst_75 = arith.constant 9.99999974E-6 : f32
    %144 = vector.broadcast %cst_75 : f32 to vector<12x1xf32>
    %145 = arith.addf %141, %144 : vector<12x1xf32>
    %146 = math.rsqrt %145 : vector<12x1xf32>
    %147 = vector.broadcast %146 : vector<12x1xf32> to vector<12x32xf32>
    %148 = arith.mulf %143, %147 : vector<12x32xf32>
    %149 = vector.broadcast %129 : vector<1x32xf32> to vector<12x32xf32>
    %150 = arith.mulf %148, %149 : vector<12x32xf32>
    %151 = vector.broadcast %130 : vector<1x32xf32> to vector<12x32xf32>
    %152 = arith.addf %150, %151 : vector<12x32xf32>
    %c0_76 = arith.constant 0 : index
    %c0_77 = arith.constant 0 : index
    %153 = vector.load %arg33[%c0_76, %c0_77] : memref<32x32xbf16, #tpu.memory_space<vmem>>, vector<32x32xbf16>
    %154 = arith.truncf %152 : vector<12x32xf32> to vector<12x32xbf16>
    %cst_78 = arith.constant dense<0.000000e+00> : vector<12x32xf32>
    %155 = tpu.matmul %154, %153, %cst_78 {dimension_numbers = #tpu.dot_dimension_numbers<[1], [0], [0], [1], [0, 0, 1, 1], [], []>} : vector<12x32xbf16>, vector<32x32xbf16>, vector<12x32xf32> -> vector<12x32xf32>
    %c0_79 = arith.constant 0 : index
    %c0_80 = arith.constant 0 : index
    %156 = vector.load %arg34[%c0_79, %c0_80] : memref<1x32xf32, #tpu.memory_space<vmem>>, vector<1x32xf32>
    %157 = vector.broadcast %156 : vector<1x32xf32> to vector<12x32xf32>
    %158 = arith.addf %155, %157 : vector<12x32xf32>
    %cst_81 = arith.constant 5.000000e-01 : f32
    %159 = vector.broadcast %cst_81 : f32 to vector<12x32xf32>
    %160 = arith.mulf %159, %158 : vector<12x32xf32>
    %cst_82 = arith.constant 0.707106769 : f32
    %161 = vector.broadcast %cst_82 : f32 to vector<12x32xf32>
    %162 = arith.mulf %158, %161 : vector<12x32xf32>
    %163 = math.erf %162 : vector<12x32xf32>
    %cst_83 = arith.constant 1.000000e+00 : f32
    %164 = vector.broadcast %cst_83 : f32 to vector<12x32xf32>
    %165 = arith.addf %164, %163 : vector<12x32xf32>
    %166 = arith.mulf %160, %165 : vector<12x32xf32>
    %c0_84 = arith.constant 0 : index
    %c0_85 = arith.constant 0 : index
    %167 = vector.load %arg35[%c0_84, %c0_85] : memref<32x32xbf16, #tpu.memory_space<vmem>>, vector<32x32xbf16>
    %168 = arith.truncf %166 : vector<12x32xf32> to vector<12x32xbf16>
    %cst_86 = arith.constant dense<0.000000e+00> : vector<12x32xf32>
    %169 = tpu.matmul %168, %167, %cst_86 {dimension_numbers = #tpu.dot_dimension_numbers<[1], [0], [0], [1], [0, 0, 1, 1], [], []>} : vector<12x32xbf16>, vector<32x32xbf16>, vector<12x32xf32> -> vector<12x32xf32>
    %c0_87 = arith.constant 0 : index
    %c0_88 = arith.constant 0 : index
    %170 = vector.load %arg36[%c0_87, %c0_88] : memref<1x32xf32, #tpu.memory_space<vmem>>, vector<1x32xf32>
    %171 = vector.broadcast %170 : vector<1x32xf32> to vector<12x32xf32>
    %172 = arith.addf %169, %171 : vector<12x32xf32>
    %173 = arith.addf %128, %172 : vector<12x32xf32>
    %174 = arith.addf %173, %102 : vector<12x32xf32>
    %175 = arith.addf %3, %174 : vector<12x32xf32>
    %c0_89 = arith.constant 0 : index
    %c0_90 = arith.constant 0 : index
    %176 = vector.load %arg3[%c0_89, %c0_90] : memref<1x32xf32, #tpu.memory_space<vmem>>, vector<1x32xf32>
    %c0_91 = arith.constant 0 : index
    %c0_92 = arith.constant 0 : index
    %177 = vector.load %arg4[%c0_91, %c0_92] : memref<1x32xf32, #tpu.memory_space<vmem>>, vector<1x32xf32>
    %cst_93 = arith.constant dense<0.000000e+00> : vector<12xf32>
    %178 = vector.multi_reduction <add>, %175, %cst_93 [1] : vector<12x32xf32> to vector<12xf32>
    %179 = vector.shape_cast %178 : vector<12xf32> to vector<12x1xf32>
    %cst_94 = arith.constant 3.200000e+01 : f32
    %180 = vector.broadcast %cst_94 : f32 to vector<12x1xf32>
    %181 = arith.divf %179, %180 : vector<12x1xf32>
    %182 = vector.broadcast %181 : vector<12x1xf32> to vector<12x32xf32>
    %183 = arith.subf %175, %182 : vector<12x32xf32>
    %184 = arith.mulf %183, %183 : vector<12x32xf32>
    %cst_95 = arith.constant dense<0.000000e+00> : vector<12xf32>
    %185 = vector.multi_reduction <add>, %184, %cst_95 [1] : vector<12x32xf32> to vector<12xf32>
    %186 = vector.shape_cast %185 : vector<12xf32> to vector<12x1xf32>
    %cst_96 = arith.constant 3.200000e+01 : f32
    %187 = vector.broadcast %cst_96 : f32 to vector<12x1xf32>
    %188 = arith.divf %186, %187 : vector<12x1xf32>
    %189 = vector.broadcast %181 : vector<12x1xf32> to vector<12x32xf32>
    %190 = arith.subf %175, %189 : vector<12x32xf32>
    %cst_97 = arith.constant 9.99999974E-6 : f32
    %191 = vector.broadcast %cst_97 : f32 to vector<12x1xf32>
    %192 = arith.addf %188, %191 : vector<12x1xf32>
    %193 = math.rsqrt %192 : vector<12x1xf32>
    %194 = vector.broadcast %193 : vector<12x1xf32> to vector<12x32xf32>
    %195 = arith.mulf %190, %194 : vector<12x32xf32>
    %196 = vector.broadcast %176 : vector<1x32xf32> to vector<12x32xf32>
    %197 = arith.mulf %195, %196 : vector<12x32xf32>
    %198 = vector.broadcast %177 : vector<1x32xf32> to vector<12x32xf32>
    %199 = arith.addf %197, %198 : vector<12x32xf32>
    %c0_98 = arith.constant 0 : index
    %c0_99 = arith.constant 0 : index
    %200 = vector.load %arg9[%c0_98, %c0_99] : memref<32x32xbf16, #tpu.memory_space<vmem>>, vector<32x32xbf16>
    %201 = arith.truncf %199 : vector<12x32xf32> to vector<12x32xbf16>
    %cst_100 = arith.constant dense<0.000000e+00> : vector<12x32xf32>
    %202 = tpu.matmul %201, %200, %cst_100 {dimension_numbers = #tpu.dot_dimension_numbers<[1], [0], [0], [1], [0, 0, 1, 1], [], []>} : vector<12x32xbf16>, vector<32x32xbf16>, vector<12x32xf32> -> vector<12x32xf32>
    %c0_101 = arith.constant 0 : index
    %c0_102 = arith.constant 0 : index
    %203 = vector.load %arg10[%c0_101, %c0_102] : memref<1x32xf32, #tpu.memory_space<vmem>>, vector<1x32xf32>
    %204 = vector.broadcast %203 : vector<1x32xf32> to vector<12x32xf32>
    %205 = arith.addf %202, %204 : vector<12x32xf32>
    %206 = arith.truncf %33 : vector<16x32xf32> to vector<16x32xbf16>
    %207 = arith.truncf %205 : vector<12x32xf32> to vector<12x32xbf16>
    %cst_103 = arith.constant dense<0.000000e+00> : vector<16x12xf32>
    %208 = tpu.matmul %206, %207, %cst_103 {dimension_numbers = #tpu.dot_dimension_numbers<[1], [1], [0], [0], [0, 0, 1, 0], [], []>} : vector<16x32xbf16>, vector<12x32xbf16>, vector<16x12xf32> -> vector<16x12xf32>
    %cst_104 = arith.constant 0.000000e+00 : f32
    %209 = vector.broadcast %cst_104 : f32 to vector<16x12xf32>
    %210 = arith.maximumf %208, %209 : vector<16x12xf32>
    %cst_105 = arith.constant 0.176776692 : f32
    %211 = vector.broadcast %cst_105 : f32 to vector<16x12xf32>
    %212 = arith.mulf %210, %211 : vector<16x12xf32>
    %cst_106 = arith.constant dense<0xFF800000> : vector<12xf32>
    %213 = vector.multi_reduction <maximumf>, %212, %cst_106 [0] : vector<16x12xf32> to vector<12xf32>
    %214 = vector.shape_cast %213 : vector<12xf32> to vector<1x12xf32>
    %215 = vector.broadcast %214 : vector<1x12xf32> to vector<16x12xf32>
    %216 = arith.subf %212, %215 : vector<16x12xf32>
    %217 = math.exp %216 : vector<16x12xf32>
    %cst_107 = arith.constant dense<0.000000e+00> : vector<12xf32>
    %218 = vector.multi_reduction <add>, %217, %cst_107 [0] : vector<16x12xf32> to vector<12xf32>
    %219 = vector.shape_cast %218 : vector<12xf32> to vector<1x12xf32>
    %220 = tpu.reciprocal %219 {approx = true} : vector<1x12xf32> -> vector<1x12xf32>
    %221 = vector.broadcast %220 : vector<1x12xf32> to vector<16x12xf32>
    %222 = arith.mulf %217, %221 : vector<16x12xf32>
    %223 = arith.truncf %222 : vector<16x12xf32> to vector<16x12xbf16>
    %224 = arith.truncf %45 : vector<16x32xf32> to vector<16x32xbf16>
    %cst_108 = arith.constant dense<0.000000e+00> : vector<12x32xf32>
    %225 = tpu.matmul %223, %224, %cst_108 {dimension_numbers = #tpu.dot_dimension_numbers<[0], [0], [1], [1], [0, 1, 1, 1], [], []>} : vector<16x12xbf16>, vector<16x32xbf16>, vector<12x32xf32> -> vector<12x32xf32>
    %c0_109 = arith.constant 0 : index
    %c0_110 = arith.constant 0 : index
    %226 = vector.load %arg15[%c0_109, %c0_110] : memref<32x32xbf16, #tpu.memory_space<vmem>>, vector<32x32xbf16>
    %227 = arith.truncf %225 : vector<12x32xf32> to vector<12x32xbf16>
    %cst_111 = arith.constant dense<0.000000e+00> : vector<12x32xf32>
    %228 = tpu.matmul %227, %226, %cst_111 {dimension_numbers = #tpu.dot_dimension_numbers<[1], [0], [0], [1], [0, 0, 1, 1], [], []>} : vector<12x32xbf16>, vector<32x32xbf16>, vector<12x32xf32> -> vector<12x32xf32>
    %c0_112 = arith.constant 0 : index
    %c0_113 = arith.constant 0 : index
    %229 = vector.load %arg16[%c0_112, %c0_113] : memref<1x32xf32, #tpu.memory_space<vmem>>, vector<1x32xf32>
    %230 = vector.broadcast %229 : vector<1x32xf32> to vector<12x32xf32>
    %231 = arith.addf %228, %230 : vector<12x32xf32>
    %232 = arith.addf %175, %231 : vector<12x32xf32>
    %cst_114 = arith.constant dense<0xFF800000> : vector<12xf32>
    %233 = vector.multi_reduction <maximumf>, %232, %cst_114 [1] : vector<12x32xf32> to vector<12xf32>
    %234 = vector.shape_cast %233 : vector<12xf32> to vector<12x1xf32>
    %c0_115 = arith.constant 0 : index
    %c0_116 = arith.constant 0 : index
    %235 = vector.load %arg43[%c0_115, %c0_116] : memref<2x12xf32, #tpu.memory_space<vmem>>, vector<2x12xf32>
    %cst_117 = arith.constant dense<0.000000e+00> : vector<2x1xf32>
    %236 = tpu.matmul %235, %234, %cst_117 {dimension_numbers = #tpu.dot_dimension_numbers<[1], [0], [0], [1], [0, 0, 1, 1], [], []>} : vector<2x12xf32>, vector<12x1xf32>, vector<2x1xf32> -> vector<2x1xf32>
    %c0_118 = arith.constant 0 : index
    %c0_119 = arith.constant 0 : index
    %237 = vector.load %arg44[%c0_118, %c0_119] : memref<2x1xf32, #tpu.memory_space<vmem>>, vector<2x1xf32>
    %238 = arith.addf %236, %237 : vector<2x1xf32>
    %cst_120 = arith.constant 5.000000e-01 : f32
    %239 = vector.broadcast %cst_120 : f32 to vector<2x1xf32>
    %240 = arith.mulf %239, %238 : vector<2x1xf32>
    %cst_121 = arith.constant 0.707106769 : f32
    %241 = vector.broadcast %cst_121 : f32 to vector<2x1xf32>
    %242 = arith.mulf %238, %241 : vector<2x1xf32>
    %243 = math.erf %242 : vector<2x1xf32>
    %cst_122 = arith.constant 1.000000e+00 : f32
    %244 = vector.broadcast %cst_122 : f32 to vector<2x1xf32>
    %245 = arith.addf %244, %243 : vector<2x1xf32>
    %246 = arith.mulf %240, %245 : vector<2x1xf32>
    %c0_123 = arith.constant 0 : index
    %c0_124 = arith.constant 0 : index
    %247 = vector.load %arg45[%c0_123, %c0_124] : memref<12x2xf32, #tpu.memory_space<vmem>>, vector<12x2xf32>
    %cst_125 = arith.constant dense<0.000000e+00> : vector<12x1xf32>
    %248 = tpu.matmul %247, %246, %cst_125 {dimension_numbers = #tpu.dot_dimension_numbers<[1], [0], [0], [1], [0, 0, 1, 1], [], []>} : vector<12x2xf32>, vector<2x1xf32>, vector<12x1xf32> -> vector<12x1xf32>
    %c0_126 = arith.constant 0 : index
    %c0_127 = arith.constant 0 : index
    %249 = vector.load %arg46[%c0_126, %c0_127] : memref<12x1xf32, #tpu.memory_space<vmem>>, vector<12x1xf32>
    %250 = arith.addf %248, %249 : vector<12x1xf32>
    %251 = arith.negf %250 : vector<12x1xf32>
    %252 = math.exp %251 : vector<12x1xf32>
    %cst_128 = arith.constant 1.000000e+00 : f32
    %253 = vector.broadcast %cst_128 : f32 to vector<12x1xf32>
    %254 = arith.addf %253, %252 : vector<12x1xf32>
    %255 = arith.divf %253, %254 : vector<12x1xf32>
    %256 = vector.broadcast %255 : vector<12x1xf32> to vector<12x32xf32>
    %257 = arith.mulf %256, %232 : vector<12x32xf32>
    %258 = arith.addf %257, %232 : vector<12x32xf32>
    %c0_129 = arith.constant 0 : index
    %c0_130 = arith.constant 0 : index
    %259 = vector.load %arg31[%c0_129, %c0_130] : memref<1x32xf32, #tpu.memory_space<vmem>>, vector<1x32xf32>
    %c0_131 = arith.constant 0 : index
    %c0_132 = arith.constant 0 : index
    %260 = vector.load %arg32[%c0_131, %c0_132] : memref<1x32xf32, #tpu.memory_space<vmem>>, vector<1x32xf32>
    %cst_133 = arith.constant dense<0.000000e+00> : vector<12xf32>
    %261 = vector.multi_reduction <add>, %258, %cst_133 [1] : vector<12x32xf32> to vector<12xf32>
    %262 = vector.shape_cast %261 : vector<12xf32> to vector<12x1xf32>
    %cst_134 = arith.constant 3.200000e+01 : f32
    %263 = vector.broadcast %cst_134 : f32 to vector<12x1xf32>
    %264 = arith.divf %262, %263 : vector<12x1xf32>
    %265 = vector.broadcast %264 : vector<12x1xf32> to vector<12x32xf32>
    %266 = arith.subf %258, %265 : vector<12x32xf32>
    %267 = arith.mulf %266, %266 : vector<12x32xf32>
    %cst_135 = arith.constant dense<0.000000e+00> : vector<12xf32>
    %268 = vector.multi_reduction <add>, %267, %cst_135 [1] : vector<12x32xf32> to vector<12xf32>
    %269 = vector.shape_cast %268 : vector<12xf32> to vector<12x1xf32>
    %cst_136 = arith.constant 3.200000e+01 : f32
    %270 = vector.broadcast %cst_136 : f32 to vector<12x1xf32>
    %271 = arith.divf %269, %270 : vector<12x1xf32>
    %272 = vector.broadcast %264 : vector<12x1xf32> to vector<12x32xf32>
    %273 = arith.subf %258, %272 : vector<12x32xf32>
    %cst_137 = arith.constant 9.99999974E-6 : f32
    %274 = vector.broadcast %cst_137 : f32 to vector<12x1xf32>
    %275 = arith.addf %271, %274 : vector<12x1xf32>
    %276 = math.rsqrt %275 : vector<12x1xf32>
    %277 = vector.broadcast %276 : vector<12x1xf32> to vector<12x32xf32>
    %278 = arith.mulf %273, %277 : vector<12x32xf32>
    %279 = vector.broadcast %259 : vector<1x32xf32> to vector<12x32xf32>
    %280 = arith.mulf %278, %279 : vector<12x32xf32>
    %281 = vector.broadcast %260 : vector<1x32xf32> to vector<12x32xf32>
    %282 = arith.addf %280, %281 : vector<12x32xf32>
    %c0_138 = arith.constant 0 : index
    %c0_139 = arith.constant 0 : index
    %283 = vector.load %arg33[%c0_138, %c0_139] : memref<32x32xbf16, #tpu.memory_space<vmem>>, vector<32x32xbf16>
    %284 = arith.truncf %282 : vector<12x32xf32> to vector<12x32xbf16>
    %cst_140 = arith.constant dense<0.000000e+00> : vector<12x32xf32>
    %285 = tpu.matmul %284, %283, %cst_140 {dimension_numbers = #tpu.dot_dimension_numbers<[1], [0], [0], [1], [0, 0, 1, 1], [], []>} : vector<12x32xbf16>, vector<32x32xbf16>, vector<12x32xf32> -> vector<12x32xf32>
    %c0_141 = arith.constant 0 : index
    %c0_142 = arith.constant 0 : index
    %286 = vector.load %arg34[%c0_141, %c0_142] : memref<1x32xf32, #tpu.memory_space<vmem>>, vector<1x32xf32>
    %287 = vector.broadcast %286 : vector<1x32xf32> to vector<12x32xf32>
    %288 = arith.addf %285, %287 : vector<12x32xf32>
    %cst_143 = arith.constant 5.000000e-01 : f32
    %289 = vector.broadcast %cst_143 : f32 to vector<12x32xf32>
    %290 = arith.mulf %289, %288 : vector<12x32xf32>
    %cst_144 = arith.constant 0.707106769 : f32
    %291 = vector.broadcast %cst_144 : f32 to vector<12x32xf32>
    %292 = arith.mulf %288, %291 : vector<12x32xf32>
    %293 = math.erf %292 : vector<12x32xf32>
    %cst_145 = arith.constant 1.000000e+00 : f32
    %294 = vector.broadcast %cst_145 : f32 to vector<12x32xf32>
    %295 = arith.addf %294, %293 : vector<12x32xf32>
    %296 = arith.mulf %290, %295 : vector<12x32xf32>
    %c0_146 = arith.constant 0 : index
    %c0_147 = arith.constant 0 : index
    %297 = vector.load %arg35[%c0_146, %c0_147] : memref<32x32xbf16, #tpu.memory_space<vmem>>, vector<32x32xbf16>
    %298 = arith.truncf %296 : vector<12x32xf32> to vector<12x32xbf16>
    %cst_148 = arith.constant dense<0.000000e+00> : vector<12x32xf32>
    %299 = tpu.matmul %298, %297, %cst_148 {dimension_numbers = #tpu.dot_dimension_numbers<[1], [0], [0], [1], [0, 0, 1, 1], [], []>} : vector<12x32xbf16>, vector<32x32xbf16>, vector<12x32xf32> -> vector<12x32xf32>
    %c0_149 = arith.constant 0 : index
    %c0_150 = arith.constant 0 : index
    %300 = vector.load %arg36[%c0_149, %c0_150] : memref<1x32xf32, #tpu.memory_space<vmem>>, vector<1x32xf32>
    %301 = vector.broadcast %300 : vector<1x32xf32> to vector<12x32xf32>
    %302 = arith.addf %299, %301 : vector<12x32xf32>
    %303 = arith.addf %258, %302 : vector<12x32xf32>
    %304 = arith.addf %303, %232 : vector<12x32xf32>
    %c0_151 = arith.constant 0 : index
    %c0_152 = arith.constant 0 : index
    %c0_153 = arith.constant 0 : index
    %305 = vector.load %arg56[%c0_151, %c0_152, %c0_153] : memref<1x1x12xf32, #tpu.memory_space<vmem>>, vector<1x1x12xf32>
    %306 = vector.shape_cast %305 : vector<1x1x12xf32> to vector<1x12xf32>
    %307 = vector.shape_cast %84 : vector<1x12xf32> to vector<1x1x12xf32>
    tpu.vector_store %arg56[%c0_151, %c0_152, %c0_153], %307 {strides = array<i32>} : memref<1x1x12xf32, #tpu.memory_space<vmem>>, vector<1x1x12xf32>,
    %c0_154 = arith.constant 0 : index
    %c0_155 = arith.constant 0 : index
    %c0_156 = arith.constant 0 : index
    %308 = vector.load %arg57[%c0_154, %c0_155, %c0_156] : memref<1x1x12xf32, #tpu.memory_space<vmem>>, vector<1x1x12xf32>
    %309 = vector.shape_cast %308 : vector<1x1x12xf32> to vector<1x12xf32>
    %310 = vector.shape_cast %214 : vector<1x12xf32> to vector<1x1x12xf32>
    tpu.vector_store %arg57[%c0_154, %c0_155, %c0_156], %310 {strides = array<i32>} : memref<1x1x12xf32, #tpu.memory_space<vmem>>, vector<1x1x12xf32>,
    %c0_157 = arith.constant 0 : index
    %c0_158 = arith.constant 0 : index
    %311 = vector.load %arg17[%c0_157, %c0_158] : memref<32x1xf32, #tpu.memory_space<vmem>>, vector<32x1xf32>
    %312 = vector.broadcast %311 : vector<32x1xf32> to vector<32x16xf32>
    %313 = arith.mulf %21, %312 : vector<32x16xf32>
    %c0_159 = arith.constant 0 : index
    %c0_160 = arith.constant 0 : index
    %314 = vector.load %arg18[%c0_159, %c0_160] : memref<32x1xf32, #tpu.memory_space<vmem>>, vector<32x1xf32>
    %315 = vector.broadcast %314 : vector<32x1xf32> to vector<32x16xf32>
    %316 = arith.addf %313, %315 : vector<32x16xf32>
    %c0_161 = arith.constant 0 : index
    %c0_162 = arith.constant 0 : index
    %317 = vector.load %arg23[%c0_161, %c0_162] : memref<32x32xbf16, #tpu.memory_space<vmem>>, vector<32x32xbf16>
    %318 = arith.truncf %316 : vector<32x16xf32> to vector<32x16xbf16>
    %cst_163 = arith.constant dense<0.000000e+00> : vector<16x32xf32>
    %319 = tpu.matmul %318, %317, %cst_163 {dimension_numbers = #tpu.dot_dimension_numbers<[0], [0], [1], [1], [0, 1, 1, 1], [], []>} : vector<32x16xbf16>, vector<32x32xbf16>, vector<16x32xf32> -> vector<16x32xf32>
    %c0_164 = arith.constant 0 : index
    %c0_165 = arith.constant 0 : index
    %320 = vector.load %arg24[%c0_164, %c0_165] : memref<1x32xf32, #tpu.memory_space<vmem>>, vector<1x32xf32>
    %321 = vector.broadcast %320 : vector<1x32xf32> to vector<16x32xf32>
    %322 = arith.addf %319, %321 : vector<16x32xf32>
    %c0_166 = arith.constant 0 : index
    %c0_167 = arith.constant 0 : index
    %323 = vector.load %arg19[%c0_166, %c0_167] : memref<1x32xf32, #tpu.memory_space<vmem>>, vector<1x32xf32>
    %c0_168 = arith.constant 0 : index
    %c0_169 = arith.constant 0 : index
    %324 = vector.load %arg20[%c0_168, %c0_169] : memref<1x32xf32, #tpu.memory_space<vmem>>, vector<1x32xf32>
    %cst_170 = arith.constant dense<0.000000e+00> : vector<12xf32>
    %325 = vector.multi_reduction <add>, %304, %cst_170 [1] : vector<12x32xf32> to vector<12xf32>
    %326 = vector.shape_cast %325 : vector<12xf32> to vector<12x1xf32>
    %cst_171 = arith.constant 3.200000e+01 : f32
    %327 = vector.broadcast %cst_171 : f32 to vector<12x1xf32>
    %328 = arith.divf %326, %327 : vector<12x1xf32>
    %329 = vector.broadcast %328 : vector<12x1xf32> to vector<12x32xf32>
    %330 = arith.subf %304, %329 : vector<12x32xf32>
    %331 = arith.mulf %330, %330 : vector<12x32xf32>
    %cst_172 = arith.constant dense<0.000000e+00> : vector<12xf32>
    %332 = vector.multi_reduction <add>, %331, %cst_172 [1] : vector<12x32xf32> to vector<12xf32>
    %333 = vector.shape_cast %332 : vector<12xf32> to vector<12x1xf32>
    %cst_173 = arith.constant 3.200000e+01 : f32
    %334 = vector.broadcast %cst_173 : f32 to vector<12x1xf32>
    %335 = arith.divf %333, %334 : vector<12x1xf32>
    %336 = vector.broadcast %328 : vector<12x1xf32> to vector<12x32xf32>
    %337 = arith.subf %304, %336 : vector<12x32xf32>
    %cst_174 = arith.constant 9.99999974E-6 : f32
    %338 = vector.broadcast %cst_174 : f32 to vector<12x1xf32>
    %339 = arith.addf %335, %338 : vector<12x1xf32>
    %340 = math.rsqrt %339 : vector<12x1xf32>
    %341 = vector.broadcast %340 : vector<12x1xf32> to vector<12x32xf32>
    %342 = arith.mulf %337, %341 : vector<12x32xf32>
    %343 = vector.broadcast %323 : vector<1x32xf32> to vector<12x32xf32>
    %344 = arith.mulf %342, %343 : vector<12x32xf32>
    %345 = vector.broadcast %324 : vector<1x32xf32> to vector<12x32xf32>
    %346 = arith.addf %344, %345 : vector<12x32xf32>
    %c0_175 = arith.constant 0 : index
    %c0_176 = arith.constant 0 : index
    %347 = vector.load %arg25[%c0_175, %c0_176] : memref<32x32xbf16, #tpu.memory_space<vmem>>, vector<32x32xbf16>
    %348 = arith.truncf %346 : vector<12x32xf32> to vector<12x32xbf16>
    %cst_177 = arith.constant dense<0.000000e+00> : vector<12x32xf32>
    %349 = tpu.matmul %348, %347, %cst_177 {dimension_numbers = #tpu.dot_dimension_numbers<[1], [0], [0], [1], [0, 0, 1, 1], [], []>} : vector<12x32xbf16>, vector<32x32xbf16>, vector<12x32xf32> -> vector<12x32xf32>
    %c0_178 = arith.constant 0 : index
    %c0_179 = arith.constant 0 : index
    %350 = vector.load %arg26[%c0_178, %c0_179] : memref<1x32xf32, #tpu.memory_space<vmem>>, vector<1x32xf32>
    %351 = vector.broadcast %350 : vector<1x32xf32> to vector<12x32xf32>
    %352 = arith.addf %349, %351 : vector<12x32xf32>
    %c0_180 = arith.constant 0 : index
    %c0_181 = arith.constant 0 : index
    %353 = vector.load %arg21[%c0_180, %c0_181] : memref<1x32xf32, #tpu.memory_space<vmem>>, vector<1x32xf32>
    %c0_182 = arith.constant 0 : index
    %c0_183 = arith.constant 0 : index
    %354 = vector.load %arg22[%c0_182, %c0_183] : memref<1x32xf32, #tpu.memory_space<vmem>>, vector<1x32xf32>
    %cst_184 = arith.constant dense<0.000000e+00> : vector<12xf32>
    %355 = vector.multi_reduction <add>, %304, %cst_184 [1] : vector<12x32xf32> to vector<12xf32>
    %356 = vector.shape_cast %355 : vector<12xf32> to vector<12x1xf32>
    %cst_185 = arith.constant 3.200000e+01 : f32
    %357 = vector.broadcast %cst_185 : f32 to vector<12x1xf32>
    %358 = arith.divf %356, %357 : vector<12x1xf32>
    %359 = vector.broadcast %358 : vector<12x1xf32> to vector<12x32xf32>
    %360 = arith.subf %304, %359 : vector<12x32xf32>
    %361 = arith.mulf %360, %360 : vector<12x32xf32>
    %cst_186 = arith.constant dense<0.000000e+00> : vector<12xf32>
    %362 = vector.multi_reduction <add>, %361, %cst_186 [1] : vector<12x32xf32> to vector<12xf32>
    %363 = vector.shape_cast %362 : vector<12xf32> to vector<12x1xf32>
    %cst_187 = arith.constant 3.200000e+01 : f32
    %364 = vector.broadcast %cst_187 : f32 to vector<12x1xf32>
    %365 = arith.divf %363, %364 : vector<12x1xf32>
    %366 = vector.broadcast %358 : vector<12x1xf32> to vector<12x32xf32>
    %367 = arith.subf %304, %366 : vector<12x32xf32>
    %cst_188 = arith.constant 9.99999974E-6 : f32
    %368 = vector.broadcast %cst_188 : f32 to vector<12x1xf32>
    %369 = arith.addf %365, %368 : vector<12x1xf32>
    %370 = math.rsqrt %369 : vector<12x1xf32>
    %371 = vector.broadcast %370 : vector<12x1xf32> to vector<12x32xf32>
    %372 = arith.mulf %367, %371 : vector<12x32xf32>
    %373 = vector.broadcast %353 : vector<1x32xf32> to vector<12x32xf32>
    %374 = arith.mulf %372, %373 : vector<12x32xf32>
    %375 = vector.broadcast %354 : vector<1x32xf32> to vector<12x32xf32>
    %376 = arith.addf %374, %375 : vector<12x32xf32>
    %c0_189 = arith.constant 0 : index
    %c0_190 = arith.constant 0 : index
    %377 = vector.load %arg27[%c0_189, %c0_190] : memref<32x32xbf16, #tpu.memory_space<vmem>>, vector<32x32xbf16>
    %378 = arith.truncf %376 : vector<12x32xf32> to vector<12x32xbf16>
    %cst_191 = arith.constant dense<0.000000e+00> : vector<12x32xf32>
    %379 = tpu.matmul %378, %377, %cst_191 {dimension_numbers = #tpu.dot_dimension_numbers<[1], [0], [0], [1], [0, 0, 1, 1], [], []>} : vector<12x32xbf16>, vector<32x32xbf16>, vector<12x32xf32> -> vector<12x32xf32>
    %c0_192 = arith.constant 0 : index
    %c0_193 = arith.constant 0 : index
    %380 = vector.load %arg28[%c0_192, %c0_193] : memref<1x32xf32, #tpu.memory_space<vmem>>, vector<1x32xf32>
    %381 = vector.broadcast %380 : vector<1x32xf32> to vector<12x32xf32>
    %382 = arith.addf %379, %381 : vector<12x32xf32>
    %383 = arith.truncf %352 : vector<12x32xf32> to vector<12x32xbf16>
    %384 = arith.truncf %322 : vector<16x32xf32> to vector<16x32xbf16>
    %cst_194 = arith.constant dense<0.000000e+00> : vector<12x16xf32>
    %385 = tpu.matmul %383, %384, %cst_194 {dimension_numbers = #tpu.dot_dimension_numbers<[1], [1], [0], [0], [0, 0, 1, 0], [], []>} : vector<12x32xbf16>, vector<16x32xbf16>, vector<12x16xf32> -> vector<12x16xf32>
    %cst_195 = arith.constant 0.000000e+00 : f32
    %386 = vector.broadcast %cst_195 : f32 to vector<12x16xf32>
    %387 = arith.maximumf %385, %386 : vector<12x16xf32>
    %cst_196 = arith.constant 0.176776692 : f32
    %388 = vector.broadcast %cst_196 : f32 to vector<12x16xf32>
    %389 = arith.mulf %387, %388 : vector<12x16xf32>
    %cst_197 = arith.constant dense<0xFF800000> : vector<16xf32>
    %390 = vector.multi_reduction <maximumf>, %389, %cst_197 [0] : vector<12x16xf32> to vector<16xf32>
    %391 = vector.shape_cast %390 : vector<16xf32> to vector<1x16xf32>
    %392 = vector.broadcast %391 : vector<1x16xf32> to vector<12x16xf32>
    %393 = arith.subf %389, %392 : vector<12x16xf32>
    %394 = math.exp %393 : vector<12x16xf32>
    %cst_198 = arith.constant dense<0.000000e+00> : vector<16xf32>
    %395 = vector.multi_reduction <add>, %394, %cst_198 [0] : vector<12x16xf32> to vector<16xf32>
    %396 = vector.shape_cast %395 : vector<16xf32> to vector<1x16xf32>
    %397 = tpu.reciprocal %396 {approx = true} : vector<1x16xf32> -> vector<1x16xf32>
    %398 = vector.broadcast %397 : vector<1x16xf32> to vector<12x16xf32>
    %399 = arith.mulf %394, %398 : vector<12x16xf32>
    %400 = arith.truncf %382 : vector<12x32xf32> to vector<12x32xbf16>
    %401 = arith.truncf %399 : vector<12x16xf32> to vector<12x16xbf16>
    %cst_199 = arith.constant dense<0.000000e+00> : vector<32x16xf32>
    %402 = tpu.matmul %400, %401, %cst_199 {dimension_numbers = #tpu.dot_dimension_numbers<[0], [0], [1], [1], [0, 1, 1, 1], [], []>} : vector<12x32xbf16>, vector<12x16xbf16>, vector<32x16xf32> -> vector<32x16xf32>
    %c0_200 = arith.constant 0 : index
    %c0_201 = arith.constant 0 : index
    %403 = vector.load %arg29[%c0_200, %c0_201] : memref<32x32xbf16, #tpu.memory_space<vmem>>, vector<32x32xbf16>
    %404 = arith.truncf %402 : vector<32x16xf32> to vector<32x16xbf16>
    %cst_202 = arith.constant dense<0.000000e+00> : vector<32x16xf32>
    %405 = tpu.matmul %403, %404, %cst_202 {dimension_numbers = #tpu.dot_dimension_numbers<[0], [0], [1], [1], [0, 1, 1, 1], [], []>} : vector<32x32xbf16>, vector<32x16xbf16>, vector<32x16xf32> -> vector<32x16xf32>
    %406 = arith.addf %1, %405 : vector<32x16xf32>
    %c0_203 = arith.constant 0 : index
    %c0_204 = arith.constant 0 : index
    %407 = vector.load %arg30[%c0_203, %c0_204] : memref<32x1xf32, #tpu.memory_space<vmem>>, vector<32x1xf32>
    %408 = vector.broadcast %407 : vector<32x1xf32> to vector<32x16xf32>
    %409 = arith.addf %406, %408 : vector<32x16xf32>
    %c0_205 = arith.constant 0 : index
    %c0_206 = arith.constant 0 : index
    %410 = vector.load %arg47[%c0_205, %c0_206] : memref<32x1xf32, #tpu.memory_space<vmem>>, vector<32x1xf32>
    %c0_207 = arith.constant 0 : index
    %c0_208 = arith.constant 0 : index
    %411 = vector.load %arg48[%c0_207, %c0_208] : memref<32x1xf32, #tpu.memory_space<vmem>>, vector<32x1xf32>
    %cst_209 = arith.constant dense<0.000000e+00> : vector<16xf32>
    %412 = vector.multi_reduction <add>, %409, %cst_209 [0] : vector<32x16xf32> to vector<16xf32>
    %413 = vector.shape_cast %412 : vector<16xf32> to vector<1x16xf32>
    %cst_210 = arith.constant 3.200000e+01 : f32
    %414 = vector.broadcast %cst_210 : f32 to vector<1x16xf32>
    %415 = arith.divf %413, %414 : vector<1x16xf32>
    %416 = vector.broadcast %415 : vector<1x16xf32> to vector<32x16xf32>
    %417 = arith.subf %409, %416 : vector<32x16xf32>
    %418 = arith.mulf %417, %417 : vector<32x16xf32>
    %cst_211 = arith.constant dense<0.000000e+00> : vector<16xf32>
    %419 = vector.multi_reduction <add>, %418, %cst_211 [0] : vector<32x16xf32> to vector<16xf32>
    %420 = vector.shape_cast %419 : vector<16xf32> to vector<1x16xf32>
    %cst_212 = arith.constant 3.200000e+01 : f32
    %421 = vector.broadcast %cst_212 : f32 to vector<1x16xf32>
    %422 = arith.divf %420, %421 : vector<1x16xf32>
    %423 = vector.broadcast %415 : vector<1x16xf32> to vector<32x16xf32>
    %424 = arith.subf %409, %423 : vector<32x16xf32>
    %cst_213 = arith.constant 9.99999974E-6 : f32
    %425 = vector.broadcast %cst_213 : f32 to vector<1x16xf32>
    %426 = arith.addf %422, %425 : vector<1x16xf32>
    %427 = math.rsqrt %426 : vector<1x16xf32>
    %428 = vector.broadcast %427 : vector<1x16xf32> to vector<32x16xf32>
    %429 = arith.mulf %424, %428 : vector<32x16xf32>
    %430 = vector.broadcast %410 : vector<32x1xf32> to vector<32x16xf32>
    %431 = arith.mulf %429, %430 : vector<32x16xf32>
    %432 = vector.broadcast %411 : vector<32x1xf32> to vector<32x16xf32>
    %433 = arith.addf %431, %432 : vector<32x16xf32>
    %c0_214 = arith.constant 0 : index
    %c0_215 = arith.constant 0 : index
    %434 = vector.load %arg49[%c0_214, %c0_215] : memref<16x64xbf16, #tpu.memory_space<vmem>>, vector<16x64xbf16>
    %435 = arith.truncf %433 : vector<32x16xf32> to vector<32x16xbf16>
    %cst_216 = arith.constant dense<0.000000e+00> : vector<32x64xf32>
    %436 = tpu.matmul %435, %434, %cst_216 {dimension_numbers = #tpu.dot_dimension_numbers<[1], [0], [0], [1], [0, 0, 1, 1], [], []>} : vector<32x16xbf16>, vector<16x64xbf16>, vector<32x64xf32> -> vector<32x64xf32>
    %c0_217 = arith.constant 0 : index
    %c0_218 = arith.constant 0 : index
    %437 = vector.load %arg50[%c0_217, %c0_218] : memref<1x64xf32, #tpu.memory_space<vmem>>, vector<1x64xf32>
    %438 = vector.broadcast %437 : vector<1x64xf32> to vector<32x64xf32>
    %439 = arith.addf %436, %438 : vector<32x64xf32>
    %cst_219 = arith.constant 5.000000e-01 : f32
    %440 = vector.broadcast %cst_219 : f32 to vector<32x64xf32>
    %441 = arith.mulf %440, %439 : vector<32x64xf32>
    %cst_220 = arith.constant 0.707106769 : f32
    %442 = vector.broadcast %cst_220 : f32 to vector<32x64xf32>
    %443 = arith.mulf %439, %442 : vector<32x64xf32>
    %444 = math.erf %443 : vector<32x64xf32>
    %cst_221 = arith.constant 1.000000e+00 : f32
    %445 = vector.broadcast %cst_221 : f32 to vector<32x64xf32>
    %446 = arith.addf %445, %444 : vector<32x64xf32>
    %447 = arith.mulf %441, %446 : vector<32x64xf32>
    %c0_222 = arith.constant 0 : index
    %c0_223 = arith.constant 0 : index
    %448 = vector.load %arg51[%c0_222, %c0_223] : memref<64x64xbf16, #tpu.memory_space<vmem>>, vector<64x64xbf16>
    %449 = arith.truncf %447 : vector<32x64xf32> to vector<32x64xbf16>
    %cst_224 = arith.constant dense<0.000000e+00> : vector<32x64xf32>
    %450 = tpu.matmul %449, %448, %cst_224 {dimension_numbers = #tpu.dot_dimension_numbers<[1], [0], [0], [1], [0, 0, 1, 1], [], []>} : vector<32x64xbf16>, vector<64x64xbf16>, vector<32x64xf32> -> vector<32x64xf32>
    %c0_225 = arith.constant 0 : index
    %c0_226 = arith.constant 0 : index
    %451 = vector.load %arg52[%c0_225, %c0_226] : memref<1x64xf32, #tpu.memory_space<vmem>>, vector<1x64xf32>
    %452 = vector.broadcast %451 : vector<1x64xf32> to vector<32x64xf32>
    %453 = arith.addf %450, %452 : vector<32x64xf32>
    %cst_227 = arith.constant 5.000000e-01 : f32
    %454 = vector.broadcast %cst_227 : f32 to vector<32x64xf32>
    %455 = arith.mulf %454, %453 : vector<32x64xf32>
    %cst_228 = arith.constant 0.707106769 : f32
    %456 = vector.broadcast %cst_228 : f32 to vector<32x64xf32>
    %457 = arith.mulf %453, %456 : vector<32x64xf32>
    %458 = math.erf %457 : vector<32x64xf32>
    %cst_229 = arith.constant 1.000000e+00 : f32
    %459 = vector.broadcast %cst_229 : f32 to vector<32x64xf32>
    %460 = arith.addf %459, %458 : vector<32x64xf32>
    %461 = arith.mulf %455, %460 : vector<32x64xf32>
    %c0_230 = arith.constant 0 : index
    %c0_231 = arith.constant 0 : index
    %462 = vector.load %arg53[%c0_230, %c0_231] : memref<64x16xbf16, #tpu.memory_space<vmem>>, vector<64x16xbf16>
    %463 = arith.truncf %461 : vector<32x64xf32> to vector<32x64xbf16>
    %cst_232 = arith.constant dense<0.000000e+00> : vector<32x16xf32>
    %464 = tpu.matmul %463, %462, %cst_232 {dimension_numbers = #tpu.dot_dimension_numbers<[1], [0], [0], [1], [0, 0, 1, 1], [], []>} : vector<32x64xbf16>, vector<64x16xbf16>, vector<32x16xf32> -> vector<32x16xf32>
    %c0_233 = arith.constant 0 : index
    %c0_234 = arith.constant 0 : index
    %465 = vector.load %arg54[%c0_233, %c0_234] : memref<1x16xf32, #tpu.memory_space<vmem>>, vector<1x16xf32>
    %466 = vector.broadcast %465 : vector<1x16xf32> to vector<32x16xf32>
    %467 = arith.addf %464, %466 : vector<32x16xf32>
    %468 = arith.addf %409, %467 : vector<32x16xf32>
    %c0_235 = arith.constant 0 : index
    %c0_236 = arith.constant 0 : index
    %469 = vector.load %arg37[%c0_235, %c0_236] : memref<32x1xf32, #tpu.memory_space<vmem>>, vector<32x1xf32>
    %c0_237 = arith.constant 0 : index
    %c0_238 = arith.constant 0 : index
    %470 = vector.load %arg38[%c0_237, %c0_238] : memref<32x1xf32, #tpu.memory_space<vmem>>, vector<32x1xf32>
    %cst_239 = arith.constant dense<0.000000e+00> : vector<16xf32>
    %471 = vector.multi_reduction <add>, %468, %cst_239 [0] : vector<32x16xf32> to vector<16xf32>
    %472 = vector.shape_cast %471 : vector<16xf32> to vector<1x16xf32>
    %cst_240 = arith.constant 3.200000e+01 : f32
    %473 = vector.broadcast %cst_240 : f32 to vector<1x16xf32>
    %474 = arith.divf %472, %473 : vector<1x16xf32>
    %475 = vector.broadcast %474 : vector<1x16xf32> to vector<32x16xf32>
    %476 = arith.subf %468, %475 : vector<32x16xf32>
    %477 = arith.mulf %476, %476 : vector<32x16xf32>
    %cst_241 = arith.constant dense<0.000000e+00> : vector<16xf32>
    %478 = vector.multi_reduction <add>, %477, %cst_241 [0] : vector<32x16xf32> to vector<16xf32>
    %479 = vector.shape_cast %478 : vector<16xf32> to vector<1x16xf32>
    %cst_242 = arith.constant 3.200000e+01 : f32
    %480 = vector.broadcast %cst_242 : f32 to vector<1x16xf32>
    %481 = arith.divf %479, %480 : vector<1x16xf32>
    %482 = vector.broadcast %474 : vector<1x16xf32> to vector<32x16xf32>
    %483 = arith.subf %468, %482 : vector<32x16xf32>
    %cst_243 = arith.constant 9.99999974E-6 : f32
    %484 = vector.broadcast %cst_243 : f32 to vector<1x16xf32>
    %485 = arith.addf %481, %484 : vector<1x16xf32>
    %486 = math.rsqrt %485 : vector<1x16xf32>
    %487 = vector.broadcast %486 : vector<1x16xf32> to vector<32x16xf32>
    %488 = arith.mulf %483, %487 : vector<32x16xf32>
    %489 = vector.broadcast %469 : vector<32x1xf32> to vector<32x16xf32>
    %490 = arith.mulf %488, %489 : vector<32x16xf32>
    %491 = vector.broadcast %470 : vector<32x1xf32> to vector<32x16xf32>
    %492 = arith.addf %490, %491 : vector<32x16xf32>
    %c0_244 = arith.constant 0 : index
    %c0_245 = arith.constant 0 : index
    %493 = vector.load %arg39[%c0_244, %c0_245] : memref<32x128xbf16, #tpu.memory_space<vmem>>, vector<32x128xbf16>
    %494 = arith.truncf %492 : vector<32x16xf32> to vector<32x16xbf16>
    %cst_246 = arith.constant dense<0.000000e+00> : vector<128x16xf32>
    %495 = tpu.matmul %493, %494, %cst_246 {dimension_numbers = #tpu.dot_dimension_numbers<[0], [0], [1], [1], [0, 1, 1, 1], [], []>} : vector<32x128xbf16>, vector<32x16xbf16>, vector<128x16xf32> -> vector<128x16xf32>
    %c0_247 = arith.constant 0 : index
    %c0_248 = arith.constant 0 : index
    %496 = vector.load %arg40[%c0_247, %c0_248] : memref<128x1xf32, #tpu.memory_space<vmem>>, vector<128x1xf32>
    %497 = vector.broadcast %496 : vector<128x1xf32> to vector<128x16xf32>
    %498 = arith.addf %495, %497 : vector<128x16xf32>
    %cst_249 = arith.constant 5.000000e-01 : f32
    %499 = vector.broadcast %cst_249 : f32 to vector<128x16xf32>
    %500 = arith.mulf %499, %498 : vector<128x16xf32>
    %cst_250 = arith.constant 0.707106769 : f32
    %501 = vector.broadcast %cst_250 : f32 to vector<128x16xf32>
    %502 = arith.mulf %498, %501 : vector<128x16xf32>
    %503 = math.erf %502 : vector<128x16xf32>
    %cst_251 = arith.constant 1.000000e+00 : f32
    %504 = vector.broadcast %cst_251 : f32 to vector<128x16xf32>
    %505 = arith.addf %504, %503 : vector<128x16xf32>
    %506 = arith.mulf %500, %505 : vector<128x16xf32>
    %c0_252 = arith.constant 0 : index
    %c0_253 = arith.constant 0 : index
    %507 = vector.load %arg41[%c0_252, %c0_253] : memref<128x32xbf16, #tpu.memory_space<vmem>>, vector<128x32xbf16>
    %508 = arith.truncf %506 : vector<128x16xf32> to vector<128x16xbf16>
    %cst_254 = arith.constant dense<0.000000e+00> : vector<32x16xf32>
    %509 = tpu.matmul %507, %508, %cst_254 {dimension_numbers = #tpu.dot_dimension_numbers<[0], [0], [1], [1], [0, 1, 1, 1], [], []>} : vector<128x32xbf16>, vector<128x16xbf16>, vector<32x16xf32> -> vector<32x16xf32>
    %510 = arith.addf %468, %509 : vector<32x16xf32>
    %c0_255 = arith.constant 0 : index
    %c0_256 = arith.constant 0 : index
    %511 = vector.load %arg42[%c0_255, %c0_256] : memref<32x1xf32, #tpu.memory_space<vmem>>, vector<32x1xf32>
    %512 = vector.broadcast %511 : vector<32x1xf32> to vector<32x16xf32>
    %513 = arith.addf %510, %512 : vector<32x16xf32>
    %c0_257 = arith.constant 0 : index
    %c0_258 = arith.constant 0 : index
    %c0_259 = arith.constant 0 : index
    %514 = vector.load %arg55[%c0_257, %c0_258, %c0_259] : memref<1x32x16xf32, #tpu.memory_space<vmem>>, vector<1x32x16xf32>
    %515 = vector.shape_cast %514 : vector<1x32x16xf32> to vector<32x16xf32>
    %516 = vector.shape_cast %513 : vector<32x16xf32> to vector<1x32x16xf32>
    tpu.vector_store %arg55[%c0_257, %c0_258, %c0_259], %516 {strides = array<i32>} : memref<1x32x16xf32, #tpu.memory_space<vmem>>, vector<1x32x16xf32>,
    return
  }
  func.func @transform_0(%arg0: i32) -> (i32, i32, i32) {
    %c0_i32 = arith.constant 0 : i32
    %c0_i32_0 = arith.constant 0 : i32
    %c0_i32_1 = arith.constant 0 : i32
    return %arg0, %c0_i32, %c0_i32_0 : i32, i32, i32
  }
  func.func @transform_1(%arg0: i32) -> (i32, i32, i32) {
    %c0_i32 = arith.constant 0 : i32
    %c0_i32_0 = arith.constant 0 : i32
    %c0_i32_1 = arith.constant 0 : i32
    return %arg0, %c0_i32, %c0_i32_0 : i32, i32, i32
  }
  func.func @transform_2(%arg0: i32) -> (i32, i32) {
    %c0_i32 = arith.constant 0 : i32
    %c0_i32_0 = arith.constant 0 : i32
    %c0_i32_1 = arith.constant 0 : i32
    return %c0_i32, %c0_i32_0 : i32, i32
  }
  func.func @transform_3(%arg0: i32) -> (i32, i32) {
    %c0_i32 = arith.constant 0 : i32
    %c0_i32_0 = arith.constant 0 : i32
    %c0_i32_1 = arith.constant 0 : i32
    return %c0_i32, %c0_i32_0 : i32, i32
  }
  func.func @transform_4(%arg0: i32) -> (i32, i32) {
    %c0_i32 = arith.constant 0 : i32
    %c0_i32_0 = arith.constant 0 : i32
    %c0_i32_1 = arith.constant 0 : i32
    return %c0_i32, %c0_i32_0 : i32, i32
  }
  func.func @transform_5(%arg0: i32) -> (i32, i32) {
    %c0_i32 = arith.constant 0 : i32
    %c0_i32_0 = arith.constant 0 : i32
    %c0_i32_1 = arith.constant 0 : i32
    return %c0_i32, %c0_i32_0 : i32, i32
  }
  func.func @transform_6(%arg0: i32) -> (i32, i32) {
    %c0_i32 = arith.constant 0 : i32
    %c0_i32_0 = arith.constant 0 : i32
    %c0_i32_1 = arith.constant 0 : i32
    return %c0_i32, %c0_i32_0 : i32, i32
  }
  func.func @transform_7(%arg0: i32) -> (i32, i32) {
    %c0_i32 = arith.constant 0 : i32
    %c0_i32_0 = arith.constant 0 : i32
    %c0_i32_1 = arith.constant 0 : i32
    return %c0_i32, %c0_i32_0 : i32, i32
  }
  func.func @transform_8(%arg0: i32) -> (i32, i32) {
    %c0_i32 = arith.constant 0 : i32
    %c0_i32_0 = arith.constant 0 : i32
    %c0_i32_1 = arith.constant 0 : i32
    return %c0_i32, %c0_i32_0 : i32, i32
  }
  func.func @transform_9(%arg0: i32) -> (i32, i32) {
    %c0_i32 = arith.constant 0 : i32
    %c0_i32_0 = arith.constant 0 : i32
    %c0_i32_1 = arith.constant 0 : i32
    return %c0_i32, %c0_i32_0 : i32, i32
  }
  func.func @transform_10(%arg0: i32) -> (i32, i32) {
    %c0_i32 = arith.constant 0 : i32
    %c0_i32_0 = arith.constant 0 : i32
    %c0_i32_1 = arith.constant 0 : i32
    return %c0_i32, %c0_i32_0 : i32, i32
  }
  func.func @transform_11(%arg0: i32) -> (i32, i32) {
    %c0_i32 = arith.constant 0 : i32
    %c0_i32_0 = arith.constant 0 : i32
    %c0_i32_1 = arith.constant 0 : i32
    return %c0_i32, %c0_i32_0 : i32, i32
  }
  func.func @transform_12(%arg0: i32) -> (i32, i32) {
    %c0_i32 = arith.constant 0 : i32
    %c0_i32_0 = arith.constant 0 : i32
    %c0_i32_1 = arith.constant 0 : i32
    return %c0_i32, %c0_i32_0 : i32, i32
  }
  func.func @transform_13(%arg0: i32) -> (i32, i32) {
    %c0_i32 = arith.constant 0 : i32
    %c0_i32_0 = arith.constant 0 : i32
    %c0_i32_1 = arith.constant 0 : i32
    return %c0_i32, %c0_i32_0 : i32, i32
  }
  func.func @transform_14(%arg0: i32) -> (i32, i32) {
    %c0_i32 = arith.constant 0 : i32
    %c0_i32_0 = arith.constant 0 : i32
    %c0_i32_1 = arith.constant 0 : i32
    return %c0_i32, %c0_i32_0 : i32, i32
  }
  func.func @transform_15(%arg0: i32) -> (i32, i32) {
    %c0_i32 = arith.constant 0 : i32
    %c0_i32_0 = arith.constant 0 : i32
    %c0_i32_1 = arith.constant 0 : i32
    return %c0_i32, %c0_i32_0 : i32, i32
  }
  func.func @transform_16(%arg0: i32) -> (i32, i32) {
    %c0_i32 = arith.constant 0 : i32
    %c0_i32_0 = arith.constant 0 : i32
    %c0_i32_1 = arith.constant 0 : i32
    return %c0_i32, %c0_i32_0 : i32, i32
  }
  func.func @transform_17(%arg0: i32) -> (i32, i32) {
    %c0_i32 = arith.constant 0 : i32
    %c0_i32_0 = arith.constant 0 : i32
    %c0_i32_1 = arith.constant 0 : i32
    return %c0_i32, %c0_i32_0 : i32, i32
  }
  func.func @transform_18(%arg0: i32) -> (i32, i32) {
    %c0_i32 = arith.constant 0 : i32
    %c0_i32_0 = arith.constant 0 : i32
    %c0_i32_1 = arith.constant 0 : i32
    return %c0_i32, %c0_i32_0 : i32, i32
  }
  func.func @transform_19(%arg0: i32) -> (i32, i32) {
    %c0_i32 = arith.constant 0 : i32
    %c0_i32_0 = arith.constant 0 : i32
    %c0_i32_1 = arith.constant 0 : i32
    return %c0_i32, %c0_i32_0 : i32, i32
  }
  func.func @transform_20(%arg0: i32) -> (i32, i32) {
    %c0_i32 = arith.constant 0 : i32
    %c0_i32_0 = arith.constant 0 : i32
    %c0_i32_1 = arith.constant 0 : i32
    return %c0_i32, %c0_i32_0 : i32, i32
  }
  func.func @transform_21(%arg0: i32) -> (i32, i32) {
    %c0_i32 = arith.constant 0 : i32
    %c0_i32_0 = arith.constant 0 : i32
    %c0_i32_1 = arith.constant 0 : i32
    return %c0_i32, %c0_i32_0 : i32, i32
  }
  func.func @transform_22(%arg0: i32) -> (i32, i32) {
    %c0_i32 = arith.constant 0 : i32
    %c0_i32_0 = arith.constant 0 : i32
    %c0_i32_1 = arith.constant 0 : i32
    return %c0_i32, %c0_i32_0 : i32, i32
  }
  func.func @transform_23(%arg0: i32) -> (i32, i32) {
    %c0_i32 = arith.constant 0 : i32
    %c0_i32_0 = arith.constant 0 : i32
    %c0_i32_1 = arith.constant 0 : i32
    return %c0_i32, %c0_i32_0 : i32, i32
  }
  func.func @transform_24(%arg0: i32) -> (i32, i32) {
    %c0_i32 = arith.constant 0 : i32
    %c0_i32_0 = arith.constant 0 : i32
    %c0_i32_1 = arith.constant 0 : i32
    return %c0_i32, %c0_i32_0 : i32, i32
  }
  func.func @transform_25(%arg0: i32) -> (i32, i32) {
    %c0_i32 = arith.constant 0 : i32
    %c0_i32_0 = arith.constant 0 : i32
    %c0_i32_1 = arith.constant 0 : i32
    return %c0_i32, %c0_i32_0 : i32, i32
  }
  func.func @transform_26(%arg0: i32) -> (i32, i32) {
    %c0_i32 = arith.constant 0 : i32
    %c0_i32_0 = arith.constant 0 : i32
    %c0_i32_1 = arith.constant 0 : i32
    return %c0_i32, %c0_i32_0 : i32, i32
  }
  func.func @transform_27(%arg0: i32) -> (i32, i32) {
    %c0_i32 = arith.constant 0 : i32
    %c0_i32_0 = arith.constant 0 : i32
    %c0_i32_1 = arith.constant 0 : i32
    return %c0_i32, %c0_i32_0 : i32, i32
  }
  func.func @transform_28(%arg0: i32) -> (i32, i32) {
    %c0_i32 = arith.constant 0 : i32
    %c0_i32_0 = arith.constant 0 : i32
    %c0_i32_1 = arith.constant 0 : i32
    return %c0_i32, %c0_i32_0 : i32, i32
  }
  func.func @transform_29(%arg0: i32) -> (i32, i32) {
    %c0_i32 = arith.constant 0 : i32
    %c0_i32_0 = arith.constant 0 : i32
    %c0_i32_1 = arith.constant 0 : i32
    return %c0_i32, %c0_i32_0 : i32, i32
  }
  func.func @transform_30(%arg0: i32) -> (i32, i32) {
    %c0_i32 = arith.constant 0 : i32
    %c0_i32_0 = arith.constant 0 : i32
    %c0_i32_1 = arith.constant 0 : i32
    return %c0_i32, %c0_i32_0 : i32, i32
  }
  func.func @transform_31(%arg0: i32) -> (i32, i32) {
    %c0_i32 = arith.constant 0 : i32
    %c0_i32_0 = arith.constant 0 : i32
    %c0_i32_1 = arith.constant 0 : i32
    return %c0_i32, %c0_i32_0 : i32, i32
  }
  func.func @transform_32(%arg0: i32) -> (i32, i32) {
    %c0_i32 = arith.constant 0 : i32
    %c0_i32_0 = arith.constant 0 : i32
    %c0_i32_1 = arith.constant 0 : i32
    return %c0_i32, %c0_i32_0 : i32, i32
  }
  func.func @transform_33(%arg0: i32) -> (i32, i32) {
    %c0_i32 = arith.constant 0 : i32
    %c0_i32_0 = arith.constant 0 : i32
    %c0_i32_1 = arith.constant 0 : i32
    return %c0_i32, %c0_i32_0 : i32, i32
  }
  func.func @transform_34(%arg0: i32) -> (i32, i32) {
    %c0_i32 = arith.constant 0 : i32
    %c0_i32_0 = arith.constant 0 : i32
    %c0_i32_1 = arith.constant 0 : i32
    return %c0_i32, %c0_i32_0 : i32, i32
  }
  func.func @transform_35(%arg0: i32) -> (i32, i32) {
    %c0_i32 = arith.constant 0 : i32
    %c0_i32_0 = arith.constant 0 : i32
    %c0_i32_1 = arith.constant 0 : i32
    return %c0_i32, %c0_i32_0 : i32, i32
  }
  func.func @transform_36(%arg0: i32) -> (i32, i32) {
    %c0_i32 = arith.constant 0 : i32
    %c0_i32_0 = arith.constant 0 : i32
    %c0_i32_1 = arith.constant 0 : i32
    return %c0_i32, %c0_i32_0 : i32, i32
  }
  func.func @transform_37(%arg0: i32) -> (i32, i32) {
    %c0_i32 = arith.constant 0 : i32
    %c0_i32_0 = arith.constant 0 : i32
    %c0_i32_1 = arith.constant 0 : i32
    return %c0_i32, %c0_i32_0 : i32, i32
  }
  func.func @transform_38(%arg0: i32) -> (i32, i32) {
    %c0_i32 = arith.constant 0 : i32
    %c0_i32_0 = arith.constant 0 : i32
    %c0_i32_1 = arith.constant 0 : i32
    return %c0_i32, %c0_i32_0 : i32, i32
  }
  func.func @transform_39(%arg0: i32) -> (i32, i32) {
    %c0_i32 = arith.constant 0 : i32
    %c0_i32_0 = arith.constant 0 : i32
    %c0_i32_1 = arith.constant 0 : i32
    return %c0_i32, %c0_i32_0 : i32, i32
  }
  func.func @transform_40(%arg0: i32) -> (i32, i32) {
    %c0_i32 = arith.constant 0 : i32
    %c0_i32_0 = arith.constant 0 : i32
    %c0_i32_1 = arith.constant 0 : i32
    return %c0_i32, %c0_i32_0 : i32, i32
  }
  func.func @transform_41(%arg0: i32) -> (i32, i32) {
    %c0_i32 = arith.constant 0 : i32
    %c0_i32_0 = arith.constant 0 : i32
    %c0_i32_1 = arith.constant 0 : i32
    return %c0_i32, %c0_i32_0 : i32, i32
  }
  func.func @transform_42(%arg0: i32) -> (i32, i32) {
    %c0_i32 = arith.constant 0 : i32
    %c0_i32_0 = arith.constant 0 : i32
    %c0_i32_1 = arith.constant 0 : i32
    return %c0_i32, %c0_i32_0 : i32, i32
  }
  func.func @transform_43(%arg0: i32) -> (i32, i32) {
    %c0_i32 = arith.constant 0 : i32
    %c0_i32_0 = arith.constant 0 : i32
    %c0_i32_1 = arith.constant 0 : i32
    return %c0_i32, %c0_i32_0 : i32, i32
  }
  func.func @transform_44(%arg0: i32) -> (i32, i32) {
    %c0_i32 = arith.constant 0 : i32
    %c0_i32_0 = arith.constant 0 : i32
    %c0_i32_1 = arith.constant 0 : i32
    return %c0_i32, %c0_i32_0 : i32, i32
  }
  func.func @transform_45(%arg0: i32) -> (i32, i32) {
    %c0_i32 = arith.constant 0 : i32
    %c0_i32_0 = arith.constant 0 : i32
    %c0_i32_1 = arith.constant 0 : i32
    return %c0_i32, %c0_i32_0 : i32, i32
  }
  func.func @transform_46(%arg0: i32) -> (i32, i32) {
    %c0_i32 = arith.constant 0 : i32
    %c0_i32_0 = arith.constant 0 : i32
    %c0_i32_1 = arith.constant 0 : i32
    return %c0_i32, %c0_i32_0 : i32, i32
  }
  func.func @transform_47(%arg0: i32) -> (i32, i32) {
    %c0_i32 = arith.constant 0 : i32
    %c0_i32_0 = arith.constant 0 : i32
    %c0_i32_1 = arith.constant 0 : i32
    return %c0_i32, %c0_i32_0 : i32, i32
  }
  func.func @transform_48(%arg0: i32) -> (i32, i32) {
    %c0_i32 = arith.constant 0 : i32
    %c0_i32_0 = arith.constant 0 : i32
    %c0_i32_1 = arith.constant 0 : i32
    return %c0_i32, %c0_i32_0 : i32, i32
  }
  func.func @transform_49(%arg0: i32) -> (i32, i32) {
    %c0_i32 = arith.constant 0 : i32
    %c0_i32_0 = arith.constant 0 : i32
    %c0_i32_1 = arith.constant 0 : i32
    return %c0_i32, %c0_i32_0 : i32, i32
  }
  func.func @transform_50(%arg0: i32) -> (i32, i32) {
    %c0_i32 = arith.constant 0 : i32
    %c0_i32_0 = arith.constant 0 : i32
    %c0_i32_1 = arith.constant 0 : i32
    return %c0_i32, %c0_i32_0 : i32, i32
  }
  func.func @transform_51(%arg0: i32) -> (i32, i32) {
    %c0_i32 = arith.constant 0 : i32
    %c0_i32_0 = arith.constant 0 : i32
    %c0_i32_1 = arith.constant 0 : i32
    return %c0_i32, %c0_i32_0 : i32, i32
  }
  func.func @transform_52(%arg0: i32) -> (i32, i32) {
    %c0_i32 = arith.constant 0 : i32
    %c0_i32_0 = arith.constant 0 : i32
    %c0_i32_1 = arith.constant 0 : i32
    return %c0_i32, %c0_i32_0 : i32, i32
  }
  func.func @transform_53(%arg0: i32) -> (i32, i32) {
    %c0_i32 = arith.constant 0 : i32
    %c0_i32_0 = arith.constant 0 : i32
    %c0_i32_1 = arith.constant 0 : i32
    return %c0_i32, %c0_i32_0 : i32, i32
  }
  func.func @transform_54(%arg0: i32) -> (i32, i32, i32) {
    %c0_i32 = arith.constant 0 : i32
    %c0_i32_0 = arith.constant 0 : i32
    %c0_i32_1 = arith.constant 0 : i32
    return %arg0, %c0_i32, %c0_i32_0 : i32, i32, i32
  }
  func.func @transform_55(%arg0: i32) -> (i32, i32, i32) {
    %c0_i32 = arith.constant 0 : i32
    %c0_i32_0 = arith.constant 0 : i32
    %c0_i32_1 = arith.constant 0 : i32
    return %arg0, %c0_i32, %c0_i32_0 : i32, i32, i32
  }
  func.func @transform_56(%arg0: i32) -> (i32, i32, i32) {
    %c0_i32 = arith.constant 0 : i32
    %c0_i32_0 = arith.constant 0 : i32
    %c0_i32_1 = arith.constant 0 : i32
    return %arg0, %c0_i32, %c0_i32_0 : i32, i32, i32
  }
}

</mosaic_0001>

<bundles_post_ra>
// kernel: block_forward.1
= control target key start
LH: loop header
LB: loop body
LE: loop exit
PB: predicated region body
PF: predicated region fallthrough
CT: control target
= control target key end

     0   :  { %s6031_s6 = smov 1   ;;  %s6032_s10 = smov 2   ;;  %s7143_s0 = inlined_call_operand.smem [shape: u32[57], index: -1, kind: input, shape index: {}] }
   0x1   :  { %s6102_s5 = sld [smem:[%s7143_s0]]   ;;  %s6033_s14 = smov 3  }
   0x2   :  { %s6107_s9 = sld [smem:[%s7143_s0 + %s6031_s6]]   ;;  %s6034_s18 = smov 4  }
   0x3   :  { %s6112_s13 = sld [smem:[%s7143_s0 + %s6032_s10]]   ;;  %s6035_s22 = smov 5  }
   0x4   :  { %s6117_s17 = sld [smem:[%s7143_s0 + %s6033_s14]]   ;;  %s6036_s26 = smov 6  }
   0x5   :  { %s6122_s21 = sld [smem:[%s7143_s0 + %s6034_s18]]   ;;  %s6037_s30 = smov 7  }
   0x6   :  { %s6127_s25 = sld [smem:[%s7143_s0 + %s6035_s22]]   ;;  %s6038_s4 = smov 8  }
   0x7   :  { %7193 = sst [smem:[#allocation8_spill]] %s6102_s5  ;;  %s6039_s10 = smov 9  }
   0x8   :  { %7194 = sst [smem:[#allocation9_spill]] %s6107_s9  ;;  %s6040_s15 = smov 10  }
   0x9   :  { %7195 = sst [smem:[#allocation10_spill]] %s6112_s13  ;;  %s6041_s20 = smov 11  }
   0xa   :  { %7196 = sst [smem:[#allocation11_spill]] %s6117_s17  ;;  %s6043_s1 = smov 13  }
   0xb   :  { %7197 = sst [smem:[#allocation12_spill]] %s6122_s21  ;;  %s6044_s7 = smov 14  }
   0xc   :  { %s6132_s29 = sld [smem:[%s7143_s0 + %s6036_s26]]   ;;  %s6042_s26 = smov 12  }
   0xd   :  { %s6137_s3 = sld [smem:[%s7143_s0 + %s6037_s30]]   ;;  %s6046_s22 = smov 16  }
   0xe   :  { %s6142_s8 = sld [smem:[%s7143_s0 + %s6038_s4]]   ;;  %s6047_s28 = smov 17  }
   0xf   :  { %s6147_s14 = sld [smem:[%s7143_s0 + %s6039_s10]]  }
  0x10   :  { %s6152_s19 = sld [smem:[%s7143_s0 + %s6040_s15]]   ;;  %s6045_s15 = smov 15  }
  0x11   :  { %s6157_s24 = sld [smem:[%s7143_s0 + %s6041_s20]]  }
  0x12   :  { %s6162_s30 = sld [smem:[%s7143_s0 + %s6042_s26]]  }
  0x13   :  { %7198 = sst [smem:[#allocation13_spill]] %s6137_s3 }
  0x14   :  { %7199 = sst [smem:[#allocation14_spill]] %s6142_s8 }
  0x15   :  { %7200 = sst [smem:[#allocation15_spill]] %s6147_s14 }
  0x16   :  { %7201 = sst [smem:[#allocation16_spill]] %s6152_s19 }
  0x17   :  { %7202 = sst [smem:[#allocation17_spill]] %s6157_s24 }
  0x18   :  { %s6167_s6 = sld [smem:[%s7143_s0 + %s6043_s1]]  }
  0x19   :  { %s6172_s12 = sld [smem:[%s7143_s0 + %s6044_s7]]   ;;  %s6048_s7 = smov 18  }
  0x1a   :  { %s6177_s20 = sld [smem:[%s7143_s0 + %s6045_s15]]   ;;  %s6049_s15 = smov 19  }
  0x1b   :  { %s6182_s27 = sld [smem:[%s7143_s0 + %s6046_s22]]   ;;  %s6050_s22 = smov 20  }
  0x1c   :  { %s6187_s4 = sld [smem:[%s7143_s0 + %s6047_s28]]   ;;  %s6051_s28 = smov 21  }
  0x1e   :  { %7203 = sst [smem:[#allocation18_spill]] %s6167_s6 }
  0x1f   :  { %7204 = sst [smem:[#allocation19_spill]] %s6172_s12 }
  0x20   :  { %7205 = sst [smem:[#allocation20_spill]] %s6177_s20 }
  0x21   :  { %7206 = sst [smem:[#allocation21_spill]] %s6182_s27 }
  0x22   :  { %7207 = sst [smem:[#allocation22_spill]] %s6187_s4 }
  0x23   :  { %s6192_s12 = sld [smem:[%s7143_s0 + %s6048_s7]]   ;;  %s6052_s7 = smov 22  }
  0x24   :  { %s6197_s20 = sld [smem:[%s7143_s0 + %s6049_s15]]   ;;  %s6053_s15 = smov 23  }
  0x25   :  { %s6202_s27 = sld [smem:[%s7143_s0 + %s6050_s22]]   ;;  %s6054_s22 = smov 24  }
  0x26   :  { %s6207_s4 = sld [smem:[%s7143_s0 + %s6051_s28]]   ;;  %s6055_s28 = smov 25  }
  0x29   :  { %7208 = sst [smem:[#allocation23_spill]] %s6192_s12 }
  0x2a   :  { %7209 = sst [smem:[#allocation24_spill]] %s6197_s20 }
  0x2b   :  { %7210 = sst [smem:[#allocation25_spill]] %s6202_s27 }
  0x2c   :  { %7211 = sst [smem:[#allocation26_spill]] %s6207_s4 }
  0x2d   :  { %s6212_s12 = sld [smem:[%s7143_s0 + %s6052_s7]]   ;;  %s6056_s7 = smov 26  }
  0x2e   :  { %s6217_s20 = sld [smem:[%s7143_s0 + %s6053_s15]]   ;;  %s6057_s15 = smov 27  }
  0x2f   :  { %s6222_s27 = sld [smem:[%s7143_s0 + %s6054_s22]]   ;;  %s6058_s22 = smov 28  }
  0x30   :  { %s6227_s4 = sld [smem:[%s7143_s0 + %s6055_s28]]   ;;  %s6059_s28 = smov 29  }
  0x33   :  { %7212 = sst [smem:[#allocation27_spill]] %s6212_s12 }
  0x34   :  { %7213 = sst [smem:[#allocation28_spill]] %s6217_s20 }
  0x35   :  { %7214 = sst [smem:[#allocation29_spill]] %s6222_s27 }
  0x36   :  { %7215 = sst [smem:[#allocation30_spill]] %s6227_s4 }
  0x37   :  { %s6232_s12 = sld [smem:[%s7143_s0 + %s6056_s7]]   ;;  %s6060_s7 = smov 30  }
  0x38   :  { %s6237_s20 = sld [smem:[%s7143_s0 + %s6057_s15]]   ;;  %s6061_s15 = smov 31  }
  0x39   :  { %s6242_s27 = sld [smem:[%s7143_s0 + %s6058_s22]]   ;;  %s6062_s22 = smov 32  }
  0x3a   :  { %s6247_s4 = sld [smem:[%s7143_s0 + %s6059_s28]]   ;;  %s6063_s28 = smov 33  }
  0x3d   :  { %7216 = sst [smem:[#allocation31_spill]] %s6232_s12 }
  0x3e   :  { %7217 = sst [smem:[#allocation32_spill]] %s6237_s20 }
  0x3f   :  { %7218 = sst [smem:[#allocation33_spill]] %s6242_s27 }
  0x40   :  { %7219 = sst [smem:[#allocation34_spill]] %s6247_s4 }
  0x41   :  { %s6252_s12 = sld [smem:[%s7143_s0 + %s6060_s7]]   ;;  %s6064_s7 = smov 34  }
  0x42   :  { %s6257_s20 = sld [smem:[%s7143_s0 + %s6061_s15]]   ;;  %s6065_s15 = smov 35  }
  0x43   :  { %s6262_s27 = sld [smem:[%s7143_s0 + %s6062_s22]]   ;;  %s6066_s22 = smov 36  }
  0x44   :  { %s6267_s4 = sld [smem:[%s7143_s0 + %s6063_s28]]   ;;  %s6067_s28 = smov 37  }
  0x47   :  { %7220 = sst [smem:[#allocation35_spill]] %s6252_s12 }
  0x48   :  { %7221 = sst [smem:[#allocation36_spill]] %s6257_s20 }
  0x49   :  { %7222 = sst [smem:[#allocation37_spill]] %s6262_s27 }
  0x4a   :  { %7223 = sst [smem:[#allocation38_spill]] %s6267_s4 }
  0x4b   :  { %s6272_s12 = sld [smem:[%s7143_s0 + %s6064_s7]]   ;;  %s6068_s7 = smov 38  }
  0x4c   :  { %s6277_s20 = sld [smem:[%s7143_s0 + %s6065_s15]]   ;;  %s6069_s15 = smov 39  }
  0x4d   :  { %s6282_s27 = sld [smem:[%s7143_s0 + %s6066_s22]]   ;;  %s6070_s22 = smov 40  }
  0x4e   :  { %s6287_s4 = sld [smem:[%s7143_s0 + %s6067_s28]]   ;;  %s6071_s28 = smov 41  }
  0x51   :  { %7224 = sst [smem:[#allocation39_spill]] %s6272_s12 }
  0x52   :  { %7225 = sst [smem:[#allocation40_spill]] %s6277_s20 }
  0x53   :  { %7226 = sst [smem:[#allocation41_spill]] %s6282_s27 }
  0x54   :  { %7227 = sst [smem:[#allocation42_spill]] %s6287_s4 }
  0x55   :  { %s6292_s12 = sld [smem:[%s7143_s0 + %s6068_s7]]   ;;  %s6072_s7 = smov 42  }
  0x56   :  { %s6297_s20 = sld [smem:[%s7143_s0 + %s6069_s15]]   ;;  %s6073_s15 = smov 43  }
  0x57   :  { %s6302_s27 = sld [smem:[%s7143_s0 + %s6070_s22]]   ;;  %s6074_s22 = smov 44  }
  0x58   :  { %s6307_s4 = sld [smem:[%s7143_s0 + %s6071_s28]]   ;;  %s6075_s28 = smov 45  }
  0x5b   :  { %7228 = sst [smem:[#allocation43_spill]] %s6292_s12 }
  0x5c   :  { %7229 = sst [smem:[#allocation44_spill]] %s6297_s20 }
  0x5d   :  { %7230 = sst [smem:[#allocation45_spill]] %s6302_s27 }
  0x5e   :  { %7231 = sst [smem:[#allocation46_spill]] %s6307_s4 }
  0x5f   :  { %s6312_s12 = sld [smem:[%s7143_s0 + %s6072_s7]]   ;;  %s6076_s7 = smov 46  }
  0x60   :  { %s6317_s20 = sld [smem:[%s7143_s0 + %s6073_s15]]   ;;  %s6077_s15 = smov 47  }
  0x61   :  { %s6322_s27 = sld [smem:[%s7143_s0 + %s6074_s22]]   ;;  %s6078_s22 = smov 48  }
  0x62   :  { %s6327_s4 = sld [smem:[%s7143_s0 + %s6075_s28]]   ;;  %s6079_s28 = smov 49  }
  0x65   :  { %7232 = sst [smem:[#allocation47_spill]] %s6312_s12 }
  0x66   :  { %7233 = sst [smem:[#allocation48_spill]] %s6317_s20 }
  0x67   :  { %7234 = sst [smem:[#allocation49_spill]] %s6322_s27 }
  0x68   :  { %7235 = sst [smem:[#allocation50_spill]] %s6327_s4 }
  0x69   :  { %s6332_s12 = sld [smem:[%s7143_s0 + %s6076_s7]]   ;;  %s6080_s7 = smov 50  }
  0x6a   :  { %s6337_s20 = sld [smem:[%s7143_s0 + %s6077_s15]]   ;;  %s6081_s15 = smov 51  }
  0x6b   :  { %s6342_s27 = sld [smem:[%s7143_s0 + %s6078_s22]]   ;;  %s6082_s22 = smov 52  }
  0x6c   :  { %s6347_s4 = sld [smem:[%s7143_s0 + %s6079_s28]]   ;;  %s6083_s28 = smov 53  }
  0x6f   :  { %7236 = sst [smem:[#allocation51_spill]] %s6332_s12 }
  0x70   :  { %7237 = sst [smem:[#allocation52_spill]] %s6337_s20 }
  0x71   :  { %7238 = sst [smem:[#allocation53_spill]] %s6342_s27 }
  0x72   :  { %7239 = sst [smem:[#allocation54_spill]] %s6347_s4 }
  0x73   :  { %s6352_s12 = sld [smem:[%s7143_s0 + %s6080_s7]]   ;;  %s6084_s7 = smov 54  }
  0x74   :  { %s6357_s20 = sld [smem:[%s7143_s0 + %s6081_s15]]   ;;  %s6085_s15 = smov 55  }
  0x75   :  { %s6362_s27 = sld [smem:[%s7143_s0 + %s6082_s22]]   ;;  %s6086_s22 = smov 56  }
  0x76   :  { %s6367_s4 = sld [smem:[%s7143_s0 + %s6083_s28]]  }
  0x79   :  { %7240 = sst [smem:[#allocation55_spill]] %s6352_s12 }
  0x7a   :  { %7241 = sst [smem:[#allocation56_spill]] %s6357_s20 }
  0x7b   :  { %7242 = sst [smem:[#allocation57_spill]] %s6362_s27 }
  0x7c   :  { %7243 = sst [smem:[#allocation58_spill]] %s6367_s4 }
  0x7d   :  { %s6372_s12 = sld [smem:[%s7143_s0 + %s6084_s7]]  }
  0x7e   :  { %s6377_s20 = sld [smem:[%s7143_s0 + %s6085_s15]]  }
  0x7f   :  { %s6382_s27 = sld [smem:[%s7143_s0 + %s6086_s22]]  }
  0x80   :  { %119 = vsyncpa [#allocation3], 0 }
  0x81   :  { %121 = vsyncpa [#allocation3 + $0x1], 0 }
  0x82   :  { %122 = vsyncpa [#allocation5], 0 }
  0x83   :  { %124 = vsyncpa [#allocation5 + $0x1], 0  ;;  %s6384_s28 = smov 0   ;;  %s6386_s1 = smov 0  }
  0x84   :  { %s6388_s2 = smov 0   ;;  %s6390_s7 = smov 0  }
  0x85 LB: > { %s7244_s21 = sld [smem:[#allocation12_spill]]  ;;  %s7245_s19 = sld [smem:[#allocation16_spill]]  ;;  %s6029_s7 = sphi %s6390_s7, %s7305_s7   ;;  %s6025_s2 = sphi %s6388_s2, %s7304_s2   ;;  %s6021_s1 = sphi %s6386_s1, %s7303_s1   ;;  %s6017_s28 = sphi %s6384_s28, %s7302_s28  }
  0x86   : > { %s7246_s8 = sld [smem:[#allocation14_spill]]  ;;  %s7247_s3 = sld [smem:[#allocation13_spill]] }
  0x87   : > { %s6405_s0 = sadd.s32 4294967295, %s6029_s7   ;;  %s5185_s10 = sadd.s32 4294967294, %s6029_s7  }
  0x88   : > { %s6409_s11 = sadd.s32 1, %s6029_s7   ;;  %s1307_s15 = sadd.s32 1, %s6025_s2 }
  0x89   : > { %s1304_s16 = ssub.s32 %s6029_s7, %s6409_s11  ;;  %p1317_p0 = scmp.ne.s32.totalorder %s6025_s2, %s6021_s1 }
  0x8a   : > { %p1305_p1 = scmp.eq.s32.totalorder %s1304_s16, 0  ;;  %p1318_p2 = scmp.eq.s32.totalorder %s6405_s0, 1 }
  0x8b   : > { %p1323_p3 = scmp.ne.s32.totalorder %s6021_s1, %s6017_s28  ;;  %p1324_p4 = scmp.eq.s32.totalorder %s5185_s10, 1 }
  0x8c   : > { %s6420_s18 = scalar_select %p1305_p1, %s6025_s2, %s1307_s15  }
  0x8d   : > { %p6422_p5 = por %p1318_p2, %p1317_p0  ;;  %p6426_p6 = por %p1324_p4, %p1323_p3 }
  0x8e   : > { %p5188_p7 = scmp.ge.s32.totalorder %s6029_s7, 1  ;;  %p1540_p8 = scmp.lt.s32.totalorder %s6029_s7, 3 }
  0x90   : > { %p1541_p9 = pnand %p5188_p7, %p1540_p8 }
  0x91   : > { %s7250_s9 = sld [smem:[#allocation9_spill]] (!%p1541_p9)  ;;  %p1683_p10 = scmp.lt.s32.totalorder (!%p1541_p9), %s6405_s0, 1  ;;  %v1749_v0 = vld [vmem:[%s7244_s21] sm:$0xff] (!%p1541_p9)  ;;  %v6087_v1 = vmov (!%p1541_p9), 0   ;;  %v1750_v2 = vld [vmem:[%s7244_s21 + $0x8] sm:$0xff] (!%p1541_p9)  ;;  %vm1846_vm0 = vcmask (!%p1541_p9), 261120  }
  0x92   : > { %1544 = sbr.rel (%p1541_p9) target bundleno = 8520 (0x2148), region = 236  ;;  %5770 = vset.pattern.permute.xlu1 (!%p1541_p9), %v6087_v1  ;;  %5771 = vset.pattern.permute.xlu0 (!%p1541_p9), %v6087_v1  ;;  %vm2037_vm1 = vcmask (!%p1541_p9), 257024   ;;  %v1752_v5 = vld [vmem:[%s7244_s21 + $0x18] sm:$0xff] (!%p1541_p9)  ;;  %s7251_s5 = sld [smem:[#allocation8_spill]] (!%p1541_p9)  ;;  %v1777_v8 = vld [vmem:[%s6127_s25] sm:$0xff] (!%p1541_p9)  ;;  %v1778_v9 = vld [vmem:[%s6127_s25 + $0x8] sm:$0xff] (!%p1541_p9) }
  0x93   : > { %1755 = vperm.xlu1 (!%p1541_p9), %5770, %v1749_v0   ;;  %v1779_v10 = vld [vmem:[%s6127_s25 + $0x10] sm:$0xff] (!%p1541_p9)  ;;  %v1780_v11 = vld [vmem:[%s6127_s25 + $0x18] sm:$0xff] (!%p1541_p9)  ;;  %vm1705_vm2 = vcmask (!%p1541_p9), 130048   ;;  %vm6089_vm3 = vmmov (!%p1541_p9), 0   ;;  %s7252_s13 = sld [smem:[#allocation10_spill]] (!%p1541_p9)  ;;  %s7253_s17 = sld [smem:[#allocation11_spill]] (!%p1541_p9) }
  0x94   : > { %v1751_v12 = vld [vmem:[%s7244_s21 + $0x10] sm:$0xff] (!%p1541_p9)  ;;  %s7254_s24 = sld [smem:[#allocation17_spill]] (!%p1541_p9)  ;;  %s7255_s14 = sld [smem:[#allocation15_spill]] (!%p1541_p9)  ;;  %vm2198_vm4 = vcmask (!%p1541_p9), 97280   ;;  %vm3341_vm5 = vcmask (!%p1541_p9), 90112   ;;  %vm2369_vm6 = vcmask (!%p1541_p9), 1043456  }
  0x95   : > { %s7256_s6 = sld [smem:[#allocation18_spill]] (!%p1541_p9)  ;;  %vm6091_vm7 = vmmov (!%p1541_p9), 1   ;;  %vm2452_vm9 = vcmask (!%p1541_p9), 15360   ;;  %vm2459_vm10 = vcmask (!%p1541_p9), 1041408   ;;  %vm3737_vm11 = vcmask (!%p1541_p9), 125952  }
  0x96   : > { %vm6619_vm8 = vmpackc.low (!%p1541_p9), %vm2369_vm6, %vm6091_vm7  ;;  %s7286_s21 = sld [smem:[#allocation26_spill]] (!%p1541_p9)  ;;  %vm3788_vm12 = vcmask (!%p1541_p9), 1045504   ;;  %vm4193_vm13 = vcmask (!%p1541_p9), 523264  }
  0x97   : > { %1760 = vperm.xlu1 (!%p1541_p9), %5770, %v1750_v2   ;;  %s7298_s4 = sld [smem:[#allocation58_spill]] (!%p1541_p9) }
  0x99   : > { %s6435_s26 = scalar_select %p1683_p10, %s6405_s0, 1 }
  0x9b   : > { %s5309_s10 = sshll.u32 %s6435_s26, 4  ;;  %1770 = vperm.xlu1 %5770, %v1752_v5   ;;  %s7166_s16 = sshll.u32 %s6435_s26, 5 }
  0x9c   : > { %s1692_s15 = scalar_lea.vmem %s7250_s9, %s5309_s10  ;;  %s6458_s10 = scalar_lea.vmem %s7251_s5, %s7166_s16 }
  0x9d   : > { %v6440_v3 = vld [vmem:[%s1692_s15] sm:$0xff]  ;;  %v6445_v6 = vld [vmem:[%s1692_s15 + $0x8] sm:$0xf]  ;;  %v1701_v17 = vld [vmem:[%s6458_s10 + $0x10] sm:$0xff]  ;;  %s6580_s15 = sand.u32 1, %s6021_s1   ;;  %s7257_s16 = sld [smem:[#allocation19_spill]] }
  0x9e   : > { %v2034_v4 = vsel %vm1846_vm0, %v6440_v3, 0.0  ;;  %v2038_v7 = vsel %vm2037_vm1, %v6445_v6, 0.0  ;;  %v1699_v13 = vld [vmem:[%s6458_s10] sm:$0xff]  ;;  %v1700_v14 = vld [vmem:[%s6458_s10 + $0x8] sm:$0xff]  ;;  %v1709_v19 = vsel %vm1705_vm2, %v1701_v17, 0.0  ;;  %v1702_v20 = vld [vmem:[%s6458_s10 + $0x18] sm:$0xff] }
  0x9f   : > { %2035 = vadd.xlane.f32.xlu0 %v2034_v4  ;;  %1783 = vperm.xlu1 %5770, %v1777_v8   ;;  %v1706_v15 = vsel %vm1705_vm2, %v1699_v13, 0.0  ;;  %v1707_v16 = vsel %vm1705_vm2, %v1700_v14, 0.0  ;;  %v1711_v22 = vsel %vm1705_vm2, %v1702_v20, 0.0  ;;  %v5772_v4 = vld [vmem:[%s7245_s19] sm:$0xff]   ;;  %s7259_s5 = sld [smem:[#allocation47_spill]]  ;;  %s7279_s9 = sld [smem:[#allocation41_spill]] }
  0xa0   : > { %v1708_v18 = vadd.f32 %v1707_v16, %v1706_v15  ;;  %v1891_v8 = vld [vmem:[%s6132_s29] sm:$0xff]  ;;  %v1893_v15 = vld [vmem:[%s6132_s29 + $0x10] sm:$0xff] }
  0xa2   : > { %v1710_v21 = vadd.f32 %v1709_v19, %v1708_v18 }
  0xa3   : > { %2039 = vadd.xlane.f32.xlu0 %v2038_v7  ;;  %1788 = vperm.xlu1 %5770, %v1778_v9   ;;  %v6088_v7 = vmov 0.0   ;;  %v5773_v9 = vld [vmem:[%s7245_s19 + $0x8] sm:$0xff]   ;;  %s7285_s19 = sld [smem:[#allocation24_spill]] }
  0xa4   : > { %v1712_v23 = vadd.f32 %v1711_v22, %v1710_v21  ;;  %5414 = vmatprep.subr.bf16.mxu0 %v6088_v7  ;;  %5422 = vmatprep.subr.bf16.mxu1 %v6088_v7  ;;  %v1894_v21 = vld [vmem:[%s6132_s29 + $0x18] sm:$0xff] }
  0xa5   : > { %5415 = vmatpush3.bf16.msra.mxu0 %v5772_v4  ;;  %5418 = vmatprep.mubr.msk.bf16.mxu0 %vm6089_vm3, %v6088_v7 }
  0xa6   : > { %v1713_v24 = vrot.slane %v1712_v23, 4  ;;  %5416 = vmatprep.subr.bf16.mxu0 %v6088_v7  ;;  %5426 = vmatprep.mubr.msk.bf16.mxu1 %vm6089_vm3, %v6088_v7 }
  0xa7   : > { %1793 = vperm.xlu1 %5770, %v1779_v10   ;;  %v1892_v10 = vld [vmem:[%s6132_s29 + $0x8] sm:$0xff] }
  0xa8   : > { %v1714_v25 = vadd.f32 %v1713_v24, %v1712_v23 }
  0xa9   : > { %5417 = vmatpush3.bf16.msra.mxu0 %v5773_v9 }
  0xaa   : > { %v1715_v26 = vrot.slane %v1714_v25, 2  ;;  %5430 = vmatprep.subr.bf16.mxu0 %v6088_v7 }
  0xab   : > { %1798 = vperm.xlu1 %5770, %v1780_v11  }
  0xac   : > { %v1716_v27 = vadd.f32 %v1715_v26, %v1714_v25 }
  0xae   : > { %v1717_v28 = vrot.slane %v1716_v27, 1 }
  0xb0   : > { %v1718_v29 = vadd.f32 %v1717_v28, %v1716_v27  ;;  %v1920_v27 = vld [vmem:[%s7247_s3 + $0x8] sm:$0xff] }
  0xb2   : > { %v1720_v30 = vmul.f32 0.03125, %v1718_v29 }
  0xb4   : > { %v1722_v31 = vsub.f32 %v1700_v14, %v1720_v30  ;;  %v1721_v32 = vsub.f32 %v1699_v13, %v1720_v30  ;;  %v6468_v33 = vsub.f32 %v1701_v17, %v1720_v30  ;;  %v1724_v36 = vsub.f32 %v1702_v20, %v1720_v30 }
  0xb6   : > { %v1725_v34 = vmul.f32 %v1721_v32, %v1721_v32  ;;  %v1726_v35 = vmul.f32 %v1722_v31, %v1722_v31  ;;  %v1727_v37 = vmul.f32 %v6468_v33, %v6468_v33  ;;  %v1728_v41 = vmul.f32 %v1724_v36, %v1724_v36 }
  0xb8   : > { %v1729_v38 = vsel %vm1705_vm2, %v1725_v34, 0.0  ;;  %v1730_v39 = vsel %vm1705_vm2, %v1726_v35, 0.0  ;;  %v1732_v42 = vsel %vm1705_vm2, %v1727_v37, 0.0  ;;  %v1734_v44 = vsel %vm1705_vm2, %v1728_v41, 0.0  ;;  %v1919_v34 = vld [vmem:[%s7247_s3] sm:$0xff]  ;;  %v1921_v35 = vld [vmem:[%s7247_s3 + $0x10] sm:$0xff] }
  0xb9   : > { %1765 = vperm.xlu0 %5771, %v1751_v12   ;;  %v1731_v40 = vadd.f32 %v1730_v39, %v1729_v38 }
  0xbb   : > { %v1733_v43 = vadd.f32 %v1732_v42, %v1731_v40  ;;  %v6520_v40 = vld [vmem:[%s7246_s8] sm:$0xff]  }
  0xbd   : > { %v1735_v45 = vadd.f32 %v1734_v44, %v1733_v43  ;;  %v6525_v44 = vld [vmem:[%s7246_s8 + $0x8] sm:$0xff]   ;;  %s7264_s8 = sld [smem:[#allocation50_spill]] }
  0xbf   : > { %v1736_v46 = vrot.slane %v1735_v45, 4 }
  0xc1   : > { %v1737_v47 = vadd.f32 %v1736_v46, %v1735_v45 }
  0xc3   : > { %v1738_v50 = vrot.slane %v1737_v47, 2 }
  0xc5   : > { %v1739_v55 = vadd.f32 %v1738_v50, %v1737_v47 }
  0xc7   : > { %v1740_v59 = vrot.slane %v1739_v55, 1 }
  0xc9   : > { %v1741_v62 = vadd.f32 %v1740_v59, %v1739_v55 }
  0xcb   : > { %v1742_v63 = vmul.f32 0.03125, %v1741_v62 }
  0xcd   : > { %v1743_v1 = vadd.f32 1e-05, %v1742_v63 }
  0xcf   : > { %5811 = vrsqrt.f32 %v1743_v1 }
  0xd9   : > { %v5812_v11 = vpop.eup %5811 }
  0xda   : > { %v6500_v13 = vmul.f32 %v5812_v11, %v1721_v32  ;;  %v6502_v14 = vmul.f32 %v5812_v11, %v1722_v31  ;;  %v6507_v19 = vmul.f32 %v5812_v11, %v1724_v36  ;;  %v6510_v20 = vmul.f32 %v5812_v11, %v6468_v33  ;;  %v1922_v32 = vld [vmem:[%s7247_s3 + $0x18] sm:$0xff]  ;;  %s7168_s3 = scalar_lea.vmem [#allocation2], %s6580_s15 }
 0x112   : > { %v1756_v61 = vpop.permute.xlu1 %1755 }
 0x113   : > { %v1773_v17 = vmul.f32 %v1756_v61, %v6500_v13 }
 0x116   : > { %v1761_v0 = vpop.permute.xlu1 %1760 }
 0x117   : > { %v1774_v18 = vmul.f32 %v1761_v0, %v6502_v14 }
 0x11a   : > { %v1771_v2 = vpop.permute.xlu1 %1770 }
 0x11b   : > { %v1776_v23 = vmul.f32 %v1771_v2, %v6507_v19 }
 0x11e   : > { %v1784_v5 = vpop.permute.xlu1 %1783 }
 0x11f   : > { %v1801_v24 = vadd.f32 %v1784_v5, %v1773_v17 }
 0x122   : > { %v1789_v12 = vpop.permute.xlu1 %1788 }
 0x123   : > { %v1802_v25 = vadd.f32 %v1789_v12, %v1774_v18  ;;  %v5195_v18 = vld [vmem:[%s7254_s24] ss:$0 sm:$0xff]  ;;  %s7288_s24 = sld [smem:[#allocation46_spill]] }
 0x125   : > { %v1809_v29 = vpack.c.bf16 %v1802_v25, %v1801_v24 }
 0x126   : > { %v1794_v16 = vpop.permute.xlu1 %1793 }
 0x12a   : > { %v1799_v28 = vpop.permute.xlu1 %1798 }
 0x12b   : > { %v1804_v31 = vadd.f32 %v1799_v28, %v1776_v23  ;;  %v6562_v28 = vld [vmem:[%s7255_s14] ss:$0 sm:$0xff]  ;;  %s7281_s14 = sld [smem:[#allocation43_spill]] }
 0x12c   : > { %v2036_v48 = vpop.xlane.xlu0 %2035 }
 0x12d   : > { %v2041_v49 = vmul.f32 0.03125, %v2036_v48  ;;  %v6534_v48 = vld [vmem:[%s7252_s13] ss:$0 sm:$0xff]  ;;  %s7280_s13 = sld [smem:[#allocation42_spill]] }
 0x12f   : > { %v6477_v51 = vsub.f32 %v6440_v3, %v2041_v49 }
 0x130   : > { %v2040_v52 = vpop.xlane.xlu0 %2039 }
 0x131   : > { %v2042_v53 = vmul.f32 0.03125, %v2040_v52  ;;  %v2045_v54 = vmul.f32 %v6477_v51, %v6477_v51 }
 0x133   : > { %v6482_v56 = vsub.f32 %v6445_v6, %v2042_v53  ;;  %v2047_v57 = vsel %vm1846_vm0, %v2045_v54, 0.0  ;;  %v6539_v54 = vld [vmem:[%s7253_s17] ss:$0 sm:$0xff]  ;;  %s7284_s17 = sld [smem:[#allocation25_spill]] }
 0x134   : > { %2048 = vadd.xlane.f32.xlu1 %v2047_v57 }
 0x135   : > { %v2046_v58 = vmul.f32 %v6482_v56, %v6482_v56 }
 0x137   : > { %v2050_v60 = vsel %vm2037_vm1, %v2046_v58, 0.0 }
 0x138   : > { %2051 = vadd.xlane.f32.xlu0 %v2050_v60  ;;  %v1766_v22 = vpop.permute.xlu0 %1765 }
 0x139   : > { %v1775_v26 = vmul.f32 %v1766_v22, %v6510_v20 }
 0x13b   : > { %v1803_v30 = vadd.f32 %v1794_v16, %v1775_v26  ;;  %v5777_v16 = vld [vmem:[%s6162_s30 + $0x8] sm:$0xff]  }
 0x13d   : > { %v1810_v33 = vpack.c.bf16 %v1804_v31, %v1803_v30 }
 0x14e   : > { %1897 = vperm.xlu0 %5771, %v1891_v8  }
 0x152   : > { %1902 = vperm.xlu0 %5771, %v1892_v10  }
 0x156   : > { %1907 = vperm.xlu0 %5771, %v1893_v15   ;;  %v5776_v15 = vld [vmem:[%s6162_s30] sm:$0xff]  }
 0x157   : > { %5423 = vmatpush3.bf16.msra.mxu1 %v5776_v15 }
 0x158   : > { %5424 = vmatprep.subr.bf16.mxu1 %v6088_v7 }
 0x15a   : > { %1912 = vperm.xlu0 %5771, %v1894_v21  }
 0x15b   : > { %5425 = vmatpush3.bf16.msra.mxu1 %v5777_v16 }
 0x15c   : > { %5438 = vmatprep.subr.bf16.mxu1 %v6088_v7 }
 0x15e   : > { %1930 = vperm.xlu0 %5771, %v1920_v27  }
 0x161   : > { %1818 = vxpose.xlu1.c.b16.start [1/2] (short) (narrow) %v1809_v29, 16 }
 0x162   : > { %1940 = vperm.xlu0 %5771, %v1922_v32  }
 0x165   : > { %1819 = vxpose.xlu1.c.b16.end [2/2] (short) (narrow) %v1810_v33, 16 }
 0x169   : > { %1925 = vperm.xlu1 %5770, %v1919_v34  }
 0x16d   : > { %1935 = vperm.xlu1 %5770, %v1921_v35  }
 0x1c1   : > { %v2049_v36 = vpop.xlane.xlu1 %2048 }
 0x1c2   : > { %v2053_v37 = vmul.f32 0.03125, %v2049_v36 }
 0x1c4   : > { %v2055_v38 = vadd.f32 1e-05, %v2053_v37  ;;  %v5199_v37 = vld [vmem:[%s7256_s6] ss:$0 sm:$0xff]  ;;  %s7260_s6 = sld [smem:[#allocation49_spill]] }
 0x1c5   : > { %v2052_v39 = vpop.xlane.xlu0 %2051 }
 0x1c6   : > { %5813 = vrsqrt.f32 %v2055_v38  ;;  %v2054_v41 = vmul.f32 0.03125, %v2052_v39 }
 0x1c7   : > { %v1826_v42 = vpop.trf.xlu1 }
 0x1c8   : > { %v2056_v43 = vadd.f32 1e-05, %v2054_v41  ;;  %5419 = vmatmul.mubr.msk.bf16.vlgmr.msra.gmra.mrb[0].mxu0 %vm1846_vm0, %v1826_v42 }
 0x1c9   : > { %5431 = vmatpush3.bf16.msra.mxu0 %v6520_v40  ;;  %5434 = vmatprep.mubr.msk.bf16.mxu0 %vm6089_vm3, %v6088_v7 }
 0x1ca   : > { %5815 = vrsqrt.f32 %v2056_v43  ;;  %5432 = vmatprep.subr.bf16.mxu0 %v6088_v7 }
 0x1cd   : > { %v1898_v45 = vpop.permute.xlu0 %1897  ;;  %5433 = vmatpush3.bf16.msra.mxu0 %v6525_v44 }
 0x1ce   : > { %5444 = vmatprep.subr.bf16.mxu0 %v6088_v7 }
 0x1d0   : > { %v5814_v46 = vpop.eup %5813 }
 0x1d1   : > { %v2059_v47 = vmul.f32 %v5814_v46, %v6477_v51  ;;  %v1903_v49 = vpop.permute.xlu0 %1902 }
 0x1d2   : > { %v1916_v62 = vmul.f32 %v1903_v49, %v6502_v14 }
 0x1d3   : > { %v2067_v52 = vmul.f32 %v6534_v48, %v2059_v47 }
 0x1d4   : > { %v5816_v50 = vpop.eup %5815 }
 0x1d5   : > { %v2060_v53 = vmul.f32 %v5816_v50, %v6482_v56  ;;  %v1908_v57 = vpop.permute.xlu0 %1907  ;;  %v2075_v58 = vadd.f32 %v6539_v54, %v2067_v52  ;;  %v1915_v56 = vmul.f32 %v1898_v45, %v6500_v13 }
 0x1d6   : > { %v1917_v4 = vmul.f32 %v1908_v57, %v6510_v20 }
 0x1d7   : > { %v2068_v55 = vmul.f32 %v6534_v48, %v2060_v53 }
 0x1d9   : > { %v2076_v59 = vadd.f32 %v6539_v54, %v2068_v55  ;;  %v1913_v51 = vpop.permute.xlu0 %1912 }
 0x1da   : > { %v1918_v5 = vmul.f32 %v1913_v51, %v6507_v19 }
 0x1db   : > { %v2081_v60 = vpack.c.bf16 %v2076_v59, %v2075_v58 }
 0x1dd   : > { %5435 = vmatmul.mubr.msk.bf16.vlgmr.msra.gmra.mrb[4].mxu0 %vm1846_vm0, %v2081_v60  ;;  %v1931_v61 = vpop.permute.xlu0 %1930 }
 0x1de   : > { %5446 = vmatprep.mubr.msk.bf16.mxu0 %vm6089_vm3, %v6088_v7  ;;  %v1944_v0 = vadd.f32 %v1931_v61, %v1916_v62 }
 0x1e1   : > { %v1941_v2 = vpop.permute.xlu0 %1940 }
 0x1e2   : > { %v1946_v10 = vadd.f32 %v1941_v2, %v1918_v5 }
 0x1e8   : > { %v1926_v63 = vpop.permute.xlu1 %1925 }
 0x1e9   : > { %v1943_v1 = vadd.f32 %v1926_v63, %v1915_v56 }
 0x1eb   : > { %v1951_v8 = vpack.c.bf16 %v1944_v0, %v1943_v1 }
 0x1ec   : > { %v1936_v9 = vpop.permute.xlu1 %1935 }
 0x1ed   : > { %v1945_v11 = vadd.f32 %v1936_v9, %v1917_v4  ;;  %1960 = vxpose.xlu1.c.b16.start [1/2] (short) (narrow) %v1951_v8, 16 }
 0x1ef   : > { %v1952_v12 = vpack.c.bf16 %v1946_v10, %v1945_v11 }
 0x1f1   : > { %1961 = vxpose.xlu1.c.b16.end [2/2] (short) (narrow) %v1952_v12, 16 }
 0x253   : > { %v1968_v17 = vpop.trf.xlu1 }
 0x254   : > { %5427 = vmatmul.mubr.msk.bf16.vlgmr.msra.gmra.mrb[0].mxu1 %vm1846_vm0, %v1968_v17 }
 0x255   : > { %5440 = vmatprep.mubr.msk.bf16.mxu1 %vm6089_vm3, %v6088_v7 }
 0x29b   : > { %v1884_v21 = vpop.f32.mrb[0].mxu0 }
 0x29c   : > { %v1885_v22 = vadd.f32 %v5195_v18, %v1884_v21  ;;  %v5420_v23 = vpop.f32.mrb[1].mxu0 }
 0x29d   : > { %v1887_v24 = vpop.f32.mrb[2].mxu0 }
 0x29e   : > { %v1888_v25 = vadd.f32 %v5195_v18, %v1887_v24  ;;  %v5421_v26 = vpop.f32.mrb[3].mxu0  ;;  %v6589_v18 = vld [vmem:[%s7257_s16] sm:$0xff]  }
 0x2a0   : > { %v6559_v27 = vpack.c.bf16 %v1888_v25, %v1885_v22 }
 0x2b0   : > { %v2138_v29 = vpop.f32.mrb[4].mxu0 }
 0x2b1   : > { %v5436_v30 = vpop.f32.mrb[5].mxu0  ;;  %v2139_v32 = vadd.f32 %v6562_v28, %v2138_v29 }
 0x2b2   : > { %v2141_v31 = vpop.f32.mrb[6].mxu0 }
 0x2b3   : > { %v2142_v33 = vadd.f32 %v6562_v28, %v2141_v31  ;;  %v5437_v34 = vpop.f32.mrb[7].mxu0 }
 0x2b5   : > { %v2146_v35 = vpack.c.bf16 %v2142_v33, %v2139_v32  ;;  %v6597_v32 = vld [vmem:[%s7257_s16 + $0x8] sm:$0xff]   ;;  %s7282_s16 = sld [smem:[#allocation31_spill]] }
 0x2b7   : > { %v2151_v36 = vsel %vm1846_vm0, %v2146_v35, 0 }
 0x2b8   : > { %5439 = vmatpush3.bf16.xpose.msra.mxu1 %v2151_v36 }
 0x2b9   : > { %5450 = vmatprep.subr.bf16.mxu1 %v6088_v7 }
 0x2bf   : > { %5441 = vmatmul.mubr.msk.bf16.vlgmr.msra.gmra.mrb[4].mxu1 %vm1846_vm0, %v6559_v27 }
 0x2c0   : > { %5454 = vmatprep.mubr.msk.bf16.mxu1 %vm6089_vm3, %v6088_v7  ;;  %5451 = vmatpush3.bf16.msra.mxu1 %v6589_v18 }
 0x2c1   : > { %5452 = vmatprep.subr.bf16.mxu1 %v6088_v7 }
 0x2c4   : > { %5453 = vmatpush3.bf16.msra.mxu1 %v6597_v32 }
 0x327   : > { %v2025_v38 = vpop.f32.mrb[0].mxu1 }
 0x328   : > { %v2026_v39 = vadd.f32 %v5199_v37, %v2025_v38  ;;  %v5428_v41 = vpop.f32.mrb[1].mxu1 }
 0x329   : > { %v2028_v42 = vpop.f32.mrb[2].mxu1 }
 0x32a   : > { %v2029_v43 = vadd.f32 %v5199_v37, %v2028_v42  ;;  %v5429_v45 = vpop.f32.mrb[3].mxu1 }
 0x32c   : > { %v6573_v46 = vpack.c.bf16 %v2029_v43, %v2026_v39 }
 0x32e   : > { %5445 = vmatpush3.bf16.msra.mxu0 %v6573_v46 }
 0x32f   : > { %5470 = vmatprep.subr.bf16.mxu0 %v6088_v7 }
 0x392   : > { %v2187_v47 = vpop.f32.mrb[4].mxu1 }
 0x393   : > { %v2194_v49 = vmax.f32 %v2187_v47, 0.0  ;;  %v5442_v50 = vpop.f32.mrb[5].mxu1 }
 0x394   : > { %v2190_v52 = vpop.f32.mrb[6].mxu1 }
 0x395   : > { %v2196_v53 = vmul.f32 0.17677669, %v2194_v49  ;;  %v2195_v55 = vmax.f32 %v2190_v52, 0.0  ;;  %v5443_v57 = vpop.f32.mrb[7].mxu1 }
 0x397   : > { %v2197_v58 = vmul.f32 0.17677669, %v2195_v55  ;;  %v2199_v59 = vsel %vm2198_vm4, %v2196_v53, -inf  ;;  %v6090_v55 = vmov 0.0|0.0  }
 0x398   : > { %5656 = vmatprep.subr.bf16.mxu1 %v6090_v55 }
 0x399   : > { %v2200_v60 = vsel %vm2198_vm4, %v2197_v58, -inf }
 0x39a   : > { %v2201_v51 = vmax.f32 %v2199_v59, %v2200_v60 }
 0x39c   : > { %v2202_v61 = vrot.slane %v2201_v51, 4 }
 0x39e   : > { %v2203_v56 = vmax.f32 %v2201_v51, %v2202_v61  ;;  %v6626_v51 = vld [vmem:[%s7259_s5] sm:$0x3]  ;;  %s7265_s5 = sld [smem:[#allocation37_spill]] }
 0x39f   : > { %v6631_v61 = vld [vmem:[%s7260_s6] sm:$0xff] }
 0x3a0   : > { %v2204_v62 = vrot.slane %v2203_v56, 2 }
 0x3a2   : > { %v2205_v63 = vmax.f32 %v2203_v56, %v2204_v62 }
 0x3a4   : > { %v2206_v0 = vrot.slane %v2205_v63, 1 }
 0x3a6   : > { %v2207_v1 = vmax.f32 %v2205_v63, %v2206_v0 }
 0x3a8   : > { %v2208_v2 = vsub.f32 %v2196_v53, %v2207_v1  ;;  %v2209_v4 = vsub.f32 %v2197_v58, %v2207_v1  ;;  %3342 = vst.msk [vmem:[%s7168_s3] sm:$0x1] %vm3341_vm5, %v2207_v1  ;;  %s7258_s3 = sld [smem:[#allocation20_spill]] }
 0x3aa   : > { %v2210_v5 = vmul.f32 1.442695, %v2208_v2  ;;  %v2212_v8 = vmul.f32 1.442695, %v2209_v4 }
 0x3ac   : > { %5817 = vpow2.f32 %v2210_v5 }
 0x3ad   : > { %5819 = vpow2.f32 %v2212_v8 }
 0x3ae   : > { %v6604_v38 = vld [vmem:[%s7258_s3] ss:$0 sm:$0xff]  ;;  %s7261_s3 = sld [smem:[#allocation48_spill]] }
 0x3b4   : > { %v6636_v56 = vld [vmem:[%s7261_s3] sm:$0x3]  ;;  %s7266_s3 = sld [smem:[#allocation35_spill]] }
 0x3b6   : > { %v5818_v9 = vpop.eup %5817 }
 0x3b7   : > { %v5820_v10 = vpop.eup %5819  ;;  %v2214_v11 = vsel %vm2198_vm4, %v5818_v9, 0.0 }
 0x3b8   : > { %v2215_v12 = vsel %vm2198_vm4, %v5820_v10, 0.0 }
 0x3b9   : > { %v2216_v15 = vadd.f32 %v2215_v12, %v2214_v11  ;;  %v6653_v11 = vld [vmem:[%s7264_s8] sm:$0xff] }
 0x3bb   : > { %v2217_v16 = vrot.slane %v2216_v15, 4 }
 0x3bd   : > { %v2218_v17 = vadd.f32 %v2217_v16, %v2216_v15 }
 0x3bf   : > { %v2219_v21 = vrot.slane %v2218_v17, 2 }
 0x3c1   : > { %v2220_v22 = vadd.f32 %v2219_v21, %v2218_v17 }
 0x3c3   : > { %v2221_v23 = vrot.slane %v2220_v22, 1 }
 0x3c5   : > { %v2222_v24 = vadd.f32 %v2221_v23, %v2220_v22 }
 0x3c7   : > { %5821 = vrcp.f32 %v2222_v24 }
 0x3d1   : > { %v5822_v25 = vpop.eup %5821 }
 0x3d2   : > { %v2224_v26 = vmul.f32 %v5822_v25, %v5818_v9  ;;  %v2225_v29 = vmul.f32 %v5822_v25, %v5820_v10  ;;  %v6640_v9 = vld [vmem:[%s7260_s6 + $0x8] sm:$0xf]  ;;  %s7267_s6 = sld [smem:[#allocation36_spill]] }
 0x3d3   : > { %v6650_v10 = vld [vmem:[%s7264_s8 + $0x8] sm:$0xf]  ;;  %s7268_s8 = sld [smem:[#allocation39_spill]] }
 0x3d4   : > { %v2226_v30 = vpack.c.bf16 %v2225_v29, %v2224_v26 }
 0x3d6   : > { %2228 = vxpose.xlu0.c.b16.start.end [1/1] (short) (narrow) %v2226_v30, 16 }
 0x43c   : > { %v2236_v31 = vpop.trf.xlu0 }
 0x43d   : > { %5447 = vmatmul.mubr.msk.bf16.vlgmr.msra.gmra.mrb[8].mxu0 %vm1705_vm2, %v2236_v31 }
 0x43e   : > { %5474 = vmatprep.mubr.msk.bf16.mxu0 %vm6089_vm3, %v6088_v7 }
 0x510   : > { %v2281_v33 = vpop.f32.mrb[8].mxu0 }
 0x511   : > { %v5448_v34 = vpop.f32.mrb[9].mxu0 }
 0x512   : > { %v2284_v35 = vpop.f32.mrb[10].mxu0 }
 0x513   : > { %v2292_v36 = vpack.c.bf16 %v2284_v35, %v2281_v33  ;;  %v5449_v37 = vpop.f32.mrb[11].mxu0 }
 0x515   : > { %5455 = vmatmul.mubr.msk.bf16.vlgmr.msra.gmra.mrb[8].mxu1 %vm1846_vm0, %v2292_v36 }
 0x516   : > { %5462 = vmatprep.mubr.msk.f32.mxu1 %vm6089_vm3, %v6088_v7 }
 0x5e8   : > { %v2349_v39 = vpop.f32.mrb[8].mxu1 }
 0x5e9   : > { %v2350_v41 = vadd.f32 %v6604_v38, %v2349_v39  ;;  %v5456_v42 = vpop.f32.mrb[9].mxu1 }
 0x5ea   : > { %v2352_v43 = vpop.f32.mrb[10].mxu1 }
 0x5eb   : > { %v6608_v45 = vadd.f32 %v2350_v41, %v6440_v3  ;;  %v2353_v47 = vadd.f32 %v6604_v38, %v2352_v43  ;;  %v5457_v49 = vpop.f32.mrb[11].mxu1 }
 0x5ed   : > { %v6612_v50 = vadd.f32 %v2353_v47, %v6445_v6  ;;  %v2358_v52 = vsel %vm1846_vm0, %v6608_v45, -inf }
 0x5ee   : > { %2359 = vmax.xlane.f32.xlu0 %v2358_v52 }
 0x5ef   : > { %v2361_v53 = vsel %vm2037_vm1, %v6612_v50, -inf }
 0x5f0   : > { %2362 = vmax.xlane.f32.xlu1 %v2361_v53 }
 0x67b   : > { %v2360_v57 = vpop.xlane.xlu0 %2359 }
 0x67d   : > { %v2363_v58 = vpop.xlane.xlu1 %2362 }
 0x67e   : > { %v5657_v60 = vpack.c.bf16 %v2363_v58, %v2360_v57 }
 0x680   : > { %5659 = vmatpush3.bf16.msk.msra.mxu1 %vm6619_vm8, %v5657_v60 }
 0x683   : > { %5463 = vmatmul.mubr.msk.f32.vlgmr.msra.gmra.mrb[12].mxu1 %vm2198_vm4, %v6626_v51 }
 0x684   : > { %5467 = vmatprep.mubr.msk.f32.mxu1 %vm2452_vm9, %v6631_v61 }
 0x756   : > { %v2439_v62 = vpop.f32.mrb[12].mxu1 }
 0x757   : > { %v2440_v63 = vadd.f32 %v2439_v62, %v6636_v56  ;;  %v5464_v0 = vpop.f32.mrb[13].mxu1 }
 0x758   : > { %v6679_v0 = vld [vmem:[%s7265_s5 + $0x8] sm:$0xff]  }
 0x759   : > { %v2444_v1 = vmul.f32 0.70710677, %v2440_v63  ;;  %v2443_v4 = vmul.f32 0.5, %v2440_v63  ;;  %v6674_v63 = vld [vmem:[%s7265_s5] sm:$0xff]   ;;  %s7269_s5 = sld [smem:[#allocation38_spill]] }
 0x75a   : > { %5471 = vmatpush3.bf16.msra.mxu0 %v6674_v63 }
 0x75b   : > { %5823 = verf.f32 %v2444_v1  ;;  %5472 = vmatprep.subr.bf16.mxu0 %v6088_v7 }
 0x75e   : > { %5473 = vmatpush3.bf16.msra.mxu0 %v6679_v0 }
 0x75f   : > { %5486 = vmatprep.subr.bf16.mxu0 %v6088_v7 }
 0x765   : > { %v5824_v2 = vpop.eup %5823 }
 0x766   : > { %v2446_v5 = vadd.f32 1.0, %v5824_v2 }
 0x768   : > { %v2447_v8 = vmul.f32 %v2446_v5, %v2443_v4 }
 0x76a   : > { %5465 = vmatprep.subr.msk.mxu1 %vm2459_vm10, %v2447_v8 }
 0x76b   : > { %5466 = vmatpush3.msk.msra.mxu1 %vm2459_vm10, %v2447_v8 }
 0x76c   : > { %5468 = vmatmul.mubr.msk.f32.vlgmr.msra.gmra.mrb[14].mxu1 %vm2452_vm9, %v6640_v9  ;;  %5478 = vmatprep.subr.bf16.mxu1 %v6088_v7 }
 0x76d   : > { %5482 = vmatprep.mubr.msk.bf16.mxu1 %vm6089_vm3, %v6088_v7 }
 0x83f   : > { %v5469_v12 = vpop.f32.mrb[14].mxu1 }
 0x840   : > { %v2535_v15 = vadd.f32 %v5469_v12, %v6650_v10  ;;  %v2529_v16 = vpop.f32.mrb[15].mxu1 }
 0x841   : > { %v2530_v17 = vadd.f32 %v2529_v16, %v6653_v11 }
 0x842   : > { %v5221_v21 = vmul.f32 -1.442695, %v2535_v15 }
 0x843   : > { %v5220_v22 = vmul.f32 -1.442695, %v2530_v17  ;;  %v6684_v17 = vld [vmem:[%s7266_s3] ss:$0 sm:$0xff]  ;;  %s7271_s3 = sld [smem:[#allocation21_spill]] }
 0x844   : > { %5825 = vpow2.f32 %v5221_v21 }
 0x845   : > { %5827 = vpow2.f32 %v5220_v22 }
 0x84e   : > { %v5826_v23 = vpop.eup %5825 }
 0x84f   : > { %v5828_v24 = vpop.eup %5827  ;;  %v2545_v25 = vadd.f32 1.0, %v5826_v23 }
 0x850   : > { %v2544_v26 = vadd.f32 1.0, %v5828_v24  ;;  %v6688_v24 = vld [vmem:[%s7267_s6] ss:$0 sm:$0xff]  ;;  %s7270_s6 = sld [smem:[#allocation40_spill]] }
 0x851   : > { %5829 = vrcp.f32 %v2545_v25 }
 0x852   : > { %5831 = vrcp.f32 %v2544_v26 }
 0x85b   : > { %v5830_v29 = vpop.eup %5829 }
 0x85c   : > { %v5832_v30 = vpop.eup %5831  ;;  %2557 = vperm.xlu1 %5770, %v5830_v29  }
 0x85d   : > { %2552 = vperm.xlu0 %5771, %v5832_v30  }
 0x8db   : > { %v2558_v31 = vpop.permute.xlu1 %2557 }
 0x8dc   : > { %v2561_v33 = vmul.f32 %v2558_v31, %v6612_v50  ;;  %v2553_v34 = vpop.permute.xlu0 %2552  ;;  %v6701_v31 = vld [vmem:[%s7268_s8] sm:$0xff]  }
 0x8dd   : > { %v2560_v35 = vmul.f32 %v2553_v34, %v6608_v45  ;;  %5479 = vmatpush3.bf16.msra.mxu1 %v6701_v31 }
 0x8de   : > { %v6660_v36 = vadd.f32 %v2561_v33, %v6612_v50  ;;  %5480 = vmatprep.subr.bf16.mxu1 %v6088_v7  ;;  %v6706_v33 = vld [vmem:[%s7268_s8 + $0x8] sm:$0xff]   ;;  %s7277_s8 = sld [smem:[#allocation51_spill]] }
 0x8df   : > { %v6663_v37 = vadd.f32 %v2560_v35, %v6608_v45 }
 0x8e0   : > { %v2569_v39 = vsel %vm2037_vm1, %v6660_v36, 0.0 }
 0x8e1   : > { %2570 = vadd.xlane.f32.xlu1 %v2569_v39  ;;  %v2566_v41 = vsel %vm1846_vm0, %v6663_v37, 0.0  ;;  %5481 = vmatpush3.bf16.msra.mxu1 %v6706_v33 }
 0x8e2   : > { %2567 = vadd.xlane.f32.xlu0 %v2566_v41  ;;  %5494 = vmatprep.subr.bf16.mxu1 %v6088_v7 }
 0x96e   : > { %v2571_v42 = vpop.xlane.xlu1 %2570 }
 0x96f   : > { %v2573_v43 = vmul.f32 0.03125, %v2571_v42  ;;  %v2568_v47 = vpop.xlane.xlu0 %2567 }
 0x970   : > { %v2572_v49 = vmul.f32 0.03125, %v2568_v47 }
 0x971   : > { %v2575_v52 = vsub.f32 %v6660_v36, %v2573_v43 }
 0x972   : > { %v2574_v53 = vsub.f32 %v6663_v37, %v2572_v49 }
 0x973   : > { %v2577_v60 = vmul.f32 %v2575_v52, %v2575_v52 }
 0x974   : > { %v2576_v57 = vmul.f32 %v2574_v53, %v2574_v53 }
 0x975   : > { %v2581_v62 = vsel %vm2037_vm1, %v2577_v60, 0.0 }
 0x976   : > { %v2578_v58 = vsel %vm1846_vm0, %v2576_v57, 0.0 }
 0x977   : > { %2579 = vadd.xlane.f32.xlu0 %v2578_v58 }
 0x97b   : > { %2582 = vadd.xlane.f32.xlu0 %v2581_v62 }
 0xa04   : > { %v2580_v1 = vpop.xlane.xlu0 %2579 }
 0xa05   : > { %v2584_v2 = vmul.f32 0.03125, %v2580_v1 }
 0xa07   : > { %v2586_v4 = vadd.f32 1e-05, %v2584_v2 }
 0xa08   : > { %v2583_v5 = vpop.xlane.xlu0 %2582 }
 0xa09   : > { %5833 = vrsqrt.f32 %v2586_v4  ;;  %v2585_v8 = vmul.f32 0.03125, %v2583_v5  ;;  %v6719_v4 = vld [vmem:[%s7270_s6] ss:$0 sm:$0xff]  ;;  %s7272_s6 = sld [smem:[#allocation22_spill]] }
 0xa0b   : > { %v2587_v12 = vadd.f32 1e-05, %v2585_v8 }
 0xa0d   : > { %5835 = vrsqrt.f32 %v2587_v12 }
 0xa13   : > { %v5834_v15 = vpop.eup %5833 }
 0xa14   : > { %v2590_v16 = vmul.f32 %v5834_v15, %v2574_v53 }
 0xa16   : > { %v2598_v22 = vmul.f32 %v6684_v17, %v2590_v16 }
 0xa17   : > { %v5836_v21 = vpop.eup %5835 }
 0xa18   : > { %v2591_v23 = vmul.f32 %v5836_v21, %v2575_v52  ;;  %v2606_v26 = vadd.f32 %v6688_v24, %v2598_v22 }
 0xa1a   : > { %v2599_v25 = vmul.f32 %v6684_v17, %v2591_v23 }
 0xa1c   : > { %v2607_v29 = vadd.f32 %v6688_v24, %v2599_v25 }
 0xa1e   : > { %v2612_v30 = vpack.c.bf16 %v2607_v29, %v2606_v26 }
 0xa20   : > { %5475 = vmatmul.mubr.msk.bf16.vlgmr.msra.gmra.mrb[12].mxu0 %vm1846_vm0, %v2612_v30 }
 0xa21   : > { %5487 = vmatpush3.bf16.msra.mxu0 %v6520_v40  ;;  %5490 = vmatprep.mubr.msk.bf16.mxu0 %vm6089_vm3, %v6088_v7  ;;  %v6711_v40 = vld [vmem:[%s7269_s5] ss:$0 sm:$0xff]  ;;  %s7173_s5 = scalar_lea.vmem [#allocation4], %s6580_s15 }
 0xa22   : > { %5488 = vmatprep.subr.bf16.mxu0 %v6088_v7 }
 0xa25   : > { %5489 = vmatpush3.bf16.msra.mxu0 %v6525_v44 }
 0xa26   : > { %5500 = vmatprep.subr.bf16.mxu0 %v6088_v7 }
 0xaf3   : > { %v2669_v34 = vpop.f32.mrb[12].mxu0 }
 0xaf4   : > { %v2670_v35 = vadd.f32 %v6711_v40, %v2669_v34  ;;  %v5476_v44 = vpop.f32.mrb[13].mxu0 }
 0xaf5   : > { %v2672_v39 = vpop.f32.mrb[14].mxu0 }
 0xaf6   : > { %v2678_v41 = vmul.f32 0.70710677, %v2670_v35  ;;  %v2673_v42 = vadd.f32 %v6711_v40, %v2672_v39  ;;  %v5477_v43 = vpop.f32.mrb[15].mxu0  ;;  %v2676_v57 = vmul.f32 0.5, %v2670_v35 }
 0xaf8   : > { %5837 = verf.f32 %v2678_v41  ;;  %v2679_v47 = vmul.f32 0.70710677, %v2673_v42  ;;  %v2677_v58 = vmul.f32 0.5, %v2673_v42 }
 0xafa   : > { %5839 = verf.f32 %v2679_v47 }
 0xb02   : > { %v5838_v49 = vpop.eup %5837 }
 0xb03   : > { %v2682_v52 = vadd.f32 1.0, %v5838_v49 }
 0xb04   : > { %v5840_v53 = vpop.eup %5839 }
 0xb05   : > { %v2683_v60 = vadd.f32 1.0, %v5840_v53  ;;  %v2684_v62 = vmul.f32 %v2682_v52, %v2676_v57 }
 0xb07   : > { %v2685_v1 = vmul.f32 %v2683_v60, %v2677_v58 }
 0xb09   : > { %v2690_v2 = vpack.c.bf16 %v2685_v1, %v2684_v62 }
 0xb0b   : > { %5483 = vmatmul.mubr.msk.bf16.vlgmr.msra.gmra.mrb[16].mxu1 %vm1846_vm0, %v2690_v2 }
 0xb0c   : > { %5496 = vmatprep.mubr.msk.bf16.mxu1 %vm6089_vm3, %v6088_v7 }
 0xbde   : > { %v2747_v5 = vpop.f32.mrb[16].mxu1 }
 0xbdf   : > { %v2748_v8 = vadd.f32 %v6719_v4, %v2747_v5  ;;  %v5484_v12 = vpop.f32.mrb[17].mxu1 }
 0xbe0   : > { %v2750_v15 = vpop.f32.mrb[18].mxu1 }
 0xbe1   : > { %v2754_v16 = vadd.f32 %v2748_v8, %v6663_v37  ;;  %v2751_v21 = vadd.f32 %v6719_v4, %v2750_v15  ;;  %v5485_v22 = vpop.f32.mrb[19].mxu1 }
 0xbe3   : > { %v2756_v23 = vadd.f32 %v2754_v16, %v6608_v45  ;;  %v2755_v25 = vadd.f32 %v2751_v21, %v6660_v36 }
 0xbe5   : > { %v2757_v26 = vadd.f32 %v2755_v25, %v6612_v50  ;;  %v6728_v29 = vadd.f32 %v2756_v23, %v6440_v3 }
 0xbe7   : > { %v2760_v30 = vsel %vm1846_vm0, %v6728_v29, 0.0  ;;  %v6733_v34 = vadd.f32 %v2757_v26, %v6445_v6 }
 0xbe8   : > { %2761 = vadd.xlane.f32.xlu1 %v2760_v30 }
 0xbe9   : > { %v2763_v37 = vsel %vm2037_vm1, %v6733_v34, 0.0 }
 0xbea   : > { %2764 = vadd.xlane.f32.xlu0 %v2763_v37 }
 0xc75   : > { %v2762_v35 = vpop.xlane.xlu1 %2761 }
 0xc76   : > { %v2766_v45 = vmul.f32 0.03125, %v2762_v35 }
 0xc77   : > { %v2765_v44 = vpop.xlane.xlu0 %2764 }
 0xc78   : > { %v2768_v36 = vsub.f32 %v6728_v29, %v2766_v45  ;;  %v2767_v50 = vmul.f32 0.03125, %v2765_v44 }
 0xc7a   : > { %v2769_v3 = vsub.f32 %v6733_v34, %v2767_v50  ;;  %v2770_v39 = vmul.f32 %v2768_v36, %v2768_v36 }
 0xc7c   : > { %v2772_v41 = vsel %vm1846_vm0, %v2770_v39, 0.0  ;;  %v2771_v42 = vmul.f32 %v2769_v3, %v2769_v3 }
 0xc7d   : > { %2773 = vadd.xlane.f32.xlu1 %v2772_v41 }
 0xc7e   : > { %v2775_v6 = vsel %vm2037_vm1, %v2771_v42, 0.0 }
 0xc7f   : > { %2776 = vadd.xlane.f32.xlu0 %v2775_v6 }
 0xd0a   : > { %v2774_v43 = vpop.xlane.xlu1 %2773 }
 0xd0b   : > { %v2778_v47 = vmul.f32 0.03125, %v2774_v43 }
 0xd0c   : > { %v2777_v49 = vpop.xlane.xlu0 %2776 }
 0xd0d   : > { %v2780_v52 = vadd.f32 1e-05, %v2778_v47  ;;  %v2779_v53 = vmul.f32 0.03125, %v2777_v49 }
 0xd0f   : > { %5841 = vrsqrt.f32 %v2780_v52  ;;  %v2781_v57 = vadd.f32 1e-05, %v2779_v53 }
 0xd11   : > { %5843 = vrsqrt.f32 %v2781_v57 }
 0xd19   : > { %v5842_v58 = vpop.eup %5841 }
 0xd1a   : > { %v2784_v60 = vmul.f32 %v5842_v58, %v2768_v36 }
 0xd1b   : > { %v5844_v62 = vpop.eup %5843 }
 0xd1c   : > { %v2786_v1 = vmul.f32 %v6534_v48, %v2784_v60  ;;  %v2785_v2 = vmul.f32 %v5844_v62, %v2769_v3 }
 0xd1e   : > { %v2787_v5 = vmul.f32 %v6534_v48, %v2785_v2  ;;  %v2788_v8 = vadd.f32 %v6539_v54, %v2786_v1 }
 0xd20   : > { %v2789_v12 = vadd.f32 %v6539_v54, %v2787_v5 }
 0xd22   : > { %v2790_v15 = vpack.c.bf16 %v2789_v12, %v2788_v8 }
 0xd24   : > { %5491 = vmatmul.mubr.msk.bf16.vlgmr.msra.gmra.mrb[16].mxu0 %vm1846_vm0, %v2790_v15 }
 0xd25   : > { %5501 = vmatpush3.bf16.msra.mxu0 %v6573_v46  ;;  %5502 = vmatprep.mubr.msk.bf16.mxu0 %vm6089_vm3, %v6088_v7 }
 0xd26   : > { %5660 = vmatprep.subr.bf16.mxu0 %v6090_v55 }
 0xdf7   : > { %v2828_v16 = vpop.f32.mrb[16].mxu0 }
 0xdf8   : > { %v5492_v21 = vpop.f32.mrb[17].mxu0  ;;  %v2829_v23 = vadd.f32 %v6562_v28, %v2828_v16 }
 0xdf9   : > { %v2831_v22 = vpop.f32.mrb[18].mxu0 }
 0xdfa   : > { %v2832_v48 = vadd.f32 %v6562_v28, %v2831_v22  ;;  %v5493_v25 = vpop.f32.mrb[19].mxu0 }
 0xdfc   : > { %v2835_v26 = vpack.c.bf16 %v2832_v48, %v2829_v23 }
 0xdfe   : > { %v2837_v54 = vsel %vm1846_vm0, %v2835_v26, 0 }
 0xdff   : > { %5495 = vmatpush3.bf16.xpose.msra.mxu1 %v2837_v54 }
 0xe00   : > { %5506 = vmatprep.subr.bf16.mxu1 %v6088_v7 }
 0xe06   : > { %5497 = vmatmul.mubr.msk.bf16.vlgmr.msra.gmra.mrb[20].mxu1 %vm1846_vm0, %v6559_v27 }
 0xe07   : > { %5507 = vmatpush3.bf16.msra.mxu1 %v6589_v18  ;;  %5510 = vmatprep.mubr.msk.bf16.mxu1 %vm6089_vm3, %v6088_v7 }
 0xe08   : > { %5508 = vmatprep.subr.bf16.mxu1 %v6088_v7 }
 0xe0b   : > { %5509 = vmatpush3.bf16.msra.mxu1 %v6597_v32 }
 0xed9   : > { %v2873_v28 = vpop.f32.mrb[20].mxu1 }
 0xeda   : > { %v2880_v46 = vmax.f32 %v2873_v28, 0.0  ;;  %v5498_v55 = vpop.f32.mrb[21].mxu1 }
 0xedb   : > { %v2876_v30 = vpop.f32.mrb[22].mxu1 }
 0xedc   : > { %v2882_v37 = vmul.f32 0.17677669, %v2880_v46  ;;  %v2881_v35 = vmax.f32 %v2876_v30, 0.0  ;;  %v5499_v45 = vpop.f32.mrb[23].mxu1 }
 0xede   : > { %v2883_v44 = vmul.f32 0.17677669, %v2881_v35  ;;  %v2884_v27 = vsel %vm2198_vm4, %v2882_v37, -inf }
 0xee0   : > { %v2885_v18 = vsel %vm2198_vm4, %v2883_v44, -inf }
 0xee1   : > { %v2886_v36 = vmax.f32 %v2884_v27, %v2885_v18 }
 0xee3   : > { %v2887_v50 = vrot.slane %v2886_v36, 4 }
 0xee5   : > { %v2888_v3 = vmax.f32 %v2886_v36, %v2887_v50 }
 0xee7   : > { %v2889_v39 = vrot.slane %v2888_v3, 2 }
 0xee9   : > { %v2890_v41 = vmax.f32 %v2888_v3, %v2889_v39 }
 0xeeb   : > { %v2891_v32 = vrot.slane %v2890_v41, 1 }
 0xeed   : > { %v2892_v42 = vmax.f32 %v2890_v41, %v2891_v32 }
 0xeef   : > { %v2893_v6 = vsub.f32 %v2882_v37, %v2892_v42  ;;  %v2894_v43 = vsub.f32 %v2883_v44, %v2892_v42  ;;  %3343 = vst.msk [vmem:[%s7173_s5] sm:$0x1] %vm3341_vm5, %v2892_v42  ;;  %s7273_s5 = sld [smem:[#allocation27_spill]] }
 0xef1   : > { %v2895_v47 = vmul.f32 1.442695, %v2893_v6  ;;  %v2897_v49 = vmul.f32 1.442695, %v2894_v43 }
 0xef3   : > { %5845 = vpow2.f32 %v2895_v47 }
 0xef4   : > { %5847 = vpow2.f32 %v2897_v49 }
 0xefd   : > { %v5846_v52 = vpop.eup %5845 }
 0xefe   : > { %v5848_v53 = vpop.eup %5847  ;;  %v2899_v57 = vsel %vm2198_vm4, %v5846_v52, 0.0 }
 0xeff   : > { %v2900_v58 = vsel %vm2198_vm4, %v5848_v53, 0.0 }
 0xf00   : > { %v2901_v60 = vadd.f32 %v2900_v58, %v2899_v57 }
 0xf02   : > { %v2902_v62 = vrot.slane %v2901_v60, 4 }
 0xf04   : > { %v2903_v1 = vadd.f32 %v2902_v62, %v2901_v60 }
 0xf06   : > { %v2904_v2 = vrot.slane %v2903_v1, 2 }
 0xf08   : > { %v2905_v5 = vadd.f32 %v2904_v2, %v2903_v1 }
 0xf0a   : > { %v2906_v8 = vrot.slane %v2905_v5, 1 }
 0xf0c   : > { %v2907_v12 = vadd.f32 %v2906_v8, %v2905_v5 }
 0xf0e   : > { %5849 = vrcp.f32 %v2907_v12 }
 0xf18   : > { %v5850_v15 = vpop.eup %5849 }
 0xf19   : > { %v2909_v16 = vmul.f32 %v5850_v15, %v5846_v52  ;;  %v2910_v21 = vmul.f32 %v5850_v15, %v5848_v53 }
 0xf1b   : > { %v2911_v22 = vpack.c.bf16 %v2910_v21, %v2909_v16 }
 0xf1d   : > { %2912 = vxpose.xlu1.c.b16.start.end [1/1] (short) (narrow) %v2911_v22, 16 }
 0xf83   : > { %v2920_v23 = vpop.trf.xlu1 }
 0xf84   : > { %5503 = vmatmul.mubr.msk.bf16.vlgmr.msra.gmra.mrb[20].mxu0 %vm1705_vm2, %v2920_v23 }
 0xf85   : > { %5518 = vmatprep.mubr.msk.f32.mxu0 %vm6089_vm3, %v6088_v7 }
0x1057   : > { %v2965_v48 = vpop.f32.mrb[20].mxu0 }
0x1058   : > { %v5504_v25 = vpop.f32.mrb[21].mxu0 }
0x1059   : > { %v2968_v26 = vpop.f32.mrb[22].mxu0 }
0x105a   : > { %v2972_v54 = vpack.c.bf16 %v2968_v26, %v2965_v48  ;;  %v5505_v28 = vpop.f32.mrb[23].mxu0 }
0x105c   : > { %5511 = vmatmul.mubr.msk.bf16.vlgmr.msra.gmra.mrb[24].mxu1 %vm1846_vm0, %v2972_v54 }
0x105d   : > { %5523 = vmatprep.mubr.msk.f32.mxu1 %vm2452_vm9, %v6631_v61 }
0x112f   : > { %v3010_v46 = vpop.f32.mrb[24].mxu1 }
0x1130   : > { %v3011_v55 = vadd.f32 %v6604_v38, %v3010_v46  ;;  %v5512_v30 = vpop.f32.mrb[25].mxu1 }
0x1131   : > { %v3013_v37 = vpop.f32.mrb[26].mxu1 }
0x1132   : > { %v6777_v35 = vadd.f32 %v3011_v55, %v6728_v29  ;;  %v3014_v45 = vadd.f32 %v6604_v38, %v3013_v37  ;;  %v5513_v44 = vpop.f32.mrb[27].mxu1 }
0x1134   : > { %v6781_v27 = vadd.f32 %v3014_v45, %v6733_v34  ;;  %v3019_v18 = vsel %vm1846_vm0, %v6777_v35, -inf }
0x1135   : > { %3020 = vmax.xlane.f32.xlu0 %v3019_v18 }
0x1136   : > { %v3022_v61 = vsel %vm2037_vm1, %v6781_v27, -inf }
0x1139   : > { %3023 = vmax.xlane.f32.xlu0 %v3022_v61 }
0x11c2   : > { %v3021_v36 = vpop.xlane.xlu0 %3020 }
0x11c6   : > { %v3024_v50 = vpop.xlane.xlu0 %3023 }
0x11c7   : > { %v5661_v3 = vpack.c.bf16 %v3024_v50, %v3021_v36 }
0x11c9   : > { %5663 = vmatpush3.bf16.msk.msra.mxu0 %vm6619_vm8, %v5661_v3 }
0x11ca   : > { %5526 = vmatprep.subr.bf16.mxu0 %v6088_v7 }
0x11cc   : > { %5519 = vmatmul.mubr.msk.f32.vlgmr.msra.gmra.mrb[24].mxu0 %vm2198_vm4, %v6626_v51 }
0x11cd   : > { %5527 = vmatpush3.bf16.msra.mxu0 %v6674_v63  ;;  %5530 = vmatprep.mubr.msk.bf16.mxu0 %vm6089_vm3, %v6088_v7 }
0x11ce   : > { %5528 = vmatprep.subr.bf16.mxu0 %v6088_v7 }
0x11d1   : > { %5529 = vmatpush3.bf16.msra.mxu0 %v6679_v0 }
0x11d2   : > { %5542 = vmatprep.subr.bf16.mxu0 %v6088_v7 }
0x129f   : > { %v3094_v38 = vpop.f32.mrb[24].mxu0 }
0x12a0   : > { %v3095_v59 = vadd.f32 %v3094_v38, %v6636_v56  ;;  %v5520_v29 = vpop.f32.mrb[25].mxu0 }
0x12a2   : > { %v3099_v34 = vmul.f32 0.70710677, %v3095_v59  ;;  %v3098_v41 = vmul.f32 0.5, %v3095_v59 }
0x12a4   : > { %5851 = verf.f32 %v3099_v34 }
0x12ae   : > { %v5852_v39 = vpop.eup %5851 }
0x12af   : > { %v3101_v51 = vadd.f32 1.0, %v5852_v39 }
0x12b1   : > { %v3102_v32 = vmul.f32 %v3101_v51, %v3098_v41 }
0x12b3   : > { %5521 = vmatprep.subr.msk.mxu1 %vm2459_vm10, %v3102_v32 }
0x12b4   : > { %5522 = vmatpush3.msk.msra.mxu1 %vm2459_vm10, %v3102_v32 }
0x12b5   : > { %5524 = vmatmul.mubr.msk.f32.vlgmr.msra.gmra.mrb[28].mxu1 %vm2452_vm9, %v6640_v9  ;;  %5534 = vmatprep.subr.bf16.mxu1 %v6088_v7 }
0x12b6   : > { %5535 = vmatpush3.bf16.msra.mxu1 %v6701_v31  ;;  %5538 = vmatprep.mubr.msk.bf16.mxu1 %vm6089_vm3, %v6088_v7 }
0x12b7   : > { %5536 = vmatprep.subr.bf16.mxu1 %v6088_v7 }
0x12ba   : > { %5537 = vmatpush3.bf16.msra.mxu1 %v6706_v33 }
0x12bb   : > { %5550 = vmatprep.subr.bf16.mxu1 %v6088_v7 }
0x1388   : > { %v5525_v56 = vpop.f32.mrb[28].mxu1 }
0x1389   : > { %v3178_v63 = vadd.f32 %v5525_v56, %v6650_v10  ;;  %v3172_v0 = vpop.f32.mrb[29].mxu1 }
0x138a   : > { %v3173_v42 = vadd.f32 %v3172_v0, %v6653_v11 }
0x138b   : > { %v5242_v9 = vmul.f32 -1.442695, %v3178_v63 }
0x138c   : > { %v5241_v6 = vmul.f32 -1.442695, %v3173_v42 }
0x138d   : > { %5853 = vpow2.f32 %v5242_v9 }
0x138e   : > { %5855 = vpow2.f32 %v5241_v6 }
0x1397   : > { %v5854_v31 = vpop.eup %5853 }
0x1398   : > { %v5856_v43 = vpop.eup %5855  ;;  %v3188_v49 = vadd.f32 1.0, %v5854_v31 }
0x1399   : > { %v3187_v47 = vadd.f32 1.0, %v5856_v43 }
0x139b   : > { %5857 = vrcp.f32 %v3187_v47 }
0x139c   : > { %5859 = vrcp.f32 %v3188_v49 }
0x13a5   : > { %v5858_v52 = vpop.eup %5857 }
0x13a6   : > { %3195 = vperm.xlu0 %5771, %v5858_v52   ;;  %v5860_v33 = vpop.eup %5859 }
0x13aa   : > { %3200 = vperm.xlu0 %5771, %v5860_v33  }
0x1425   : > { %v3196_v53 = vpop.permute.xlu0 %3195 }
0x1426   : > { %v3203_v10 = vmul.f32 %v3196_v53, %v6777_v35 }
0x1428   : > { %v6814_v57 = vadd.f32 %v3203_v10, %v6777_v35 }
0x1429   : > { %v3201_v11 = vpop.permute.xlu0 %3200 }
0x142a   : > { %v3204_v58 = vmul.f32 %v3201_v11, %v6781_v27  ;;  %v3207_v60 = vsel %vm1846_vm0, %v6814_v57, 0.0 }
0x142b   : > { %3208 = vadd.xlane.f32.xlu0 %v3207_v60 }
0x142c   : > { %v3206_v62 = vadd.f32 %v3204_v58, %v6781_v27 }
0x142e   : > { %v3210_v1 = vsel %vm2037_vm1, %v3206_v62, 0.0 }
0x142f   : > { %3211 = vadd.xlane.f32.xlu1 %v3210_v1 }
0x14b8   : > { %v3209_v2 = vpop.xlane.xlu0 %3208 }
0x14b9   : > { %v3213_v5 = vmul.f32 0.03125, %v3209_v2  ;;  %v3344_v2 = vld [vmem:[%s7271_s3] sm:$0xff] }
0x14bb   : > { %v3215_v8 = vsub.f32 %v6814_v57, %v3213_v5  ;;  %v3347_v5 = vld [vmem:[%s7271_s3 + $0x18] sm:$0xff] }
0x14bc   : > { %v3212_v12 = vpop.xlane.xlu1 %3211 }
0x14bd   : > { %v3214_v15 = vmul.f32 0.03125, %v3212_v12  ;;  %v3217_v16 = vmul.f32 %v3215_v8, %v3215_v8 }
0x14bf   : > { %v3216_v21 = vsub.f32 %v3206_v62, %v3214_v15  ;;  %v3219_v22 = vsel %vm1846_vm0, %v3217_v16, 0.0 }
0x14c0   : > { %3220 = vadd.xlane.f32.xlu1 %v3219_v22 }
0x14c1   : > { %v3218_v23 = vmul.f32 %v3216_v21, %v3216_v21 }
0x14c3   : > { %v3222_v48 = vsel %vm2037_vm1, %v3218_v23, 0.0 }
0x14c4   : > { %3223 = vadd.xlane.f32.xlu1 %v3222_v48 }
0x154d   : > { %v3221_v25 = vpop.xlane.xlu1 %3220 }
0x154e   : > { %v3225_v26 = vmul.f32 0.03125, %v3221_v25 }
0x1550   : > { %v3227_v54 = vadd.f32 1e-05, %v3225_v26 }
0x1551   : > { %v3224_v28 = vpop.xlane.xlu1 %3223 }
0x1552   : > { %5861 = vrsqrt.f32 %v3227_v54  ;;  %v3226_v46 = vmul.f32 0.03125, %v3224_v28 }
0x1554   : > { %v3228_v55 = vadd.f32 1e-05, %v3226_v46  ;;  %v5788_v46 = vld [vmem:[%s7273_s5] sm:$0xff]  }
0x1556   : > { %5863 = vrsqrt.f32 %v3228_v55 }
0x155c   : > { %v5862_v30 = vpop.eup %5861 }
0x155d   : > { %v3231_v37 = vmul.f32 %v5862_v30, %v3215_v8  ;;  %v3374_v8 = vld [vmem:[%s7272_s6 + $0x10] sm:$0xff]  ;;  %v5789_v30 = vld [vmem:[%s7273_s5 + $0x8] sm:$0xff]   ;;  %s7276_s5 = sld [smem:[#allocation34_spill]] }
0x155f   : > { %v3233_v44 = vmul.f32 %v6684_v17, %v3231_v37 }
0x1560   : > { %v5864_v45 = vpop.eup %5863 }
0x1561   : > { %v3232_v18 = vmul.f32 %v5864_v45, %v3216_v21  ;;  %v3235_v36 = vadd.f32 %v6688_v24, %v3233_v44 }
0x1563   : > { %v3234_v61 = vmul.f32 %v6684_v17, %v3232_v18 }
0x1565   : > { %v3236_v50 = vadd.f32 %v6688_v24, %v3234_v61 }
0x1567   : > { %v3237_v3 = vpack.c.bf16 %v3236_v50, %v3235_v36 }
0x1569   : > { %5531 = vmatmul.mubr.msk.bf16.vlgmr.msra.gmra.mrb[28].mxu0 %vm1846_vm0, %v3237_v3 }
0x156a   : > { %5546 = vmatprep.mubr.msk.bf16.mxu0 %vm6089_vm3, %v6088_v7  ;;  %5543 = vmatpush3.bf16.msra.mxu0 %v5788_v46  ;;  %v4939_v46 = vld [vmem:[%s7288_s24] sm:$0xff] }
0x156b   : > { %5544 = vmatprep.subr.bf16.mxu0 %v6088_v7 }
0x156e   : > { %5545 = vmatpush3.bf16.msra.mxu0 %v5789_v30  ;;  %v4942_v30 = vld [vmem:[%s7288_s24 + $0x18] sm:$0xff] }
0x156f   : > { %5558 = vmatprep.subr.bf16.mxu0 %v6088_v7 }
0x163c   : > { %v3275_v38 = vpop.f32.mrb[28].mxu0 }
0x163d   : > { %v3276_v59 = vadd.f32 %v6711_v40, %v3275_v38  ;;  %v5532_v29 = vpop.f32.mrb[29].mxu0 }
0x163e   : > { %v3278_v34 = vpop.f32.mrb[30].mxu0 }
0x163f   : > { %v3284_v39 = vmul.f32 0.70710677, %v3276_v59  ;;  %v3279_v41 = vadd.f32 %v6711_v40, %v3278_v34  ;;  %v5533_v51 = vpop.f32.mrb[31].mxu0  ;;  %v3282_v63 = vmul.f32 0.5, %v3276_v59 }
0x1641   : > { %5865 = verf.f32 %v3284_v39  ;;  %v3285_v17 = vmul.f32 0.70710677, %v3279_v41  ;;  %v3283_v0 = vmul.f32 0.5, %v3279_v41 }
0x1643   : > { %5867 = verf.f32 %v3285_v17 }
0x164b   : > { %v5866_v32 = vpop.eup %5865 }
0x164c   : > { %v3288_v24 = vadd.f32 1.0, %v5866_v32 }
0x164d   : > { %v5868_v56 = vpop.eup %5867 }
0x164e   : > { %v3289_v42 = vadd.f32 1.0, %v5868_v56  ;;  %v3290_v9 = vmul.f32 %v3288_v24, %v3282_v63  ;;  %v3962_v56 = vld [vmem:[%s7277_s8] sm:$0xff] }
0x1650   : > { %v3291_v6 = vmul.f32 %v3289_v42, %v3283_v0  ;;  %v4369_v42 = vld [vmem:[%s7279_s9] sm:$0xff] }
0x1652   : > { %v3292_v31 = vpack.c.bf16 %v3291_v6, %v3290_v9  ;;  %v4373_v9 = vld [vmem:[%s7280_s13] sm:$0xff]  ;;  %v4371_v6 = vld [vmem:[%s7279_s9 + $0x10] sm:$0xff] }
0x1654   : > { %5539 = vmatmul.mubr.msk.bf16.vlgmr.msra.gmra.mrb[32].mxu1 %vm1846_vm0, %v3292_v31  ;;  %v4375_v31 = vld [vmem:[%s7280_s13 + $0x10] sm:$0xff] }
0x1655   : > { %5554 = vmatprep.mubr.msk.bf16.mxu1 %vm6089_vm3, %v6088_v7 }
0x1727   : > { %v3330_v40 = vpop.f32.mrb[32].mxu1 }
0x1728   : > { %v3331_v43 = vadd.f32 %v6719_v4, %v3330_v40  ;;  %v5540_v47 = vpop.f32.mrb[33].mxu1  ;;  %v5786_v40 = vld [vmem:[%s7281_s14] sm:$0xff]  }
0x1729   : > { %v3333_v49 = vpop.f32.mrb[34].mxu1 }
0x172a   : > { %v3337_v52 = vadd.f32 %v3331_v43, %v6814_v57  ;;  %v3334_v33 = vadd.f32 %v6719_v4, %v3333_v49  ;;  %v5541_v53 = vpop.f32.mrb[35].mxu1  ;;  %v3346_v57 = vld [vmem:[%s7271_s3 + $0x10] sm:$0xff]  ;;  %v3345_v4 = vld [vmem:[%s7271_s3 + $0x8] sm:$0xff]  ;;  %s7274_s3 = sld [smem:[#allocation29_spill]] }
0x172b   : > { %v5787_v43 = vld [vmem:[%s7281_s14 + $0x8] sm:$0xff]   ;;  %s7287_s14 = sld [smem:[#allocation44_spill]] }
0x172c   : > { %v3338_v10 = vadd.f32 %v3334_v33, %v3206_v62  ;;  %v3339_v11 = vadd.f32 %v3337_v52, %v6777_v35  ;;  %v3372_v62 = vld [vmem:[%s7272_s6] sm:$0xff]  ;;  %v3373_v35 = vld [vmem:[%s7272_s6 + $0x8] sm:$0xff] }
0x172e   : > { %v3487_v58 = vsel %vm1846_vm0, %v3339_v11, 0.0  ;;  %v3340_v60 = vadd.f32 %v3338_v10, %v6781_v27  ;;  %v3375_v27 = vld [vmem:[%s7272_s6 + $0x18] sm:$0xff]  ;;  %s7275_s6 = sld [smem:[#allocation33_spill]]  ;;  %v5791_v10 = vld [vmem:[%s7282_s16] sm:$0xff]  }
0x172f   : > { %3488 = vadd.xlane.f32.xlu1 %v3487_v58 }
0x1730   : > { %v3490_v1 = vsel %vm2037_vm1, %v3340_v60, 0.0  ;;  %v5790_v44 = vld [vmem:[%s7274_s3] sm:$0xff]   ;;  %v5792_v18 = vld [vmem:[%s7274_s3 + $0x8] sm:$0xff]   ;;  %s7278_s3 = sld [smem:[#allocation52_spill]] }
0x1731   : > { %3491 = vadd.xlane.f32.xlu0 %v3490_v1  ;;  %5551 = vmatpush3.bf16.msra.mxu1 %v5790_v44 }
0x1732   : > { %5552 = vmatprep.subr.bf16.mxu1 %v6088_v7 }
0x1734   : > { %v5785_v24 = vld [vmem:[%s7275_s6 + $0x8] sm:$0xff]  }
0x1735   : > { %5553 = vmatpush3.bf16.msra.mxu1 %v5792_v18 }
0x1736   : > { %5566 = vmatprep.subr.bf16.mxu1 %v6088_v7  ;;  %v3966_v63 = vld [vmem:[%s7278_s3] sm:$0xff]  ;;  %v3968_v0 = vld [vmem:[%s7278_s3 + $0x10] sm:$0xff] }
0x1740   : > { %3350 = vperm.xlu1 %5770, %v3344_v2  }
0x1744   : > { %3360 = vperm.xlu1 %5770, %v3346_v57   ;;  %v5255_v57 = vld [vmem:[%s7284_s17] ss:$0 sm:$0xff]  ;;  %s7289_s17 = sld [smem:[#allocation28_spill]] }
0x1747   : > { %3355 = vperm.xlu0 %5771, %v3345_v4  }
0x1748   : > { %3365 = vperm.xlu1 %5770, %v3347_v5  }
0x174b   : > { %3378 = vperm.xlu0 %5771, %v3372_v62  }
0x174c   : > { %3383 = vperm.xlu1 %5770, %v3373_v35  }
0x174f   : > { %3388 = vperm.xlu0 %5771, %v3374_v8  }
0x1750   : > { %3393 = vperm.xlu1 %5770, %v3375_v27   ;;  %v5250_v27 = vld [vmem:[%s7285_s19] ss:$0 sm:$0xff]  ;;  %s7291_s19 = sld [smem:[#allocation32_spill]] }
0x17bc   : > { %v3489_v12 = vpop.xlane.xlu1 %3488 }
0x17bd   : > { %v3493_v15 = vmul.f32 0.03125, %v3489_v12  ;;  %v5256_v12 = vld [vmem:[%s7286_s21] ss:$0 sm:$0xff]  ;;  %s7290_s21 = sld [smem:[#allocation30_spill]] }
0x17be   : > { %v3492_v16 = vpop.xlane.xlu0 %3491 }
0x17bf   : > { %v6851_v21 = vsub.f32 %v3339_v11, %v3493_v15  ;;  %v3494_v22 = vmul.f32 0.03125, %v3492_v16 }
0x17c0   : > { %v3351_v28 = vpop.permute.xlu1 %3350 }
0x17c1   : > { %v6853_v23 = vsub.f32 %v3340_v60, %v3494_v22  ;;  %v3497_v48 = vmul.f32 %v6851_v21, %v6851_v21  ;;  %v3368_v3 = vmul.f32 %v3351_v28, %v6500_v13  ;;  %v5784_v13 = vld [vmem:[%s7275_s6] sm:$0xff]   ;;  %s7283_s6 = sld [smem:[#allocation23_spill]]  ;;  %v5793_v60 = vld [vmem:[%s7282_s16 + $0x8] sm:$0xff]  }
0x17c2   : > { %v4482_v22 = vld [vmem:[%s7287_s14 + $0x48] sm:$0xff] }
0x17c3   : > { %v3499_v25 = vsel %vm1846_vm0, %v3497_v48, 0.0  ;;  %v3498_v26 = vmul.f32 %v6853_v23, %v6853_v23 }
0x17c4   : > { %3500 = vadd.xlane.f32.xlu0 %v3499_v25  ;;  %v3361_v55 = vpop.permute.xlu1 %3360 }
0x17c5   : > { %v3502_v54 = vsel %vm2037_vm1, %v3498_v26, 0.0  ;;  %v3370_v41 = vmul.f32 %v3361_v55, %v6510_v20  ;;  %v3964_v20 = vld [vmem:[%s7277_s8 + $0x10] sm:$0xff] }
0x17c6   : > { %3503 = vadd.xlane.f32.xlu1 %v3502_v54  ;;  %v3356_v45 = vpop.permute.xlu0 %3355  ;;  %v4941_v55 = vld [vmem:[%s7288_s24 + $0x10] sm:$0xff] }
0x17c7   : > { %v3369_v50 = vmul.f32 %v3356_v45, %v6502_v14  ;;  %v5249_v2 = vld [vmem:[%s7283_s6] ss:$0 sm:$0xff]  ;;  %s7292_s6 = sld [smem:[#allocation53_spill]] }
0x17c8   : > { %v3366_v37 = vpop.permute.xlu1 %3365 }
0x17c9   : > { %v3371_v29 = vmul.f32 %v3366_v37, %v6507_v19  ;;  %v3935_v19 = vld [vmem:[%s7276_s5 + $0x8] sm:$0xff]  ;;  %v5245_v37 = vld [vmem:[%s7289_s17] ss:$0 sm:$0xff]  ;;  %s7294_s17 = sld [smem:[#allocation54_spill]] }
0x17ca   : > { %v3379_v36 = vpop.permute.xlu0 %3378 }
0x17cb   : > { %v3396_v34 = vadd.f32 %v3379_v36, %v3368_v3 }
0x17cc   : > { %v3384_v61 = vpop.permute.xlu1 %3383 }
0x17cd   : > { %v3397_v38 = vadd.f32 %v3384_v61, %v3369_v50 }
0x17ce   : > { %v3389_v39 = vpop.permute.xlu0 %3388 }
0x17cf   : > { %v3404_v51 = vpack.c.bf16 %v3397_v38, %v3396_v34  ;;  %v3398_v14 = vadd.f32 %v3389_v39, %v3370_v41 }
0x17d0   : > { %v3394_v59 = vpop.permute.xlu1 %3393 }
0x17d1   : > { %v3399_v17 = vadd.f32 %v3394_v59, %v3371_v29  ;;  %v5257_v29 = vld [vmem:[%s7291_s19] ss:$0 sm:$0xff]  ;;  %s7296_s19 = sld [smem:[#allocation56_spill]] }
0x17d3   : > { %v3405_v32 = vpack.c.bf16 %v3399_v17, %v3398_v14 }
0x17f1   : > { %3413 = vxpose.xlu0.c.b16.start [1/2] (short) (narrow) %v3404_v51, 16 }
0x17f5   : > { %3414 = vxpose.xlu0.c.b16.end [2/2] (short) (narrow) %v3405_v32, 16 }
0x17f9   : > { %3859 = vxpose.xlu0.c.b16.start [1/2] (short) (narrow) %v5784_v13, 32 }
0x17fd   : > { %3860 = vxpose.xlu0.c.b16.end [2/2] (short) (narrow) %v5785_v24, 32 }
0x1806   : > { %3945 = vperm.xlu0 %5771, %v3935_v19  }
0x180a   : > { %4014 = vperm.xlu0 %5771, %v3962_v56  }
0x180e   : > { %4024 = vperm.xlu0 %5771, %v3964_v20  }
0x1812   : > { %4038 = vperm.xlu0 %5771, %v3966_v63  }
0x1816   : > { %4048 = vperm.xlu0 %5771, %v3968_v0  }
0x181a   : > { %4421 = vperm.xlu0 %5771, %v4369_v42   ;;  %v3934_v42 = vld [vmem:[%s7276_s5] sm:$0xff] }
0x181e   : > { %4445 = vperm.xlu0 %5771, %v4373_v9   ;;  %v3936_v9 = vld [vmem:[%s7276_s5 + $0x10] sm:$0xff] }
0x1822   : > { %4431 = vperm.xlu0 %5771, %v4371_v6   ;;  %v3937_v6 = vld [vmem:[%s7276_s5 + $0x18] sm:$0xff]  ;;  %s4977_s5 = scalar_lea.sflag [#allocation3], %s6580_s15 }
0x1826   : > { %4455 = vperm.xlu0 %5771, %v4375_v31   ;;  %v3963_v31 = vld [vmem:[%s7277_s8 + $0x8] sm:$0xff] }
0x1844   : > { %4581 = vxpose.xlu0.c.b16.start [1/2] (short) %v5786_v40, 128  ;;  %v3965_v40 = vld [vmem:[%s7277_s8 + $0x18] sm:$0xff]  ;;  %s6092_s8 = smov [#allocation2]  }
0x1848   : > { %4582 = vxpose.xlu0.c.b16.end [2/2] (short) %v5787_v43, 128  ;;  %v3967_v43 = vld [vmem:[%s7278_s3 + $0x8] sm:$0xff] }
0x1851   : > { %v3501_v47 = vpop.xlane.xlu0 %3500 }
0x1852   : > { %v3505_v49 = vmul.f32 0.03125, %v3501_v47  ;;  %v3969_v47 = vld [vmem:[%s7278_s3 + $0x18] sm:$0xff] }
0x1853   : > { %v3504_v52 = vpop.xlane.xlu1 %3503 }
0x1854   : > { %v3507_v33 = vadd.f32 1e-05, %v3505_v49  ;;  %v3506_v53 = vmul.f32 0.03125, %v3504_v52  ;;  %v4370_v49 = vld [vmem:[%s7279_s9 + $0x8] sm:$0xff] }
0x1855   : > { %v4374_v52 = vld [vmem:[%s7280_s13 + $0x8] sm:$0xff] }
0x1856   : > { %5869 = vrsqrt.f32 %v3507_v33  ;;  %v3508_v11 = vadd.f32 1e-05, %v3506_v53  ;;  %v4372_v33 = vld [vmem:[%s7279_s9 + $0x18] sm:$0xff]  ;;  %s5939_s9 = sshll.u32 %s6092_s8, 4  ;;  %s5940_s9 = int_to_ptr.vmem [resolvable:$false] %s5939_s9 }
0x1857   : > { %v3421_v58 = vpop.trf.xlu0  ;;  %v4376_v53 = vld [vmem:[%s7280_s13 + $0x18] sm:$0xff] }
0x1858   : > { %5871 = vrsqrt.f32 %v3508_v11  ;;  %5547 = vmatmul.mubr.msk.bf16.vlgmr.msra.gmra.mrb[32].mxu0 %vm1846_vm0, %v3421_v58  ;;  %v4474_v11 = vld [vmem:[%s7287_s14 + $0x8] sm:$0xff]  ;;  %v4475_v58 = vld [vmem:[%s7287_s14 + $0x10] sm:$0xff] }
0x1859   : > { %5559 = vmatpush3.bf16.msra.mxu0 %v5791_v10  ;;  %5562 = vmatprep.mubr.msk.bf16.mxu0 %vm6089_vm3, %v6088_v7  ;;  %v4473_v10 = vld [vmem:[%s7287_s14] sm:$0xff] }
0x185a   : > { %5560 = vmatprep.subr.bf16.mxu0 %v6088_v7 }
0x185d   : > { %5561 = vmatpush3.bf16.msra.mxu0 %v5793_v60  ;;  %v4476_v60 = vld [vmem:[%s7287_s14 + $0x18] sm:$0xff] }
0x185f   : > { %v3867_v0 = vpop.trf.xlu0 }
0x1860   : > { %v5870_v1 = vpop.eup %5869 }
0x1861   : > { %v3511_v4 = vmul.f32 %v5870_v1, %v6851_v21  ;;  %v4477_v1 = vld [vmem:[%s7287_s14 + $0x20] sm:$0xff] }
0x1862   : > { %v5872_v5 = vpop.eup %5871 }
0x1863   : > { %v3519_v62 = vmul.f32 %v5249_v2, %v3511_v4  ;;  %v3605_v35 = vmul.f32 %v5255_v57, %v3511_v4  ;;  %v3512_v8 = vmul.f32 %v5872_v5, %v6853_v23  ;;  %v4940_v23 = vld [vmem:[%s7288_s24 + $0x8] sm:$0xff]  ;;  %v4480_v4 = vld [vmem:[%s7287_s14 + $0x38] sm:$0xff]  ;;  %v4481_v5 = vld [vmem:[%s7287_s14 + $0x40] sm:$0xff] }
0x1865   : > { %v3520_v15 = vmul.f32 %v5249_v2, %v3512_v8  ;;  %v3606_v16 = vmul.f32 %v5255_v57, %v3512_v8  ;;  %v3527_v48 = vadd.f32 %v5250_v27, %v3519_v62  ;;  %v3613_v26 = vadd.f32 %v5256_v12, %v3605_v35  ;;  %v4478_v2 = vld [vmem:[%s7287_s14 + $0x28] sm:$0xff]  ;;  %v4479_v57 = vld [vmem:[%s7287_s14 + $0x30] sm:$0xff]  ;;  %v4484_v35 = vld [vmem:[%s7287_s14 + $0x58] sm:$0xff] }
0x1866   : > { %v4483_v62 = vld [vmem:[%s7287_s14 + $0x50] sm:$0xff]  ;;  %v4485_v8 = vld [vmem:[%s7287_s14 + $0x60] sm:$0xff] }
0x1867   : > { %v3528_v25 = vadd.f32 %v5250_v27, %v3520_v15  ;;  %v3614_v54 = vadd.f32 %v5256_v12, %v3606_v16  ;;  %v4486_v27 = vld [vmem:[%s7287_s14 + $0x68] sm:$0xff]  ;;  %v4487_v12 = vld [vmem:[%s7287_s14 + $0x70] sm:$0xff]  ;;  %v4488_v16 = vld [vmem:[%s7287_s14 + $0x78] sm:$0xff] }
0x1869   : > { %4536 = vperm.xlu0 %5771, %v4482_v22   ;;  %v3533_v21 = vpack.c.bf16 %v3528_v25, %v3527_v48  ;;  %v3619_v28 = vpack.c.bf16 %v3614_v54, %v3613_v26 }
0x186b   : > { %5555 = vmatmul.mubr.msk.bf16.vlgmr.msra.gmra.mrb[36].mxu1 %vm1846_vm0, %v3533_v21  ;;  %5563 = vmatmul.mubr.msk.bf16.vlgmr.msra.gmra.mrb[36].mxu0 %vm1846_vm0, %v3619_v28 }
0x186c   : > { %5568 = vmatprep.mubr.msk.bf16.mxu1 %vm6089_vm3, %v6088_v7  ;;  %v5251_v7 = vld [vmem:[%s7290_s21] ss:$0 sm:$0xff]  ;;  %s7295_s21 = sld [smem:[#allocation57_spill]] }
0x186d   : > { %4945 = vperm.xlu0 %5771, %v4939_v46  }
0x1871   : > { %4950 = vperm.xlu0 %5771, %v4940_v23  }
0x1875   : > { %4955 = vperm.xlu0 %5771, %v4941_v55  }
0x1879   : > { %4960 = vperm.xlu0 %5771, %v4942_v30  }
0x192b   : > { %v3478_v45 = vpop.f32.mrb[32].mxu0 }
0x192c   : > { %v3479_v44 = vadd.f32 %v5245_v37, %v3478_v45  ;;  %v5548_v18 = vpop.f32.mrb[33].mxu0 }
0x192d   : > { %v3481_v61 = vpop.f32.mrb[34].mxu0 }
0x192e   : > { %v3482_v36 = vadd.f32 %v5245_v37, %v3481_v61  ;;  %v5549_v50 = vpop.f32.mrb[35].mxu0 }
0x1930   : > { %v3684_v3 = vpack.c.bf16 %v3482_v36, %v3479_v44 }
0x1932   : > { %v3689_v38 = vsel %vm1846_vm0, %v3684_v3, 0 }
0x1933   : > { %5567 = vmatpush3.bf16.xpose.msra.mxu1 %v3689_v38 }
0x193e   : > { %v3590_v59 = vpop.f32.mrb[36].mxu1  ;;  %v3676_v34 = vpop.f32.mrb[36].mxu0 }
0x193f   : > { %v5556_v39 = vpop.f32.mrb[37].mxu1  ;;  %v5564_v41 = vpop.f32.mrb[37].mxu0  ;;  %v3591_v14 = vadd.f32 %v5251_v7, %v3590_v59  ;;  %v3677_v32 = vadd.f32 %v5257_v29, %v3676_v34 }
0x1940   : > { %v3593_v51 = vpop.f32.mrb[38].mxu1  ;;  %v3679_v17 = vpop.f32.mrb[38].mxu0 }
0x1941   : > { %v3594_v13 = vadd.f32 %v5251_v7, %v3593_v51  ;;  %v3680_v24 = vadd.f32 %v5257_v29, %v3679_v17  ;;  %v5557_v19 = vpop.f32.mrb[39].mxu1  ;;  %v5565_v56 = vpop.f32.mrb[39].mxu0 }
0x1943   : > { %v3683_v20 = vpack.c.bf16 %v3594_v13, %v3591_v14  ;;  %v3764_v63 = vpack.c.bf16 %v3680_v24, %v3677_v32 }
0x1945   : > { %5569 = vmatmul.mubr.msk.bf16.vlgmr.msra.gmra.mrb[40].mxu1 %vm1846_vm0, %v3683_v20  ;;  %3766 = vxpose.xlu1.c.b16.start.end [1/1] (short) (narrow) %v3764_v63, 32 }
0x1946   : > { %5582 = vmatprep.mubr.msk.bf16.mxu1 %vm1846_vm0, %v3867_v0 }
0x194d   : > { %3940 = vperm.xlu1 %5770, %v3934_v42  }
0x1951   : > { %3950 = vperm.xlu1 %5770, %v3936_v9  }
0x1955   : > { %3955 = vperm.xlu1 %5770, %v3937_v6  }
0x1959   : > { %4019 = vperm.xlu1 %5770, %v3963_v31  }
0x195d   : > { %4029 = vperm.xlu1 %5770, %v3965_v40  }
0x1961   : > { %4043 = vperm.xlu1 %5770, %v3967_v43  }
0x1965   : > { %4053 = vperm.xlu1 %5770, %v3969_v47  }
0x1969   : > { %4426 = vperm.xlu1 %5770, %v4370_v49   ;;  %v3868_v49 = vpop.trf.xlu0 }
0x196d   : > { %4450 = vperm.xlu1 %5770, %v4374_v52   ;;  %v5794_v52 = vld [vmem:[%s7292_s6] sm:$0xff]   ;;  %s7297_s6 = sld [smem:[#allocation45_spill]] }
0x1971   : > { %4436 = vperm.xlu1 %5770, %v4372_v33  }
0x1975   : > { %4460 = vperm.xlu1 %5770, %v4376_v53  }
0x1979   : > { %4491 = vperm.xlu1 %5770, %v4473_v10  }
0x197d   : > { %4496 = vperm.xlu1 %5770, %v4474_v11  }
0x1981   : > { %4501 = vperm.xlu1 %5770, %v4475_v58   ;;  %v5931_v58 = vld [vmem:[%s6458_s10 + $0x10] sm:$0xff] }
0x1985   : > { %4506 = vperm.xlu1 %5770, %v4476_v60  }
0x1989   : > { %4511 = vperm.xlu1 %5770, %v4477_v1   ;;  %v5932_v1 = vld [vmem:[%s6458_s10] sm:$0xff] }
0x198d   : > { %4516 = vperm.xlu1 %5770, %v4478_v2  }
0x1991   : > { %4521 = vperm.xlu1 %5770, %v4479_v57  }
0x1995   : > { %4526 = vperm.xlu1 %5770, %v4480_v4  }
0x1999   : > { %4531 = vperm.xlu1 %5770, %v4481_v5  }
0x199d   : > { %4541 = vperm.xlu1 %5770, %v4483_v62   ;;  %v5933_v62 = vld [vmem:[%s6458_s10 + $0x18] sm:$0xff] }
0x19a1   : > { %4546 = vperm.xlu1 %5770, %v4484_v35  }
0x19a5   : > { %4551 = vperm.xlu1 %5770, %v4485_v8   ;;  %v5934_v8 = vld [vmem:[%s6458_s10 + $0x8] sm:$0xff]  ;;  %s7293_s10 = sld [smem:[#allocation55_spill]] }
0x19a9   : > { %4556 = vperm.xlu1 %5770, %v4486_v27  }
0x19ab   : > { %v3774_v15 = vpop.trf.xlu1 }
0x19ac   : > { %5574 = vmatprep.mubr.msk.bf16.mxu0 %vm2198_vm4, %v3774_v15 }
0x19ad   : > { %4561 = vperm.xlu1 %5770, %v4487_v12   ;;  %v3946_v12 = vpop.permute.xlu0 %3945 }
0x19af   : > { %v3775_v42 = vpop.trf.xlu1 }
0x19b1   : > { %4566 = vperm.xlu1 %5770, %v4488_v16  }
0x19cc   : > { %v3941_v33 = vpop.permute.xlu1 %3940 }
0x19d0   : > { %v3951_v10 = vpop.permute.xlu1 %3950 }
0x1a18   : > { %v3725_v22 = vpop.f32.mrb[40].mxu1 }
0x1a19   : > { %v3732_v48 = vmax.f32 %v3725_v22, 0.0  ;;  %v5570_v25 = vpop.f32.mrb[41].mxu1  ;;  %v3956_v22 = vpop.permute.xlu1 %3955 }
0x1a1a   : > { %v3728_v26 = vpop.f32.mrb[42].mxu1 }
0x1a1b   : > { %v3734_v54 = vmul.f32 0.17677669, %v3732_v48  ;;  %v3733_v21 = vmax.f32 %v3728_v26, 0.0  ;;  %v5571_v28 = vpop.f32.mrb[43].mxu1 }
0x1a1d   : > { %v3735_v46 = vmul.f32 0.17677669, %v3733_v21  ;;  %v3736_v23 = vsel %vm1705_vm2, %v3734_v54, -inf }
0x1a1f   : > { %v3738_v55 = vsel %vm3737_vm11, %v3735_v46, -inf }
0x1a20   : > { %v3739_v30 = vmax.f32 %v3736_v23, %v3738_v55 }
0x1a22   : > { %v3740_v37 = vrot.slane %v3739_v30, 4 }
0x1a24   : > { %v3741_v45 = vmax.f32 %v3739_v30, %v3740_v37 }
0x1a26   : > { %v3742_v44 = vrot.slane %v3741_v45, 2 }
0x1a28   : > { %v3743_v18 = vmax.f32 %v3741_v45, %v3742_v44 }
0x1a2a   : > { %v3744_v61 = vrot.slane %v3743_v18, 1 }
0x1a2c   : > { %v3745_v36 = vmax.f32 %v3743_v18, %v3744_v61 }
0x1a2e   : > { %v3746_v50 = vsub.f32 %v3734_v54, %v3745_v36  ;;  %v3747_v3 = vsub.f32 %v3735_v46, %v3745_v36 }
0x1a30   : > { %v3748_v38 = vmul.f32 1.442695, %v3746_v50  ;;  %v3750_v7 = vmul.f32 1.442695, %v3747_v3 }
0x1a32   : > { %5873 = vpow2.f32 %v3748_v38 }
0x1a33   : > { %5875 = vpow2.f32 %v3750_v7 }
0x1a3c   : > { %v5874_v59 = vpop.eup %5873 }
0x1a3d   : > { %v5876_v29 = vpop.eup %5875  ;;  %v3752_v34 = vsel %vm1705_vm2, %v5874_v59, 0.0 }
0x1a3e   : > { %v3753_v39 = vsel %vm3737_vm11, %v5876_v29, 0.0 }
0x1a3f   : > { %v3754_v41 = vadd.f32 %v3753_v39, %v3752_v34 }
0x1a41   : > { %v3755_v51 = vrot.slane %v3754_v41, 4 }
0x1a43   : > { %v3756_v17 = vadd.f32 %v3755_v51, %v3754_v41 }
0x1a45   : > { %v3757_v14 = vrot.slane %v3756_v17, 2 }
0x1a47   : > { %v3758_v32 = vadd.f32 %v3757_v14, %v3756_v17 }
0x1a49   : > { %v3759_v13 = vrot.slane %v3758_v32, 1 }
0x1a4b   : > { %v3760_v24 = vadd.f32 %v3759_v13, %v3758_v32 }
0x1a4d   : > { %5877 = vrcp.f32 %v3760_v24 }
0x1a57   : > { %v5878_v19 = vpop.eup %5877 }
0x1a58   : > { %v3762_v56 = vmul.f32 %v5878_v19, %v5874_v59  ;;  %v3763_v20 = vmul.f32 %v5878_v19, %v5876_v29 }
0x1a5a   : > { %v3765_v63 = vpack.c.bf16 %v3763_v20, %v3762_v56 }
0x1a5c   : > { %5664 = vmatprep.subr.msk.bf16.mxu0 %vm3788_vm12, %v3765_v63  ;;  %v3790_v0 = vsel %vm3788_vm12, %v3765_v63, 0 }
0x1a5d   : > { %5573 = vmatpush3.bf16.msra.mxu0 %v3790_v0 }
0x1a5e   : > { %5586 = vmatprep.subr.bf16.mxu0 %v5794_v52 }
0x1a60   : > { %5575 = vmatmul.mubr.msk.bf16.vlgmr.msra.gmra.mrb[40].mxu0 %vm2198_vm4, %v3775_v42  ;;  %v4015_v42 = vpop.permute.xlu0 %4014 }
0x1a61   : > { %5587 = vmatpush3.bf16.msra.mxu0 %v5794_v52 }
0x1b33   : > { %v5576_v9 = vpop.f32.mrb[40].mxu0 }
0x1b34   : > { %v3826_v6 = vpop.f32.mrb[41].mxu0 }
0x1b35   : > { %v5577_v31 = vpop.f32.mrb[42].mxu0 }
0x1b36   : > { %v3846_v40 = vpack.c.bf16 %v5577_v31, %v5576_v9  ;;  %v3829_v43 = vpop.f32.mrb[43].mxu0  ;;  %v4020_v9 = vpop.permute.xlu1 %4019 }
0x1b37   : > { %v3845_v47 = vpack.c.bf16 %v3829_v43, %v3826_v6 }
0x1b39   : > { %5578 = vmatprep.subr.bf16.mxu1 %v3845_v47 }
0x1b3a   : > { %5579 = vmatpush3.bf16.msra.mxu1 %v3845_v47  ;;  %v4030_v43 = vpop.permute.xlu1 %4029 }
0x1b3b   : > { %5580 = vmatprep.subr.bf16.mxu1 %v3846_v40 }
0x1b3e   : > { %5581 = vmatpush3.bf16.msra.mxu1 %v3846_v40  ;;  %v4025_v40 = vpop.permute.xlu0 %4024 }
0x1b41   : > { %5583 = vmatmul.mubr.msk.bf16.vlgmr.msra.gmra.mrb[44].mxu1 %vm1846_vm0, %v3868_v49  ;;  %v4044_v49 = vpop.permute.xlu1 %4043 }
0x1b42   : > { %v4039_v47 = vpop.permute.xlu0 %4038 }
0x1c14   : > { %v5584_v53 = vpop.f32.mrb[44].mxu1 }
0x1c15   : > { %v3915_v11 = vpop.f32.mrb[45].mxu1  ;;  %v3932_v60 = vadd.f32 %v5931_v58, %v5584_v53 }
0x1c16   : > { %v3930_v2 = vadd.f32 %v5932_v1, %v3915_v11  ;;  %v5585_v57 = vpop.f32.mrb[46].mxu1 }
0x1c17   : > { %v3918_v4 = vpop.f32.mrb[47].mxu1  ;;  %v3933_v35 = vadd.f32 %v5933_v62, %v5585_v57  ;;  %v6953_v15 = vadd.f32 %v3951_v10, %v3932_v60  ;;  %v4049_v57 = vpop.permute.xlu0 %4048 }
0x1c18   : > { %v6949_v5 = vadd.f32 %v3941_v33, %v3930_v2  ;;  %v3931_v27 = vadd.f32 %v5934_v8, %v3918_v4  ;;  %v4054_v4 = vpop.permute.xlu1 %4053 }
0x1c19   : > { %v6959_v25 = vadd.f32 %v3956_v22, %v3933_v35  ;;  %v3973_v21 = vsel %vm1705_vm2, %v6953_v15, 0.0 }
0x1c1a   : > { %v6955_v16 = vadd.f32 %v3946_v12, %v3931_v27  ;;  %v3970_v48 = vsel %vm1705_vm2, %v6949_v5, 0.0 }
0x1c1b   : > { %v3975_v46 = vsel %vm1705_vm2, %v6959_v25, 0.0 }
0x1c1c   : > { %v3971_v26 = vsel %vm1705_vm2, %v6955_v16, 0.0 }
0x1c1d   : > { %v3972_v54 = vadd.f32 %v3971_v26, %v3970_v48  ;;  %v5795_v48 = vld [vmem:[%s7293_s10] sm:$0xff]   ;;  %v5796_v26 = vld [vmem:[%s7293_s10 + $0x8] sm:$0xff]  }
0x1c1e   : > { %5592 = vmatprep.subr.bf16.mxu1 %v5795_v48 }
0x1c1f   : > { %v3974_v28 = vadd.f32 %v3973_v21, %v3972_v54  ;;  %5593 = vmatpush3.bf16.msra.mxu1 %v5795_v48  ;;  %v5797_v54 = vld [vmem:[%s7293_s10 + $0x10] sm:$0xff]   ;;  %v5798_v21 = vld [vmem:[%s7293_s10 + $0x18] sm:$0xff]   ;;  %s5941_s10 = scalar_lea.vmem %s5940_s9, 32 }
0x1c20   : > { %5594 = vmatprep.subr.bf16.mxu1 %v5796_v26 }
0x1c21   : > { %v3976_v23 = vadd.f32 %v3975_v46, %v3974_v28  ;;  %v5268_v28 = vld [vmem:[%s7294_s17] ss:$0 sm:$0xff]  ;;  %s5304_s17 = sshll.u32 %s6405_s0, 4 }
0x1c23   : > { %v3977_v55 = vrot.slane %v3976_v23, 4  ;;  %5595 = vmatpush3.bf16.msra.mxu1 %v5796_v26 }
0x1c24   : > { %5596 = vmatprep.subr.bf16.mxu1 %v5797_v54 }
0x1c25   : > { %v3978_v30 = vadd.f32 %v3977_v55, %v3976_v23 }
0x1c27   : > { %v3979_v37 = vrot.slane %v3978_v30, 2  ;;  %5597 = vmatpush3.bf16.msra.mxu1 %v5797_v54 }
0x1c28   : > { %5598 = vmatprep.subr.bf16.mxu1 %v5798_v21 }
0x1c29   : > { %v3980_v45 = vadd.f32 %v3979_v37, %v3978_v30 }
0x1c2b   : > { %v3981_v44 = vrot.slane %v3980_v45, 1  ;;  %5599 = vmatpush3.bf16.msra.mxu1 %v5798_v21 }
0x1c2d   : > { %v3982_v18 = vadd.f32 %v3981_v44, %v3980_v45 }
0x1c2f   : > { %v3983_v61 = vmul.f32 0.03125, %v3982_v18 }
0x1c31   : > { %v3984_v36 = vsub.f32 %v6949_v5, %v3983_v61  ;;  %v3985_v50 = vsub.f32 %v6955_v16, %v3983_v61  ;;  %v3986_v3 = vsub.f32 %v6953_v15, %v3983_v61  ;;  %v3987_v38 = vsub.f32 %v6959_v25, %v3983_v61  ;;  %v6982_v61 = vpop.permute.xlu0 %4421 }
0x1c33   : > { %v3988_v7 = vmul.f32 %v3984_v36, %v3984_v36  ;;  %v3989_v59 = vmul.f32 %v3985_v50, %v3985_v50  ;;  %v3990_v29 = vmul.f32 %v3986_v3, %v3986_v3  ;;  %v3991_v34 = vmul.f32 %v3987_v38, %v3987_v38 }
0x1c35   : > { %v3992_v39 = vsel %vm1705_vm2, %v3988_v7, 0.0  ;;  %v3993_v41 = vsel %vm1705_vm2, %v3989_v59, 0.0  ;;  %v3995_v17 = vsel %vm1705_vm2, %v3990_v29, 0.0  ;;  %v3997_v32 = vsel %vm1705_vm2, %v3991_v34, 0.0  ;;  %v6984_v7 = vpop.permute.xlu0 %4445 }
0x1c36   : > { %v3994_v51 = vadd.f32 %v3993_v41, %v3992_v39 }
0x1c38   : > { %v3996_v14 = vadd.f32 %v3995_v17, %v3994_v51 }
0x1c39   : > { %v6986_v34 = vpop.permute.xlu0 %4431 }
0x1c3a   : > { %v3998_v13 = vadd.f32 %v3997_v32, %v3996_v14 }
0x1c3c   : > { %v3999_v24 = vrot.slane %v3998_v13, 4 }
0x1c3e   : > { %v4000_v19 = vadd.f32 %v3999_v24, %v3998_v13 }
0x1c40   : > { %v4001_v56 = vrot.slane %v4000_v19, 2 }
0x1c42   : > { %v4002_v20 = vadd.f32 %v4001_v56, %v4000_v19 }
0x1c44   : > { %v4003_v63 = vrot.slane %v4002_v20, 1 }
0x1c46   : > { %v4004_v0 = vadd.f32 %v4003_v63, %v4002_v20 }
0x1c48   : > { %v4005_v6 = vmul.f32 0.03125, %v4004_v0 }
0x1c4a   : > { %v4006_v31 = vadd.f32 1e-05, %v4005_v6 }
0x1c4c   : > { %5879 = vrsqrt.f32 %v4006_v31 }
0x1c56   : > { %v5880_v52 = vpop.eup %5879 }
0x1c57   : > { %v4009_v33 = vmul.f32 %v5880_v52, %v3985_v50  ;;  %v4008_v53 = vmul.f32 %v5880_v52, %v3984_v36  ;;  %v4010_v10 = vmul.f32 %v5880_v52, %v3986_v3  ;;  %v4011_v11 = vmul.f32 %v5880_v52, %v3987_v38  ;;  %v5802_v52 = vld [vmem:[%s7295_s21 + $0x18] sm:$0xff]  }
0x1c59   : > { %v4033_v58 = vmul.f32 %v4020_v9, %v4009_v33  ;;  %v4032_v60 = vmul.f32 %v4015_v42, %v4008_v53  ;;  %v4034_v1 = vmul.f32 %v4025_v40, %v4010_v10  ;;  %v4035_v2 = vmul.f32 %v4030_v43, %v4011_v11  ;;  %v6988_v9 = vpop.permute.xlu0 %4455  ;;  %v5799_v43 = vld [vmem:[%s7295_s21] sm:$0xff]  }
0x1c5a   : > { %5604 = vmatprep.subr.bf16.mxu0 %v5799_v43  ;;  %v5272_v33 = vld [vmem:[%s7296_s19] ss:$0 sm:$0xff]  ;;  %s7299_s19 = scalar_lea.vmem [#allocation2], %s6580_s15 }
0x1c5b   : > { %v4056_v62 = vadd.f32 %v4039_v47, %v4032_v60  ;;  %v4057_v35 = vadd.f32 %v4044_v49, %v4033_v58  ;;  %v4058_v8 = vadd.f32 %v4049_v57, %v4034_v1  ;;  %v4059_v27 = vadd.f32 %v4054_v4, %v4035_v2  ;;  %v5800_v47 = vld [vmem:[%s7295_s21 + $0x8] sm:$0xff]   ;;  %v5801_v49 = vld [vmem:[%s7295_s21 + $0x10] sm:$0xff]   ;;  %s4996_s3 = sshll.u32 %s7299_s19, 4  ;;  %s4997_s3 = int_to_ptr.vmem [resolvable:$true] %s4996_s3 }
0x1c5c   : > { %p5942_p0 = scmp.lt.s32.totalorder %s4997_s3, %s5940_s9 }
0x1c5d   : > { %v4062_v12 = vpack.c.bf16 %v4057_v35, %v4056_v62  ;;  %v4063_v22 = vpack.c.bf16 %v4059_v27, %v4058_v8  ;;  %v4589_v40 = vpop.trf.xlu0 }
0x1c5f   : > { %5588 = vmatprep.mubr.msk.bf16.mxu0 %vm1705_vm2, %v4062_v12 }
0x1c60   : > { %5589 = vmatmul.mubr.msk.bf16.vlgmr.msra.gmra.mrb[44].mxu0 %vm1705_vm2, %v4063_v22 }
0x1c61   : > { %5605 = vmatpush3.bf16.msra.mxu0 %v5799_v43 }
0x1c62   : > { %5606 = vmatprep.subr.bf16.mxu0 %v5800_v47 }
0x1c65   : > { %5607 = vmatpush3.bf16.msra.mxu0 %v5800_v47 }
0x1c66   : > { %5608 = vmatprep.subr.bf16.mxu0 %v5801_v49 }
0x1c69   : > { %5609 = vmatpush3.bf16.msra.mxu0 %v5801_v49 }
0x1c6a   : > { %5610 = vmatprep.subr.bf16.mxu0 %v5802_v52 }
0x1c6d   : > { %5611 = vmatpush3.bf16.msra.mxu0 %v5802_v52 }
0x1d33   : > { %v5590_v46 = vpop.f32.mrb[44].mxu0 }
0x1d34   : > { %v4126_v23 = vadd.f32 %v5590_v46, %v5268_v28  ;;  %v4117_v55 = vpop.f32.mrb[45].mxu0 }
0x1d35   : > { %v4118_v30 = vadd.f32 %v5268_v28, %v4117_v55  ;;  %v5591_v37 = vpop.f32.mrb[46].mxu0 }
0x1d36   : > { %v4138_v45 = vmul.f32 0.70710677, %v4126_v23  ;;  %v4129_v44 = vadd.f32 %v5591_v37, %v5268_v28  ;;  %v4120_v18 = vpop.f32.mrb[47].mxu0  ;;  %v4134_v14 = vmul.f32 0.5, %v4126_v23 }
0x1d37   : > { %v4136_v36 = vmul.f32 0.70710677, %v4118_v30  ;;  %v4121_v50 = vadd.f32 %v5268_v28, %v4120_v18  ;;  %v4132_v24 = vmul.f32 0.5, %v4118_v30 }
0x1d38   : > { %5881 = verf.f32 %v4138_v45  ;;  %v4139_v3 = vmul.f32 0.70710677, %v4129_v44  ;;  %v4135_v32 = vmul.f32 0.5, %v4129_v44 }
0x1d39   : > { %5883 = verf.f32 %v4136_v36  ;;  %v4137_v38 = vmul.f32 0.70710677, %v4121_v50  ;;  %v4133_v19 = vmul.f32 0.5, %v4121_v50 }
0x1d3a   : > { %5885 = verf.f32 %v4139_v3  ;;  %v5803_v3 = vld [vmem:[%s7297_s6] sm:$0xff]  }
0x1d3b   : > { %5887 = verf.f32 %v4137_v38  ;;  %4870 = vxpose.xlu1.c.b16.start [1/8] (narrow) %v5803_v3, 32  ;;  %v5804_v38 = vld [vmem:[%s7297_s6 + $0x8] sm:$0xff]  }
0x1d3f   : > { %4871 = vxpose.xlu1.c.b16.cont [2/8] (narrow) %v5804_v38, 32 }
0x1d42   : > { %v5882_v59 = vpop.eup %5881 }
0x1d43   : > { %v5884_v29 = vpop.eup %5883  ;;  %v4146_v39 = vadd.f32 1.0, %v5882_v59  ;;  %v5805_v59 = vld [vmem:[%s7297_s6 + $0x10] sm:$0xff]  }
0x1d44   : > { %v5886_v41 = vpop.eup %5885  ;;  %v4144_v51 = vadd.f32 1.0, %v5884_v29  ;;  %4872 = vxpose.xlu1.c.b16.cont [3/8] (narrow) %v5805_v59, 32  ;;  %v5806_v29 = vld [vmem:[%s7297_s6 + $0x18] sm:$0xff]  }
0x1d45   : > { %v5888_v17 = vpop.eup %5887  ;;  %v4147_v13 = vadd.f32 1.0, %v5886_v41  ;;  %v4150_v20 = vmul.f32 %v4146_v39, %v4134_v14  ;;  %v5807_v39 = vld [vmem:[%s7297_s6 + $0x20] sm:$0xff]   ;;  %v5808_v41 = vld [vmem:[%s7297_s6 + $0x28] sm:$0xff]  }
0x1d46   : > { %v4145_v56 = vadd.f32 1.0, %v5888_v17  ;;  %v4148_v0 = vmul.f32 %v4144_v51, %v4132_v24  ;;  %v5279_v51 = vld [vmem:[%s7298_s4] ss:$0 sm:$0xff]  ;;  %s7078_s4 = scalar_lea.hbm %s6377_s20, %s5304_s17 }
0x1d47   : > { %v4151_v63 = vmul.f32 %v4147_v13, %v4135_v32  ;;  %v5809_v32 = vld [vmem:[%s7297_s6 + $0x30] sm:$0xff]  }
0x1d48   : > { %v4149_v42 = vmul.f32 %v4145_v56, %v4133_v19  ;;  %4873 = vxpose.xlu1.c.b16.cont [4/8] (narrow) %v5806_v29, 32 }
0x1d49   : > { %v4161_v6 = vpack.c.bf16 %v4151_v63, %v4150_v20 }
0x1d4a   : > { %v4160_v31 = vpack.c.bf16 %v4149_v42, %v4148_v0  ;;  %v5810_v42 = vld [vmem:[%s7297_s6 + $0x38] sm:$0xff]   ;;  %s5935_s6 = scalar_lea.vmem %s4997_s3, 16 }
0x1d4b   : > { %p5936_p11 = scmp.ne.s32.totalorder %s4997_s3, %s5935_s6  ;;  %p5943_p1 = scmp.lt.s32.totalorder %s5941_s10, %s5935_s6 }
0x1d4c   : > { %5600 = vmatprep.mubr.msk.bf16.mxu1 %vm4193_vm13, %v4160_v31  ;;  %4874 = vxpose.xlu1.c.b16.cont [5/8] (narrow) %v5807_v39, 32 }
0x1d4d   : > { %5601 = vmatmul.mubr.msk.bf16.vlgmr.msra.gmra.mrb[48].mxu1 %vm4193_vm13, %v4161_v6  ;;  %p5937_p12 = pnand %p5936_p11, %p6422_p5  ;;  %p5944_p2 = por %p5943_p1, %p5942_p0 }
0x1d4e   : > { %5620 = vmatprep.mubr.msk.bf16.mxu1 %vm1846_vm0, %v4589_v40 }
0x1d4f   : > { %p5938_p13 = pneg %p5937_p12 }
0x1d50   : > { %4875 = vxpose.xlu1.c.b16.cont [6/8] (narrow) %v5808_v41, 32 }
0x1d51   : > { %p5945_p3 = pnand %p5944_p2, %p5938_p13 }
0x1d54   : > { %4876 = vxpose.xlu1.c.b16.cont [7/8] (narrow) %v5809_v32, 32 }
0x1d58   : > { %4877 = vxpose.xlu1.c.b16.end [8/8] (narrow) %v5810_v42, 32 }
0x1e20   : > { %v5602_v53 = vpop.f32.mrb[48].mxu1 }
0x1e21   : > { %v4243_v10 = vadd.f32 %v5602_v53, %v5272_v33  ;;  %v4234_v11 = vpop.f32.mrb[49].mxu1 }
0x1e22   : > { %v4235_v58 = vadd.f32 %v5272_v33, %v4234_v11  ;;  %v5603_v60 = vpop.f32.mrb[50].mxu1 }
0x1e23   : > { %v4255_v1 = vmul.f32 0.70710677, %v4243_v10  ;;  %v4246_v2 = vadd.f32 %v5603_v60, %v5272_v33  ;;  %v4237_v57 = vpop.f32.mrb[51].mxu1  ;;  %v4251_v21 = vmul.f32 0.5, %v4243_v10 }
0x1e24   : > { %v4253_v4 = vmul.f32 0.70710677, %v4235_v58  ;;  %v4238_v62 = vadd.f32 %v5272_v33, %v4237_v57  ;;  %v4249_v23 = vmul.f32 0.5, %v4235_v58 }
0x1e25   : > { %5889 = verf.f32 %v4255_v1  ;;  %v4256_v35 = vmul.f32 0.70710677, %v4246_v2  ;;  %v4252_v28 = vmul.f32 0.5, %v4246_v2 }
0x1e26   : > { %5891 = verf.f32 %v4253_v4  ;;  %v4254_v8 = vmul.f32 0.70710677, %v4238_v62  ;;  %v4250_v55 = vmul.f32 0.5, %v4238_v62 }
0x1e27   : > { %5893 = verf.f32 %v4256_v35 }
0x1e28   : > { %5895 = verf.f32 %v4254_v8 }
0x1e2f   : > { %v5890_v27 = vpop.eup %5889 }
0x1e30   : > { %v5892_v12 = vpop.eup %5891  ;;  %v4263_v22 = vadd.f32 1.0, %v5890_v27 }
0x1e31   : > { %v5894_v48 = vpop.eup %5893  ;;  %v4261_v26 = vadd.f32 1.0, %v5892_v12 }
0x1e32   : > { %v5896_v54 = vpop.eup %5895  ;;  %v4264_v46 = vadd.f32 1.0, %v5894_v48  ;;  %v4267_v37 = vmul.f32 %v4263_v22, %v4251_v21 }
0x1e33   : > { %v4262_v30 = vadd.f32 1.0, %v5896_v54  ;;  %v4265_v44 = vmul.f32 %v4261_v26, %v4249_v23 }
0x1e34   : > { %v4268_v45 = vmul.f32 %v4264_v46, %v4252_v28 }
0x1e35   : > { %v4266_v18 = vmul.f32 %v4262_v30, %v4250_v55 }
0x1e36   : > { %v4278_v36 = vpack.c.bf16 %v4268_v45, %v4267_v37 }
0x1e37   : > { %v4277_v50 = vpack.c.bf16 %v4266_v18, %v4265_v44  ;;  %v4427_v44 = vpop.permute.xlu1 %4426 }
0x1e39   : > { %5612 = vmatprep.mubr.msk.bf16.mxu0 %vm4193_vm13, %v4277_v50 }
0x1e3a   : > { %5613 = vmatmul.mubr.msk.bf16.vlgmr.msra.gmra.mrb[48].mxu0 %vm4193_vm13, %v4278_v36 }
0x1e3b   : > { %v4451_v50 = vpop.permute.xlu1 %4450 }
0x1e3f   : > { %v4437_v3 = vpop.permute.xlu1 %4436 }
0x1f0d   : > { %v5614_v17 = vpop.f32.mrb[48].mxu0 }
0x1f0e   : > { %v4350_v14 = vpop.f32.mrb[49].mxu0  ;;  %v4359_v13 = vadd.f32 %v5614_v17, %v5279_v51 }
0x1f0f   : > { %v4351_v24 = vadd.f32 %v5279_v51, %v4350_v14  ;;  %v5615_v19 = vpop.f32.mrb[50].mxu0 }
0x1f10   : > { %v4353_v56 = vpop.f32.mrb[51].mxu0  ;;  %v4362_v63 = vadd.f32 %v5615_v19, %v5279_v51  ;;  %v7013_v6 = vadd.f32 %v4359_v13, %v6953_v15 }
0x1f11   : > { %v7009_v20 = vadd.f32 %v4351_v24, %v6949_v5  ;;  %v4354_v0 = vadd.f32 %v5279_v51, %v4353_v56  ;;  %v4590_v51 = vpop.trf.xlu0  ;;  %v4461_v24 = vpop.permute.xlu1 %4460 }
0x1f12   : > { %v7021_v43 = vadd.f32 %v4362_v63, %v6959_v25  ;;  %v4380_v49 = vsel %vm1705_vm2, %v7013_v6, 0.0 }
0x1f13   : > { %v7016_v31 = vadd.f32 %v4354_v0, %v6955_v16  ;;  %v4377_v40 = vsel %vm1705_vm2, %v7009_v20, 0.0 }
0x1f14   : > { %v4382_v15 = vsel %vm1705_vm2, %v7021_v43, 0.0 }
0x1f15   : > { %v4378_v5 = vsel %vm1705_vm2, %v7016_v31, 0.0 }
0x1f16   : > { %v4379_v47 = vadd.f32 %v4378_v5, %v4377_v40  ;;  %v4591_v40 = vpop.trf.xlu0 }
0x1f18   : > { %v4381_v52 = vadd.f32 %v4380_v49, %v4379_v47  ;;  %v4492_v49 = vpop.permute.xlu1 %4491 }
0x1f1a   : > { %v4383_v16 = vadd.f32 %v4382_v15, %v4381_v52  ;;  %v4592_v47 = vpop.trf.xlu0 }
0x1f1c   : > { %v4384_v33 = vrot.slane %v4383_v16, 4  ;;  %v4497_v52 = vpop.permute.xlu1 %4496 }
0x1f1e   : > { %v4385_v53 = vadd.f32 %v4384_v33, %v4383_v16 }
0x1f20   : > { %v4386_v10 = vrot.slane %v4385_v53, 2  ;;  %v4502_v15 = vpop.permute.xlu1 %4501 }
0x1f22   : > { %v4387_v11 = vadd.f32 %v4386_v10, %v4385_v53 }
0x1f24   : > { %v4388_v58 = vrot.slane %v4387_v11, 1  ;;  %v4507_v16 = vpop.permute.xlu1 %4506 }
0x1f26   : > { %v4389_v25 = vadd.f32 %v4388_v58, %v4387_v11 }
0x1f28   : > { %v4390_v60 = vmul.f32 0.03125, %v4389_v25  ;;  %v4512_v33 = vpop.permute.xlu1 %4511 }
0x1f2a   : > { %v4391_v1 = vsub.f32 %v7009_v20, %v4390_v60  ;;  %v4392_v2 = vsub.f32 %v7016_v31, %v4390_v60  ;;  %v4393_v57 = vsub.f32 %v7013_v6, %v4390_v60  ;;  %v4394_v4 = vsub.f32 %v7021_v43, %v4390_v60 }
0x1f2c   : > { %v4395_v62 = vmul.f32 %v4391_v1, %v4391_v1  ;;  %v4396_v35 = vmul.f32 %v4392_v2, %v4392_v2  ;;  %v4397_v8 = vmul.f32 %v4393_v57, %v4393_v57  ;;  %v4398_v27 = vmul.f32 %v4394_v4, %v4394_v4  ;;  %v4517_v53 = vpop.permute.xlu1 %4516 }
0x1f2e   : > { %v4399_v12 = vsel %vm1705_vm2, %v4395_v62, 0.0  ;;  %v4400_v22 = vsel %vm1705_vm2, %v4396_v35, 0.0  ;;  %v4402_v26 = vsel %vm1705_vm2, %v4397_v8, 0.0  ;;  %v4404_v21 = vsel %vm1705_vm2, %v4398_v27, 0.0 }
0x1f2f   : > { %v4401_v48 = vadd.f32 %v4400_v22, %v4399_v12 }
0x1f30   : > { %v4522_v10 = vpop.permute.xlu1 %4521 }
0x1f31   : > { %v4403_v54 = vadd.f32 %v4402_v26, %v4401_v48 }
0x1f33   : > { %v4405_v28 = vadd.f32 %v4404_v21, %v4403_v54 }
0x1f34   : > { %v4527_v11 = vpop.permute.xlu1 %4526 }
0x1f35   : > { %v4406_v46 = vrot.slane %v4405_v28, 4 }
0x1f37   : > { %v4407_v23 = vadd.f32 %v4406_v46, %v4405_v28 }
0x1f38   : > { %v4532_v58 = vpop.permute.xlu1 %4531 }
0x1f39   : > { %v4408_v55 = vrot.slane %v4407_v23, 2 }
0x1f3b   : > { %v4409_v30 = vadd.f32 %v4408_v55, %v4407_v23 }
0x1f3c   : > { %v4542_v25 = vpop.permute.xlu1 %4541 }
0x1f3d   : > { %v4410_v37 = vrot.slane %v4409_v30, 1 }
0x1f3f   : > { %v4411_v45 = vadd.f32 %v4410_v37, %v4409_v30 }
0x1f40   : > { %v4547_v60 = vpop.permute.xlu1 %4546 }
0x1f41   : > { %v4412_v18 = vmul.f32 0.03125, %v4411_v45 }
0x1f43   : > { %v4413_v36 = vadd.f32 1e-05, %v4412_v18 }
0x1f45   : > { %5897 = vrsqrt.f32 %v4413_v36 }
0x1f4f   : > { %v5898_v38 = vpop.eup %5897 }
0x1f50   : > { %v4416_v59 = vmul.f32 %v5898_v38, %v4392_v2  ;;  %v4415_v29 = vmul.f32 %v5898_v38, %v4391_v1  ;;  %v4417_v39 = vmul.f32 %v5898_v38, %v4393_v57  ;;  %v4418_v41 = vmul.f32 %v5898_v38, %v4394_v4  ;;  %v7048_v1 = vpop.permute.xlu1 %4551 }
0x1f52   : > { %v4439_v17 = vmul.f32 %v6982_v61, %v4415_v29  ;;  %v4440_v14 = vmul.f32 %v4427_v44, %v4416_v59  ;;  %v4441_v32 = vmul.f32 %v6986_v34, %v4417_v39  ;;  %v4442_v13 = vmul.f32 %v4437_v3, %v4418_v41  ;;  %v4593_v61 = vpop.trf.xlu0 }
0x1f54   : > { %v4463_v19 = vadd.f32 %v6984_v7, %v4439_v17  ;;  %v4464_v56 = vadd.f32 %v4451_v50, %v4440_v14  ;;  %v4465_v63 = vadd.f32 %v6988_v9, %v4441_v32  ;;  %v4466_v0 = vadd.f32 %v4461_v24, %v4442_v13  ;;  %v7050_v2 = vpop.permute.xlu1 %4556 }
0x1f56   : > { %v4471_v42 = vpack.c.bf16 %v4464_v56, %v4463_v19  ;;  %v4472_v5 = vpack.c.bf16 %v4466_v0, %v4465_v63  ;;  %v4594_v7 = vpop.trf.xlu0 }
0x1f58   : > { %5616 = vmatprep.subr.bf16.mxu1 %v4471_v42  ;;  %v7052_v57 = vpop.permute.xlu1 %4561 }
0x1f59   : > { %5617 = vmatpush3.bf16.msra.mxu1 %v4471_v42 }
0x1f5a   : > { %5618 = vmatprep.subr.bf16.mxu1 %v4472_v5  ;;  %v4595_v34 = vpop.trf.xlu0 }
0x1f5c   : > { %v7054_v4 = vpop.permute.xlu1 %4566 }
0x1f5d   : > { %5619 = vmatpush3.bf16.msra.mxu1 %v4472_v5 }
0x1f5e   : > { %v4596_v9 = vpop.trf.xlu0 }
0x1f60   : > { %5621 = vmatmul.mubr.msk.bf16.vlgmr.msra.gmra.mrb[52].mxu1 %vm1846_vm0, %v4590_v51  ;;  %v4878_v62 = vpop.trf.xlu1 }
0x1f61   : > { %5624 = vmatprep.mubr.msk.bf16.mxu1 %vm1846_vm0, %v4591_v40  ;;  %5652 = vmatprep.mubr.bf16.mxu0 %v4878_v62 }
0x1f68   : > { %5625 = vmatmul.mubr.msk.bf16.gmra.mrb[56].mxu1 %vm1846_vm0, %v4592_v47 }
0x1f69   : > { %5628 = vmatprep.mubr.msk.bf16.mxu1 %vm1846_vm0, %v4593_v61 }
0x1f70   : > { %5629 = vmatmul.mubr.msk.bf16.gmra.mrb[60].mxu1 %vm1846_vm0, %v4594_v7 }
0x1f71   : > { %5632 = vmatprep.mubr.msk.bf16.mxu1 %vm1846_vm0, %v4595_v34 }
0x1f78   : > { %5633 = vmatmul.mubr.msk.bf16.gmra.mrb[64].mxu1 %vm1846_vm0, %v4596_v9  ;;  %v4537_v9 = vpop.permute.xlu0 %4536 }
0x2033   : > { %v5622_v35 = vpop.f32.mrb[52].mxu1 }
0x2034   : > { %v4664_v8 = vadd.f32 %v5622_v35, %v4502_v15  ;;  %v4655_v27 = vpop.f32.mrb[53].mxu1 }
0x2035   : > { %v4656_v12 = vadd.f32 %v4655_v27, %v4492_v49  ;;  %v5623_v22 = vpop.f32.mrb[54].mxu1 }
0x2036   : > { %v4736_v48 = vmul.f32 0.70710677, %v4664_v8  ;;  %v4667_v26 = vadd.f32 %v5623_v22, %v4507_v16  ;;  %v4658_v54 = vpop.f32.mrb[55].mxu1  ;;  %v4720_v56 = vmul.f32 0.5, %v4664_v8 }
0x2037   : > { %v4734_v21 = vmul.f32 0.70710677, %v4656_v12  ;;  %v4659_v28 = vadd.f32 %v4658_v54, %v4497_v52  ;;  %v4718_v5 = vmul.f32 0.5, %v4656_v12 }
0x2038   : > { %5899 = verf.f32 %v4736_v48  ;;  %v4737_v46 = vmul.f32 0.70710677, %v4667_v26  ;;  %v4721_v63 = vmul.f32 0.5, %v4667_v26 }
0x2039   : > { %5901 = verf.f32 %v4734_v21  ;;  %v4735_v23 = vmul.f32 0.70710677, %v4659_v28  ;;  %v4719_v47 = vmul.f32 0.5, %v4659_v28 }
0x203a   : > { %5903 = verf.f32 %v4737_v46 }
0x203b   : > { %5905 = verf.f32 %v4735_v23  ;;  %v5626_v55 = vpop.f32.mrb[56].mxu1 }
0x203c   : > { %v4680_v30 = vadd.f32 %v5626_v55, %v4522_v10  ;;  %v4671_v37 = vpop.f32.mrb[57].mxu1 }
0x203d   : > { %v7056_v45 = vadd.f32 %v4671_v37, %v4512_v33  ;;  %v5627_v44 = vpop.f32.mrb[58].mxu1 }
0x203e   : > { %v4740_v18 = vmul.f32 0.70710677, %v4680_v30  ;;  %v4683_v36 = vadd.f32 %v5627_v44, %v4527_v11  ;;  %v4674_v50 = vpop.f32.mrb[59].mxu1  ;;  %v4724_v21 = vmul.f32 0.5, %v4680_v30 }
0x203f   : > { %v4738_v3 = vmul.f32 0.70710677, %v7056_v45  ;;  %v4675_v38 = vadd.f32 %v4674_v50, %v4517_v53  ;;  %v4722_v37 = vmul.f32 0.5, %v7056_v45 }
0x2040   : > { %5907 = verf.f32 %v4740_v18  ;;  %v4741_v59 = vmul.f32 0.70710677, %v4683_v36  ;;  %v4725_v28 = vmul.f32 0.5, %v4683_v36 }
0x2041   : > { %5909 = verf.f32 %v4738_v3  ;;  %v4739_v29 = vmul.f32 0.70710677, %v4675_v38  ;;  %v4723_v44 = vmul.f32 0.5, %v4675_v38 }
0x2042   : > { %v5900_v39 = vpop.eup %5899  ;;  %5911 = verf.f32 %v4741_v59 }
0x2043   : > { %v5902_v41 = vpop.eup %5901  ;;  %v4768_v51 = vadd.f32 1.0, %v5900_v39  ;;  %5913 = verf.f32 %v4739_v29  ;;  %v5630_v17 = vpop.f32.mrb[60].mxu1 }
0x2044   : > { %v5904_v14 = vpop.eup %5903  ;;  %v4766_v32 = vadd.f32 1.0, %v5902_v41  ;;  %v7059_v13 = vadd.f32 %v5630_v17, %v4542_v25  ;;  %v4687_v24 = vpop.f32.mrb[61].mxu1 }
0x2045   : > { %v5906_v19 = vpop.eup %5905  ;;  %v4769_v0 = vadd.f32 1.0, %v5904_v14  ;;  %v7061_v42 = vadd.f32 %v4687_v24, %v4532_v58  ;;  %v5631_v40 = vpop.f32.mrb[62].mxu1  ;;  %v4784_v49 = vmul.f32 %v4768_v51, %v4720_v56 }
0x2046   : > { %v4767_v61 = vadd.f32 1.0, %v5906_v19  ;;  %v4744_v7 = vmul.f32 0.70710677, %v7059_v13  ;;  %v4690_v34 = vpop.f32.mrb[63].mxu1  ;;  %v4699_v16 = vadd.f32 %v5631_v40, %v4547_v60  ;;  %v4782_v33 = vmul.f32 %v4766_v32, %v4718_v5 }
0x2047   : > { %v4785_v52 = vmul.f32 %v4769_v0, %v4721_v63  ;;  %v4742_v15 = vmul.f32 0.70710677, %v7061_v42  ;;  %v4691_v10 = vadd.f32 %v4690_v34, %v4537_v9  ;;  %v4728_v56 = vmul.f32 0.5, %v7059_v13 }
0x2048   : > { %v4783_v53 = vmul.f32 %v4767_v61, %v4719_v47  ;;  %5915 = verf.f32 %v4744_v7  ;;  %v4745_v11 = vmul.f32 0.70710677, %v4699_v16  ;;  %v4729_v63 = vmul.f32 0.5, %v4699_v16 }
0x2049   : > { %5917 = verf.f32 %v4742_v15  ;;  %v4815_v58 = vpack.c.bf16 %v4785_v52, %v4784_v49  ;;  %v4743_v62 = vmul.f32 0.70710677, %v4691_v10  ;;  %v4726_v0 = vmul.f32 0.5, %v7061_v42 }
0x204a   : > { %v5908_v25 = vpop.eup %5907  ;;  %v4814_v35 = vpack.c.bf16 %v4783_v53, %v4782_v33  ;;  %5919 = verf.f32 %v4745_v11  ;;  %v4727_v40 = vmul.f32 0.5, %v4691_v10 }
0x204b   : > { %v5910_v8 = vpop.eup %5909  ;;  %v4772_v27 = vadd.f32 1.0, %v5908_v25  ;;  %v5634_v12 = vpop.f32.mrb[64].mxu1  ;;  %5921 = verf.f32 %v4743_v62 }
0x204c   : > { %v5912_v22 = vpop.eup %5911  ;;  %v4770_v48 = vadd.f32 1.0, %v5910_v8  ;;  %v4712_v26 = vadd.f32 %v5634_v12, %v7052_v57  ;;  %v4703_v60 = vpop.f32.mrb[65].mxu1  ;;  %5636 = vmatprep.subr.bf16.mxu0 %v4814_v35 }
0x204d   : > { %v5914_v54 = vpop.eup %5913  ;;  %v4773_v46 = vadd.f32 1.0, %v5912_v22  ;;  %v4704_v23 = vadd.f32 %v4703_v60, %v7048_v1  ;;  %v5635_v55 = vpop.f32.mrb[66].mxu1  ;;  %5637 = vmatpush3.bf16.msra.mxu0 %v4814_v35  ;;  %v4788_v59 = vmul.f32 %v4772_v27, %v4724_v21 }
0x204e   : > { %v4771_v18 = vadd.f32 1.0, %v5914_v54  ;;  %v4748_v50 = vmul.f32 0.70710677, %v4712_v26  ;;  %v4706_v3 = vpop.f32.mrb[67].mxu1  ;;  %5638 = vmatprep.subr.bf16.mxu0 %v4815_v58  ;;  %v4715_v39 = vadd.f32 %v5635_v55, %v7054_v4  ;;  %v4786_v41 = vmul.f32 %v4770_v48, %v4722_v37 }
0x204f   : > { %v4789_v29 = vmul.f32 %v4773_v46, %v4725_v28  ;;  %v4746_v57 = vmul.f32 0.70710677, %v4704_v23  ;;  %v4707_v36 = vadd.f32 %v4706_v3, %v7050_v2  ;;  %v4732_v16 = vmul.f32 0.5, %v4712_v26  ;;  %v4879_v26 = vpop.trf.xlu1 }
0x2050   : > { %v4787_v30 = vmul.f32 %v4771_v18, %v4723_v44  ;;  %5923 = verf.f32 %v4748_v50  ;;  %v4749_v1 = vmul.f32 0.70710677, %v4715_v39  ;;  %v4730_v42 = vmul.f32 0.5, %v4704_v23 }
0x2051   : > { %5925 = verf.f32 %v4746_v57  ;;  %5639 = vmatpush3.bf16.msra.mxu0 %v4815_v58  ;;  %v4817_v51 = vpack.c.bf16 %v4789_v29, %v4788_v59  ;;  %v4747_v38 = vmul.f32 0.70710677, %v4707_v36  ;;  %v4733_v58 = vmul.f32 0.5, %v4715_v39 }
0x2052   : > { %v5916_v45 = vpop.eup %5915  ;;  %v4816_v17 = vpack.c.bf16 %v4787_v30, %v4786_v41  ;;  %5927 = verf.f32 %v4749_v1  ;;  %v4731_v10 = vmul.f32 0.5, %v4707_v36 }
0x2053   : > { %v5918_v14 = vpop.eup %5917  ;;  %v4776_v32 = vadd.f32 1.0, %v5916_v45  ;;  %5929 = verf.f32 %v4747_v38 }
0x2054   : > { %5640 = vmatprep.subr.bf16.mxu0 %v4816_v17  ;;  %v5920_v24 = vpop.eup %5919  ;;  %v4774_v19 = vadd.f32 1.0, %v5918_v14 }
0x2055   : > { %5641 = vmatpush3.bf16.msra.mxu0 %v4816_v17  ;;  %v5922_v4 = vpop.eup %5921  ;;  %v4777_v2 = vadd.f32 1.0, %v5920_v24  ;;  %v4792_v47 = vmul.f32 %v4776_v32, %v4728_v56 }
0x2056   : > { %5642 = vmatprep.subr.bf16.mxu0 %v4817_v51  ;;  %v4775_v5 = vadd.f32 1.0, %v5922_v4  ;;  %v4790_v7 = vmul.f32 %v4774_v19, %v4726_v0 }
0x2057   : > { %v4793_v61 = vmul.f32 %v4777_v2, %v4729_v63 }
0x2058   : > { %v4791_v34 = vmul.f32 %v4775_v5, %v4727_v40 }
0x2059   : > { %5643 = vmatpush3.bf16.msra.mxu0 %v4817_v51  ;;  %v4819_v49 = vpack.c.bf16 %v4793_v61, %v4792_v47 }
0x205a   : > { %v5924_v9 = vpop.eup %5923  ;;  %v4818_v15 = vpack.c.bf16 %v4791_v34, %v4790_v7 }
0x205b   : > { %v5926_v52 = vpop.eup %5925  ;;  %v4780_v33 = vadd.f32 1.0, %v5924_v9 }
0x205c   : > { %v5928_v53 = vpop.eup %5927  ;;  %v4778_v11 = vadd.f32 1.0, %v5926_v52  ;;  %5644 = vmatprep.subr.bf16.mxu0 %v4818_v15 }
0x205d   : > { %v5930_v13 = vpop.eup %5929  ;;  %v4781_v25 = vadd.f32 1.0, %v5928_v53  ;;  %5645 = vmatpush3.bf16.msra.mxu0 %v4818_v15  ;;  %v4796_v35 = vmul.f32 %v4780_v33, %v4732_v16 }
0x205e   : > { %v4779_v62 = vadd.f32 1.0, %v5930_v13  ;;  %5646 = vmatprep.subr.bf16.mxu0 %v4819_v49  ;;  %v4794_v27 = vmul.f32 %v4778_v11, %v4730_v42 }
0x205f   : > { %v4797_v8 = vmul.f32 %v4781_v25, %v4733_v58 }
0x2060   : > { %v4795_v12 = vmul.f32 %v4779_v62, %v4731_v10 }
0x2061   : > { %5647 = vmatpush3.bf16.msra.mxu0 %v4819_v49  ;;  %v4821_v22 = vpack.c.bf16 %v4797_v8, %v4796_v35 }
0x2062   : > { %v4820_v48 = vpack.c.bf16 %v4795_v12, %v4794_v27 }
0x2064   : > { %5648 = vmatprep.subr.bf16.mxu0 %v4820_v48 }
0x2065   : > { %5649 = vmatpush3.bf16.msra.mxu0 %v4820_v48 }
0x2066   : > { %5650 = vmatprep.subr.bf16.mxu0 %v4821_v22 }
0x2069   : > { %5651 = vmatpush3.bf16.msra.mxu0 %v4821_v22 }
0x206c   : > { %5653 = vmatmul.mubr.bf16.vlgmr.msra.gmra.mrb[52].mxu0 %v4879_v26 }
0x206d   : > { %5948 = shalt.err (!%p5945_p3)
}
0x206e   : > { %s5949_s19 = scalar_lea.hbm %s7078_s4, 16  ;;  %s5953_s8 = scalar_lea.hbm %s6377_s20, 32 }
0x206f   : > { %p5950_p4 = scmp.ne.s32.totalorder %s7078_s4, %s5949_s19  ;;  %p5954_p9 = scmp.lt.u32.totalorder %s7078_s4, %s6377_s20 }
0x2070   : > { %p5955_p10 = scmp.lt.u32.totalorder %s5953_s8, %s5949_s19  ;;  %p5957_p12 = scmp.lt.u32.totalorder %s5949_s19, %s7078_s4 }
0x2071   : > { %p5951_p7 = pnand %p5950_p4, %p6422_p5 }
0x2072   : > { %p5956_p11 = por %p5955_p10, %p5954_p9 }
0x2073   : > { %p5952_p8 = pneg %p5951_p7 }
0x2074   : > { %p5958_p0 = por %p5957_p12, %p5956_p11 }
0x2076   : > { %p5959_p13 = pnand %p5958_p0, %p5952_p8 }
0x2078   : > { %5962 = shalt.err (!%p5959_p13)
}
0x2079   : > { %5665 = dma.vmem_to_hbm [thread:$0]  (%p6422_p5), %s4997_s3, 16, %s7078_s4, %s4977_s5  }
0x207a   : > { %s7097_s9 = scalar_lea.hbm %s6382_s27, %s5304_s17  ;;  %s7300_s10 = scalar_lea.vmem [#allocation4], %s6580_s15 }
0x207b   : > { %s5009_s6 = sshll.u32 %s7300_s10, 4  ;;  %s4981_s8 = scalar_lea.sflag [#allocation5], %s6580_s15  ;;  %s5010_s6 = int_to_ptr.vmem [resolvable:$true] %s5009_s6 }
0x207c   : > { %s5963_s19 = scalar_lea.vmem %s5010_s6, 16  ;;  %s6093_s13 = smov [#allocation4]  }
0x207d   : > { %p5964_p1 = scmp.ne.s32.totalorder %s5010_s6, %s5963_s19  ;;  %s5967_s14 = sshll.u32 %s6093_s13, 4  ;;  %s5968_s14 = int_to_ptr.vmem [resolvable:$false] %s5967_s14 }
0x207e   : > { %s5969_s16 = scalar_lea.vmem %s5968_s14, 32  ;;  %p5970_p4 = scmp.lt.s32.totalorder %s5010_s6, %s5968_s14 }
0x207f   : > { %p5965_p2 = pnand %p5964_p1, %p6422_p5  ;;  %p5971_p7 = scmp.lt.s32.totalorder %s5969_s16, %s5963_s19 }
0x2081   : > { %p5966_p3 = pneg %p5965_p2  ;;  %p5972_p8 = por %p5971_p7, %p5970_p4 }
0x2083   : > { %p5973_p9 = pnand %p5972_p8, %p5966_p3 }
0x2085   : > { %5976 = shalt.err (!%p5973_p9)
}
0x2086   : > { %s5977_s4 = scalar_lea.hbm %s7097_s9, 16  ;;  %s5981_s13 = scalar_lea.hbm %s6382_s27, 32 }
0x2087   : > { %p5978_p10 = scmp.ne.s32.totalorder %s7097_s9, %s5977_s4  ;;  %p5982_p0 = scmp.lt.u32.totalorder %s7097_s9, %s6382_s27 }
0x2088   : > { %p5983_p13 = scmp.lt.u32.totalorder %s5981_s13, %s5977_s4  ;;  %p5985_p2 = scmp.lt.u32.totalorder %s5977_s4, %s7097_s9 }
0x2089   : > { %p5979_p11 = pnand %p5978_p10, %p6422_p5 }
0x208a   : > { %p5984_p1 = por %p5983_p13, %p5982_p0 }
0x208b   : > { %p5980_p12 = pneg %p5979_p11 }
0x208c   : > { %p5986_p4 = por %p5985_p2, %p5984_p1 }
0x208e   : > { %p5987_p3 = pnand %p5986_p4, %p5980_p12 }
0x2090   : > { %5990 = shalt.err (!%p5987_p3)
}
0x2091   : > { %5666 = dma.vmem_to_hbm [thread:$0]  (%p6422_p5), %s5010_s6, 16, %s7097_s9, %s4981_s8   ;;  %v4946_v60 = vpop.permute.xlu0 %4945 }
0x2092   : > { %s7301_s14 = sshll.u32 %s6435_s26, 5 }
0x2093   : > { %s1697_s0 = scalar_lea.vmem %s6372_s12, %s7301_s14 }
0x2095   : > { %v4951_v54 = vpop.permute.xlu0 %4950 }
0x2099   : > { %v4956_v21 = vpop.permute.xlu0 %4955 }
0x209d   : > { %v4961_v3 = vpop.permute.xlu0 %4960 }
0x213f   : > { %v5654_v28 = vpop.f32.mrb[52].mxu0 }
0x2140   : > { %v4937_v46 = vadd.f32 %v5654_v28, %v7013_v6  ;;  %v4920_v23 = vpop.f32.mrb[53].mxu0 }
0x2141   : > { %v4935_v55 = vadd.f32 %v4920_v23, %v7009_v20  ;;  %v5655_v37 = vpop.f32.mrb[54].mxu0 }
0x2142   : > { %v4965_v44 = vadd.f32 %v4956_v21, %v4937_v46  ;;  %v4938_v18 = vadd.f32 %v5655_v37, %v7021_v43  ;;  %v4923_v50 = vpop.f32.mrb[55].mxu0 }
0x2143   : > { %v4963_v59 = vadd.f32 %v4946_v60, %v4935_v55  ;;  %v4936_v29 = vadd.f32 %v4923_v50, %v7016_v31 }
0x2144   : > { %4969 = vst.msk [vmem:[%s1697_s0 + $0x10] sm:$0xff] %vm1705_vm2, %v4965_v44  ;;  %v4966_v57 = vadd.f32 %v4961_v3, %v4938_v18 }
0x2145   : > { %4967 = vst.msk [vmem:[%s1697_s0] sm:$0xff] %vm1705_vm2, %v4963_v59  ;;  %v4964_v6 = vadd.f32 %v4951_v54, %v4936_v29 }
0x2146   : > { %4970 = vst.msk [vmem:[%s1697_s0 + $0x18] sm:$0xff] %vm1705_vm2, %v4966_v57 }
0x2147   : > { %4968 = vst.msk [vmem:[%s1697_s0 + $0x8] sm:$0xff] %vm1705_vm2, %v4964_v6 }
0x2148 PF: > { %p5676_p5 = scmp.ge.s32.totalorder %s6029_s7, 2  ;;  %s5029_s22 = sand.u32 1, %s6017_s28  }
0x2149   : > { %s5030_s26 = scalar_lea.sflag [#allocation3], %s5029_s22 }
0x214a   : > { %p5670_p7 = pnand %p5676_p5, %p6426_p6 }
0x214c   : > { %6008 = dma.done.wait (!%p5670_p7), %s5030_s26, 16  }
0x214d   : > { %6010 = vsyncadd (!%p5670_p7), %s5030_s26, 4294967280  ;;  %s5038_s16 = scalar_lea.sflag [#allocation5], %s5029_s22 }
0x214e   : > { %6012 = dma.done.wait (!%p5670_p7), %s5038_s16, 16  }
0x214f   : > { %6014 = vsyncadd (!%p5670_p7), %s5038_s16, 4294967280  ;;  %p127_p8 = scmp.ge.s32.totalorder %s6409_s11, 4   ;;  %s7302_s28 = smov %s6021_s1 }
0x2150   : > { %s7303_s1 = smov %s6025_s2  ;;  %s7304_s2 = smov %s6420_s18 }
0x2151   : > { %s7305_s7 = smov %s6409_s11  ;;  %129 = sbr.rel (!%p127_p8) target bundleno = 133 (0x85), region = 359 }
0x2158   :  { %5042 = vsyncpa [#allocation3], 1 }
0x2159   :  { %5044 = vsyncpa [#allocation3 + $0x1], 1 }
0x215a   :  { %5045 = vsyncpa [#allocation5], 1 }
0x215b   :  { %5047 = vsyncpa [#allocation5 + $0x1], 1 }

</bundles_post_ra>
